<compile_context>
chip_gen: v5e
topology: v5e:2x2
jax: 0.10.0
libtpu: 0.0.40
codegen_flags: <defaults>
</compile_context>

<pallas_src>
import functools
import math

import jax
import jax.numpy as jnp
from jax.experimental import pallas as pl
from jax.experimental.pallas import tpu as pltpu


def _round_up(x, m):
    return ((x + m - 1) // m) * m


def _vmem_limit_bytes():
    """Generation-aware scoped-VMEM limit (~75% of capacity, capped)."""
    try:
        cap = int(pltpu.get_tpu_info().vmem_capacity_bytes)
        if cap <= 0:
            raise ValueError
    except Exception:
        cap = 64 * 1024 * 1024          # conservative fallback (v7x per-core VMEM)
    return int(min(cap * 3 // 4, 100 * 1024 * 1024))


def _pick_tile(n_pad, target, fits=lambda t: True):
    """Largest multiple of 128 <= target that divides n_pad and fits in VMEM."""
    t = min(target, n_pad)
    t -= t % 128
    t = max(t, 128)
    while t > 128 and (n_pad % t != 0 or not fits(t)):
        t -= 128
    return t


# --------------------------------------------------------------------------- #
# Kernel 1: row-tiled MLP encoder + classifier (log_softmax) + row-normalized
# encodings for the similarity pass.  Weight refs arrive already in the matmul
# operand dtype (pre-cast in prepare_params); biases stay f32 (added to the f32
# accumulator; negligible bytes).
# --------------------------------------------------------------------------- #
def _mlp_kernel(x_ref, w1_ref, b1_ref, w2_ref, b2_ref, wc_ref, bc_ref,
                logits_ref, enc_hat_ref, *, eps, hidden_true):
    md = w1_ref.dtype                     # matmul operand dtype (f32 or bf16)

    # ---- Linear1 -> exact GELU (erf; matches torch.nn.functional.gelu) -----
    h = jnp.dot(x_ref[...], w1_ref[...],
                preferred_element_type=jnp.float32) + b1_ref[...]
    inv_sqrt2 = jnp.float32(1.0 / math.sqrt(2.0))
    h = 0.5 * h * (1.0 + jax.lax.erf(h * inv_sqrt2))

    # ---- LayerNorm over the TRUE hidden width ------------------------------
    # Padded hidden columns of h are exactly 0 (zero-padded w1 cols / b1), so
    # the sum is already correct; only the centering needs a mask.
    inv_h = jnp.float32(1.0 / hidden_true)
    mean = jnp.sum(h, axis=-1, keepdims=True) * inv_h
    if h.shape[-1] != hidden_true:
        col = jax.lax.broadcasted_iota(jnp.int32, h.shape, 1)
        centered = jnp.where(col < hidden_true, h - mean, 0.0)
    else:
        centered = h - mean
    var = jnp.sum(centered * centered, axis=-1, keepdims=True) * inv_h
    hn = centered * jax.lax.rsqrt(var + jnp.float32(eps))

    # TODO(synk): Dropout(p=0.6) omitted (identity / eval mode).

    # ---- Linear2 -> encoded features ---------------------------------------
    enc = jnp.dot(hn.astype(md), w2_ref[...],
                  preferred_element_type=jnp.float32) + b2_ref[...]

    # ---- classifier + log_softmax (padded class cols carry a -1e30 bias) ---
    logits = jnp.dot(enc.astype(md), wc_ref[...],
                     preferred_element_type=jnp.float32) + bc_ref[...]
    m = jnp.max(logits, axis=-1, keepdims=True)
    z = logits - m
    lse = jnp.log(jnp.sum(jnp.exp(z), axis=-1, keepdims=True))
    logits_ref[...] = z - lse

    # ---- row-normalized encodings for the cosine-similarity pass -----------
    nrm_sq = jnp.sum(enc * enc, axis=-1, keepdims=True)
    enc_hat = enc * jax.lax.rsqrt(nrm_sq + jnp.float32(1e-30))
    enc_hat_ref[...] = enc_hat.astype(enc_hat_ref.dtype)


# --------------------------------------------------------------------------- #
# Kernel 2: (i, j)-tiled similarity matrix sim = enc_hat @ enc_hat^T with the
# diagonal zeroed only on tiles that intersect it.
# --------------------------------------------------------------------------- #
def _sim_kernel(er_ref, ec_ref, sim_ref):
    # Contract the last dims of both operands -> no explicit transpose.
    sim = jax.lax.dot_general(er_ref[...], ec_ref[...],
                              (((1,), (1,)), ((), ())),
                              preferred_element_type=jnp.float32)
    sim_ref[...] = sim

    @pl.when(pl.program_id(0) == pl.program_id(1))
    def _():
        tm, tn = sim.shape                 # square tile by construction
        r = jax.lax.broadcasted_iota(jnp.int32, (tm, tn), 0)
        c = jax.lax.broadcasted_iota(jnp.int32, (tm, tn), 1)
        sim_ref[...] = jnp.where(r == c, 0.0, sim)


# --------------------------------------------------------------------------- #
# One-time parameter preparation (hoisted out of the per-call forward):
# pad weights to lane-dense (multiple-of-128) shapes and pre-cast the matmul
# operands to `matmul_dtype`.
# --------------------------------------------------------------------------- #
def prepare_params(params, matmul_dtype=jnp.float32):
    f, hdim = params["w1"].shape
    c = params["wc"].shape[1]
    f_pad = _round_up(f, 128)
    h_pad = _round_up(hdim, 128)
    c_pad = _round_up(c, 128)
    f32 = jnp.float32

    w1 = jnp.zeros((f_pad, h_pad), f32).at[:f, :hdim].set(params["w1"])
    w2 = jnp.zeros((h_pad, h_pad), f32).at[:hdim, :hdim].set(params["w2"])
    wc = jnp.zeros((h_pad, c_pad), f32).at[:hdim, :c].set(params["wc"])
    b1 = jnp.zeros((1, h_pad), f32).at[:, :hdim].set(params["b1"].reshape(1, hdim))
    b2 = jnp.zeros((1, h_pad), f32).at[:, :hdim].set(params["b2"].reshape(1, hdim))
    # padded classes get a huge negative bias so they vanish in log_softmax
    bc = jnp.full((1, c_pad), -1e30, f32).at[:, :c].set(params["bc"].reshape(1, c))

    return {
        "w1": w1.astype(matmul_dtype), "w2": w2.astype(matmul_dtype),
        "wc": wc.astype(matmul_dtype),
        "b1": b1, "b2": b2, "bc": bc,                 # biases stay f32
        "num_features": f, "hidden_dim": hdim, "num_classes": c,
        "matmul_dtype": matmul_dtype,
    }


# --------------------------------------------------------------------------- #
# Forward pass: two tiled pallas_calls, padding sliced off at the end.
# --------------------------------------------------------------------------- #
def graphmlp_forward(x, prep, eps=1e-6, row_tile=512, sim_tile=512):
    n, f = x.shape
    assert f == prep["num_features"]
    md = prep["matmul_dtype"]
    hdim, c = prep["hidden_dim"], prep["num_classes"]
    f_pad, h_pad = prep["w1"].shape
    c_pad = prep["wc"].shape[1]
    md_bytes = jnp.dtype(md).itemsize

    vmem_limit = _vmem_limit_bytes()

    # N is padded only to the lane requirement (128) of the sim output; tiles
    # are then chosen as divisors of n_pad -> no tile-sized row padding
    # (previously linear waste in kernel 1 and quadratic waste in kernel 2).
    n_pad = _round_up(n, 128)

    def mlp_fits(t):
        # resident weights (single-buffered) + double-buffered x/out tiles +
        # ~5 f32 intermediates of width h_pad per row; keep under ~60% budget.
        weights = (f_pad * h_pad + h_pad * h_pad + h_pad * c_pad) * md_bytes
        per_row = (2 * f_pad * md_bytes + 2 * (c_pad * 4 + h_pad * md_bytes)
                   + 5 * h_pad * 4 + c_pad * 4)
        return weights + t * per_row < 0.6 * vmem_limit

    def sim_fits(t):
        per = 2 * 2 * t * h_pad * md_bytes + 2 * t * t * 4
        return per < 0.6 * vmem_limit

    # Kernel-1 row tile: keep >= 2 tiles on the parallel axis when possible so
    # both TensorCores get work on v7x (no-op on single-TC v5e/v6e).
    row_target = min(row_tile, n_pad // 2) if n_pad >= 256 else row_tile
    tm = _pick_tile(n_pad, row_target, mlp_fits)
    # Kernel 2 is HBM-bound: bigger tiles cut column-operand re-reads.
    tk = _pick_tile(n_pad, sim_tile, sim_fits)
    num_row_tiles = n_pad // tm

    xp = jnp.zeros((n_pad, f_pad), md).at[:n, :f].set(x.astype(md))

    whole = lambda i: (0, 0)

    def run_mlp(single_buffer_weights):
        if single_buffer_weights:
            # Block index never changes -> the default double buffer is pure
            # VMEM waste; request a single buffer.
            wspec = lambda shape: pl.BlockSpec(shape, whole,
                                               pipeline_mode=pl.Buffered(1))
        else:
            wspec = lambda shape: pl.BlockSpec(shape, whole)
        return pl.pallas_call(
            functools.partial(_mlp_kernel, eps=eps, hidden_true=hdim),
            grid_spec=pltpu.PrefetchScalarGridSpec(
                num_scalar_prefetch=0,
                grid=(num_row_tiles,),
                in_specs=[
                    pl.BlockSpec((tm, f_pad), lambda i: (i, 0)),   # x rows
                    wspec((f_pad, h_pad)),                         # w1
                    wspec((1, h_pad)),                             # b1
                    wspec((h_pad, h_pad)),                         # w2
                    wspec((1, h_pad)),                             # b2
                    wspec((h_pad, c_pad)),                         # wc
                    wspec((1, c_pad)),                             # bc
                ],
                out_specs=[
                    pl.BlockSpec((tm, c_pad), lambda i: (i, 0)),   # log_softmax
                    pl.BlockSpec((tm, h_pad), lambda i: (i, 0)),   # enc_hat
                ],
            ),
            out_shape=(
                jax.ShapeDtypeStruct((n_pad, c_pad), jnp.float32),
                jax.ShapeDtypeStruct((n_pad, h_pad), md),
            ),
            compiler_params=pltpu.CompilerParams(
                dimension_semantics=("parallel",),
                vmem_limit_bytes=vmem_limit,
            ),
        )(xp, prep["w1"], prep["b1"], prep["w2"], prep["b2"],
          prep["wc"], prep["bc"])

    try:
        logits_pad, enc_hat = run_mlp(True)
    except Exception:
        # Fallback if this JAX/Mosaic build rejects single-buffered blocks.
        logits_pad, enc_hat = run_mlp(False)

    sim_pad = pl.pallas_call(
        _sim_kernel,
        grid_spec=pltpu.PrefetchScalarGridSpec(
            num_scalar_prefetch=0,
            grid=(n_pad // tk, n_pad // tk),
            in_specs=[
                pl.BlockSpec((tk, h_pad), lambda i, j: (i, 0)),    # row tile
                pl.BlockSpec((tk, h_pad), lambda i, j: (j, 0)),    # col tile
            ],
            out_specs=pl.BlockSpec((tk, tk), lambda i, j: (i, j)),
        ),
        out_shape=jax.ShapeDtypeStruct((n_pad, n_pad), jnp.float32),
        compiler_params=pltpu.CompilerParams(
            dimension_semantics=("parallel", "parallel"),
            vmem_limit_bytes=vmem_limit,
        ),
    )(enc_hat, enc_hat)

    return logits_pad[:n, :c], sim_pad[:n, :n]


# --------------------------------------------------------------------------- #
# Deterministic synthetic init mirroring the module's _init_weights.
# --------------------------------------------------------------------------- #
def init_params(key, num_features, hidden_dim, num_classes, eps=1e-6):
    ks = jax.random.split(key, 6)

    def xavier(k, fan_in, fan_out):
        limit = math.sqrt(6.0 / (fan_in + fan_out))
        return jax.random.uniform(k, (fan_in, fan_out), jnp.float32, -limit, limit)

    return {
        "w1": xavier(ks[0], num_features, hidden_dim),
        "b1": (eps * jax.random.normal(ks[1], (1, hidden_dim))).astype(jnp.float32),
        "w2": xavier(ks[2], hidden_dim, hidden_dim),
        "b2": (eps * jax.random.normal(ks[3], (1, hidden_dim))).astype(jnp.float32),
        "wc": xavier(ks[4], hidden_dim, num_classes),
        "bc": (0.01 * jax.random.normal(ks[5], (1, num_classes))).astype(jnp.float32),
    }


def _reference(x, p, eps=1e-6):
    h = x @ p["w1"] + p["b1"]
    h = jax.nn.gelu(h, approximate=False)
    mean = jnp.mean(h, axis=-1, keepdims=True)
    var = jnp.mean((h - mean) ** 2, axis=-1, keepdims=True)
    h = (h - mean) / jnp.sqrt(var + eps)
    enc = h @ p["w2"] + p["b2"]
    sim = enc @ enc.T
    nrm = jnp.sqrt(jnp.sum(enc * enc, axis=1, keepdims=True))
    sim = sim / (nrm * nrm.T)
    sim = sim * (1.0 - jnp.eye(sim.shape[0]))
    logits = enc @ p["wc"] + p["bc"]
    return jax.nn.log_softmax(logits, axis=1), sim


if __name__ == "__main__":
    N, F, H, C = 8, 16, 32, 4          # 8 nodes, 16 features, hidden 32, 4 classes
    EPS = 1e-6

    key = jax.random.PRNGKey(0)
    kx, kp = jax.random.split(key)
    x = jax.random.normal(kx, (N, F), jnp.float32)
    params = init_params(kp, F, H, C, eps=EPS)
    ref_lp, ref_sim = _reference(x, params, eps=EPS)

    # --- f32 operand path: reference precision (1e-4) -----------------------
    prep_f32 = prepare_params(params, matmul_dtype=jnp.float32)
    log_probs, sim = graphmlp_forward(x, prep_f32, eps=EPS)
    jax.block_until_ready((log_probs, sim))
    assert log_probs.shape == (N, C) and sim.shape == (N, N)
    assert jnp.allclose(log_probs, ref_lp, atol=1e-4, rtol=1e-4)
    assert jnp.allclose(sim, ref_sim, atol=1e-4, rtol=1e-4)

    # --- bf16 operand path (f32 accumulation): MXU-native throughput --------
    prep_bf16 = prepare_params(params, matmul_dtype=jnp.bfloat16)
    lp16, sim16 = graphmlp_forward(x, prep_bf16, eps=EPS)
    jax.block_until_ready((lp16, sim16))
    assert jnp.allclose(lp16, ref_lp, atol=1e-1, rtol=1e-1)
    assert jnp.allclose(sim16, ref_sim, atol=1e-1, rtol=1e-1)

    print("KERNEL_OK")
</pallas_src>

<mosaic_0001>
module attributes {stable_mosaic.version = 11 : i64} {
  func.func @_mlp_kernel(%arg0: i32, %arg1: memref<128x128xf32, #tpu.memory_space<vmem>>, %arg2: memref<128x128xf32, #tpu.memory_space<vmem>>, %arg3: memref<1x128xf32, #tpu.memory_space<vmem>>, %arg4: memref<128x128xf32, #tpu.memory_space<vmem>>, %arg5: memref<1x128xf32, #tpu.memory_space<vmem>>, %arg6: memref<128x128xf32, #tpu.memory_space<vmem>>, %arg7: memref<1x128xf32, #tpu.memory_space<vmem>>, %arg8: memref<128x128xf32, #tpu.memory_space<vmem>>, %arg9: memref<128x128xf32, #tpu.memory_space<vmem>>) attributes {dimension_semantics = [#tpu.dimension_semantics<parallel>], iteration_bounds = array<i64: 1>, scalar_prefetch = 0 : i64, scratch_operands = 0 : i64, tpu.core_type = #tpu.core_type<tc>, window_params = [{transform_indices = @transform_0, window_bounds = array<i64: 128, 128>}, {pipeline_mode = #tpu.pipeline_mode<synchronous>, transform_indices = @transform_1, window_bounds = array<i64: 128, 128>}, {pipeline_mode = #tpu.pipeline_mode<synchronous>, transform_indices = @transform_2, window_bounds = array<i64: 1, 128>}, {pipeline_mode = #tpu.pipeline_mode<synchronous>, transform_indices = @transform_3, window_bounds = array<i64: 128, 128>}, {pipeline_mode = #tpu.pipeline_mode<synchronous>, transform_indices = @transform_4, window_bounds = array<i64: 1, 128>}, {pipeline_mode = #tpu.pipeline_mode<synchronous>, transform_indices = @transform_5, window_bounds = array<i64: 128, 128>}, {pipeline_mode = #tpu.pipeline_mode<synchronous>, transform_indices = @transform_6, window_bounds = array<i64: 1, 128>}, {transform_indices = @transform_7, window_bounds = array<i64: 128, 128>}, {transform_indices = @transform_8, window_bounds = array<i64: 128, 128>}]} {
    %c0 = arith.constant 0 : index
    %c0_0 = arith.constant 0 : index
    %0 = vector.load %arg1[%c0, %c0_0] : memref<128x128xf32, #tpu.memory_space<vmem>>, vector<128x128xf32>
    %c0_1 = arith.constant 0 : index
    %c0_2 = arith.constant 0 : index
    %1 = vector.load %arg2[%c0_1, %c0_2] : memref<128x128xf32, #tpu.memory_space<vmem>>, vector<128x128xf32>
    %cst = arith.constant dense<0.000000e+00> : vector<128x128xf32>
    %2 = tpu.matmul %0, %1, %cst {dimension_numbers = #tpu.dot_dimension_numbers<[1], [0], [0], [1], [0, 0, 1, 1], [], []>} : vector<128x128xf32>, vector<128x128xf32>, vector<128x128xf32> -> vector<128x128xf32>
    %c0_3 = arith.constant 0 : index
    %c0_4 = arith.constant 0 : index
    %3 = vector.load %arg3[%c0_3, %c0_4] : memref<1x128xf32, #tpu.memory_space<vmem>>, vector<1x128xf32>
    %4 = vector.broadcast %3 : vector<1x128xf32> to vector<128x128xf32>
    %5 = arith.addf %2, %4 : vector<128x128xf32>
    %cst_5 = arith.constant 5.000000e-01 : f32
    %6 = vector.broadcast %cst_5 : f32 to vector<128x128xf32>
    %7 = arith.mulf %6, %5 : vector<128x128xf32>
    %cst_6 = arith.constant 0.707106769 : f32
    %8 = vector.broadcast %cst_6 : f32 to vector<128x128xf32>
    %9 = arith.mulf %5, %8 : vector<128x128xf32>
    %10 = math.erf %9 : vector<128x128xf32>
    %cst_7 = arith.constant 1.000000e+00 : f32
    %11 = vector.broadcast %cst_7 : f32 to vector<128x128xf32>
    %12 = arith.addf %11, %10 : vector<128x128xf32>
    %13 = arith.mulf %7, %12 : vector<128x128xf32>
    %cst_8 = arith.constant dense<0.000000e+00> : vector<128xf32>
    %14 = vector.multi_reduction <add>, %13, %cst_8 [1] : vector<128x128xf32> to vector<128xf32>
    %15 = vector.shape_cast %14 : vector<128xf32> to vector<128x1xf32>
    %cst_9 = arith.constant 3.125000e-02 : f32
    %16 = vector.broadcast %cst_9 : f32 to vector<128x1xf32>
    %17 = arith.mulf %15, %16 : vector<128x1xf32>
    %18 = tpu.iota {dimensions = array<i32: 1>} : vector<128x128xi32>
    %c32_i32 = arith.constant 32 : i32
    %19 = vector.broadcast %c32_i32 : i32 to vector<128x128xi32>
    %20 = arith.cmpi slt, %18, %19 : vector<128x128xi32>
    %21 = vector.broadcast %17 : vector<128x1xf32> to vector<128x128xf32>
    %22 = arith.subf %13, %21 : vector<128x128xf32>
    %cst_10 = arith.constant 0.000000e+00 : f32
    %23 = vector.broadcast %cst_10 : f32 to vector<128x128xf32>
    %24 = arith.select %20, %22, %23 : vector<128x128xi1>, vector<128x128xf32>
    %25 = arith.mulf %24, %24 : vector<128x128xf32>
    %cst_11 = arith.constant dense<0.000000e+00> : vector<128xf32>
    %26 = vector.multi_reduction <add>, %25, %cst_11 [1] : vector<128x128xf32> to vector<128xf32>
    %27 = vector.shape_cast %26 : vector<128xf32> to vector<128x1xf32>
    %cst_12 = arith.constant 3.125000e-02 : f32
    %28 = vector.broadcast %cst_12 : f32 to vector<128x1xf32>
    %29 = arith.mulf %27, %28 : vector<128x1xf32>
    %cst_13 = arith.constant 9.99999997E-7 : f32
    %30 = vector.broadcast %cst_13 : f32 to vector<128x1xf32>
    %31 = arith.addf %29, %30 : vector<128x1xf32>
    %32 = math.rsqrt %31 : vector<128x1xf32>
    %33 = vector.broadcast %32 : vector<128x1xf32> to vector<128x128xf32>
    %34 = arith.mulf %24, %33 : vector<128x128xf32>
    %c0_14 = arith.constant 0 : index
    %c0_15 = arith.constant 0 : index
    %35 = vector.load %arg4[%c0_14, %c0_15] : memref<128x128xf32, #tpu.memory_space<vmem>>, vector<128x128xf32>
    %cst_16 = arith.constant dense<0.000000e+00> : vector<128x128xf32>
    %36 = tpu.matmul %34, %35, %cst_16 {dimension_numbers = #tpu.dot_dimension_numbers<[1], [0], [0], [1], [0, 0, 1, 1], [], []>} : vector<128x128xf32>, vector<128x128xf32>, vector<128x128xf32> -> vector<128x128xf32>
    %c0_17 = arith.constant 0 : index
    %c0_18 = arith.constant 0 : index
    %37 = vector.load %arg5[%c0_17, %c0_18] : memref<1x128xf32, #tpu.memory_space<vmem>>, vector<1x128xf32>
    %38 = vector.broadcast %37 : vector<1x128xf32> to vector<128x128xf32>
    %39 = arith.addf %36, %38 : vector<128x128xf32>
    %c0_19 = arith.constant 0 : index
    %c0_20 = arith.constant 0 : index
    %40 = vector.load %arg6[%c0_19, %c0_20] : memref<128x128xf32, #tpu.memory_space<vmem>>, vector<128x128xf32>
    %cst_21 = arith.constant dense<0.000000e+00> : vector<128x128xf32>
    %41 = tpu.matmul %39, %40, %cst_21 {dimension_numbers = #tpu.dot_dimension_numbers<[1], [0], [0], [1], [0, 0, 1, 1], [], []>} : vector<128x128xf32>, vector<128x128xf32>, vector<128x128xf32> -> vector<128x128xf32>
    %c0_22 = arith.constant 0 : index
    %c0_23 = arith.constant 0 : index
    %42 = vector.load %arg7[%c0_22, %c0_23] : memref<1x128xf32, #tpu.memory_space<vmem>>, vector<1x128xf32>
    %43 = vector.broadcast %42 : vector<1x128xf32> to vector<128x128xf32>
    %44 = arith.addf %41, %43 : vector<128x128xf32>
    %cst_24 = arith.constant dense<0xFF800000> : vector<128xf32>
    %45 = vector.multi_reduction <maximumf>, %44, %cst_24 [1] : vector<128x128xf32> to vector<128xf32>
    %46 = vector.shape_cast %45 : vector<128xf32> to vector<128x1xf32>
    %47 = vector.broadcast %46 : vector<128x1xf32> to vector<128x128xf32>
    %48 = arith.subf %44, %47 : vector<128x128xf32>
    %49 = math.exp %48 : vector<128x128xf32>
    %cst_25 = arith.constant dense<0.000000e+00> : vector<128xf32>
    %50 = vector.multi_reduction <add>, %49, %cst_25 [1] : vector<128x128xf32> to vector<128xf32>
    %51 = vector.shape_cast %50 : vector<128xf32> to vector<128x1xf32>
    %52 = math.log %51 : vector<128x1xf32>
    %53 = vector.broadcast %52 : vector<128x1xf32> to vector<128x128xf32>
    %54 = arith.subf %48, %53 : vector<128x128xf32>
    %c0_26 = arith.constant 0 : index
    %c0_27 = arith.constant 0 : index
    %55 = vector.load %arg8[%c0_26, %c0_27] : memref<128x128xf32, #tpu.memory_space<vmem>>, vector<128x128xf32>
    tpu.vector_store %arg8[%c0_26, %c0_27], %54 {strides = array<i32>} : memref<128x128xf32, #tpu.memory_space<vmem>>, vector<128x128xf32>,
    %56 = arith.mulf %39, %39 : vector<128x128xf32>
    %cst_28 = arith.constant dense<0.000000e+00> : vector<128xf32>
    %57 = vector.multi_reduction <add>, %56, %cst_28 [1] : vector<128x128xf32> to vector<128xf32>
    %58 = vector.shape_cast %57 : vector<128xf32> to vector<128x1xf32>
    %cst_29 = arith.constant 1.000000e-30 : f32
    %59 = vector.broadcast %cst_29 : f32 to vector<128x1xf32>
    %60 = arith.addf %58, %59 : vector<128x1xf32>
    %61 = math.rsqrt %60 : vector<128x1xf32>
    %62 = vector.broadcast %61 : vector<128x1xf32> to vector<128x128xf32>
    %63 = arith.mulf %39, %62 : vector<128x128xf32>
    %c0_30 = arith.constant 0 : index
    %c0_31 = arith.constant 0 : index
    %64 = vector.load %arg9[%c0_30, %c0_31] : memref<128x128xf32, #tpu.memory_space<vmem>>, vector<128x128xf32>
    tpu.vector_store %arg9[%c0_30, %c0_31], %63 {strides = array<i32>} : memref<128x128xf32, #tpu.memory_space<vmem>>, vector<128x128xf32>,
    return
  }
  func.func @transform_0(%arg0: i32) -> (i32, i32) {
    %c0_i32 = arith.constant 0 : i32
    %c0_i32_0 = arith.constant 0 : i32
    return %arg0, %c0_i32 : i32, i32
  }
  func.func @transform_1(%arg0: i32) -> (i32, i32) {
    %c0_i32 = arith.constant 0 : i32
    %c0_i32_0 = arith.constant 0 : i32
    %c0_i32_1 = arith.constant 0 : i32
    return %c0_i32, %c0_i32_0 : i32, i32
  }
  func.func @transform_2(%arg0: i32) -> (i32, i32) {
    %c0_i32 = arith.constant 0 : i32
    %c0_i32_0 = arith.constant 0 : i32
    %c0_i32_1 = arith.constant 0 : i32
    return %c0_i32, %c0_i32_0 : i32, i32
  }
  func.func @transform_3(%arg0: i32) -> (i32, i32) {
    %c0_i32 = arith.constant 0 : i32
    %c0_i32_0 = arith.constant 0 : i32
    %c0_i32_1 = arith.constant 0 : i32
    return %c0_i32, %c0_i32_0 : i32, i32
  }
  func.func @transform_4(%arg0: i32) -> (i32, i32) {
    %c0_i32 = arith.constant 0 : i32
    %c0_i32_0 = arith.constant 0 : i32
    %c0_i32_1 = arith.constant 0 : i32
    return %c0_i32, %c0_i32_0 : i32, i32
  }
  func.func @transform_5(%arg0: i32) -> (i32, i32) {
    %c0_i32 = arith.constant 0 : i32
    %c0_i32_0 = arith.constant 0 : i32
    %c0_i32_1 = arith.constant 0 : i32
    return %c0_i32, %c0_i32_0 : i32, i32
  }
  func.func @transform_6(%arg0: i32) -> (i32, i32) {
    %c0_i32 = arith.constant 0 : i32
    %c0_i32_0 = arith.constant 0 : i32
    %c0_i32_1 = arith.constant 0 : i32
    return %c0_i32, %c0_i32_0 : i32, i32
  }
  func.func @transform_7(%arg0: i32) -> (i32, i32) {
    %c0_i32 = arith.constant 0 : i32
    %c0_i32_0 = arith.constant 0 : i32
    return %arg0, %c0_i32 : i32, i32
  }
  func.func @transform_8(%arg0: i32) -> (i32, i32) {
    %c0_i32 = arith.constant 0 : i32
    %c0_i32_0 = arith.constant 0 : i32
    return %arg0, %c0_i32 : i32, i32
  }
}

module attributes {stable_mosaic.version = 11 : i64} {
  func.func @_mlp_kernel(%arg0: i32, %arg1: memref<128x128xf32, #tpu.memory_space<vmem>>, %arg2: memref<128x128xf32, #tpu.memory_space<vmem>>, %arg3: memref<1x128xf32, #tpu.memory_space<vmem>>, %arg4: memref<128x128xf32, #tpu.memory_space<vmem>>, %arg5: memref<1x128xf32, #tpu.memory_space<vmem>>, %arg6: memref<128x128xf32, #tpu.memory_space<vmem>>, %arg7: memref<1x128xf32, #tpu.memory_space<vmem>>, %arg8: memref<128x128xf32, #tpu.memory_space<vmem>>, %arg9: memref<128x128xf32, #tpu.memory_space<vmem>>) attributes {dimension_semantics = [#tpu.dimension_semantics<parallel>], iteration_bounds = array<i64: 1>, scalar_prefetch = 0 : i64, scratch_operands = 0 : i64, tpu.core_type = #tpu.core_type<tc>, window_params = [{transform_indices = @transform_0, window_bounds = array<i64: 128, 128>}, {pipeline_mode = #tpu.pipeline_mode<synchronous>, transform_indices = @transform_1, window_bounds = array<i64: 128, 128>}, {pipeline_mode = #tpu.pipeline_mode<synchronous>, transform_indices = @transform_2, window_bounds = array<i64: 1, 128>}, {pipeline_mode = #tpu.pipeline_mode<synchronous>, transform_indices = @transform_3, window_bounds = array<i64: 128, 128>}, {pipeline_mode = #tpu.pipeline_mode<synchronous>, transform_indices = @transform_4, window_bounds = array<i64: 1, 128>}, {pipeline_mode = #tpu.pipeline_mode<synchronous>, transform_indices = @transform_5, window_bounds = array<i64: 128, 128>}, {pipeline_mode = #tpu.pipeline_mode<synchronous>, transform_indices = @transform_6, window_bounds = array<i64: 1, 128>}, {transform_indices = @transform_7, window_bounds = array<i64: 128, 128>}, {transform_indices = @transform_8, window_bounds = array<i64: 128, 128>}]} {
    %c0 = arith.constant 0 : index
    %c0_0 = arith.constant 0 : index
    %0 = vector.load %arg1[%c0, %c0_0] : memref<128x128xf32, #tpu.memory_space<vmem>>, vector<128x128xf32>
    %c0_1 = arith.constant 0 : index
    %c0_2 = arith.constant 0 : index
    %1 = vector.load %arg2[%c0_1, %c0_2] : memref<128x128xf32, #tpu.memory_space<vmem>>, vector<128x128xf32>
    %cst = arith.constant dense<0.000000e+00> : vector<128x128xf32>
    %2 = tpu.matmul %0, %1, %cst {dimension_numbers = #tpu.dot_dimension_numbers<[1], [0], [0], [1], [0, 0, 1, 1], [], []>} : vector<128x128xf32>, vector<128x128xf32>, vector<128x128xf32> -> vector<128x128xf32>
    %c0_3 = arith.constant 0 : index
    %c0_4 = arith.constant 0 : index
    %3 = vector.load %arg3[%c0_3, %c0_4] : memref<1x128xf32, #tpu.memory_space<vmem>>, vector<1x128xf32>
    %4 = vector.broadcast %3 : vector<1x128xf32> to vector<128x128xf32>
    %5 = arith.addf %2, %4 : vector<128x128xf32>
    %cst_5 = arith.constant 5.000000e-01 : f32
    %6 = vector.broadcast %cst_5 : f32 to vector<128x128xf32>
    %7 = arith.mulf %6, %5 : vector<128x128xf32>
    %cst_6 = arith.constant 0.707106769 : f32
    %8 = vector.broadcast %cst_6 : f32 to vector<128x128xf32>
    %9 = arith.mulf %5, %8 : vector<128x128xf32>
    %10 = math.erf %9 : vector<128x128xf32>
    %cst_7 = arith.constant 1.000000e+00 : f32
    %11 = vector.broadcast %cst_7 : f32 to vector<128x128xf32>
    %12 = arith.addf %11, %10 : vector<128x128xf32>
    %13 = arith.mulf %7, %12 : vector<128x128xf32>
    %cst_8 = arith.constant dense<0.000000e+00> : vector<128xf32>
    %14 = vector.multi_reduction <add>, %13, %cst_8 [1] : vector<128x128xf32> to vector<128xf32>
    %15 = vector.shape_cast %14 : vector<128xf32> to vector<128x1xf32>
    %cst_9 = arith.constant 3.125000e-02 : f32
    %16 = vector.broadcast %cst_9 : f32 to vector<128x1xf32>
    %17 = arith.mulf %15, %16 : vector<128x1xf32>
    %18 = tpu.iota {dimensions = array<i32: 1>} : vector<128x128xi32>
    %c32_i32 = arith.constant 32 : i32
    %19 = vector.broadcast %c32_i32 : i32 to vector<128x128xi32>
    %20 = arith.cmpi slt, %18, %19 : vector<128x128xi32>
    %21 = vector.broadcast %17 : vector<128x1xf32> to vector<128x128xf32>
    %22 = arith.subf %13, %21 : vector<128x128xf32>
    %cst_10 = arith.constant 0.000000e+00 : f32
    %23 = vector.broadcast %cst_10 : f32 to vector<128x128xf32>
    %24 = arith.select %20, %22, %23 : vector<128x128xi1>, vector<128x128xf32>
    %25 = arith.mulf %24, %24 : vector<128x128xf32>
    %cst_11 = arith.constant dense<0.000000e+00> : vector<128xf32>
    %26 = vector.multi_reduction <add>, %25, %cst_11 [1] : vector<128x128xf32> to vector<128xf32>
    %27 = vector.shape_cast %26 : vector<128xf32> to vector<128x1xf32>
    %cst_12 = arith.constant 3.125000e-02 : f32
    %28 = vector.broadcast %cst_12 : f32 to vector<128x1xf32>
    %29 = arith.mulf %27, %28 : vector<128x1xf32>
    %cst_13 = arith.constant 9.99999997E-7 : f32
    %30 = vector.broadcast %cst_13 : f32 to vector<128x1xf32>
    %31 = arith.addf %29, %30 : vector<128x1xf32>
    %32 = math.rsqrt %31 : vector<128x1xf32>
    %33 = vector.broadcast %32 : vector<128x1xf32> to vector<128x128xf32>
    %34 = arith.mulf %24, %33 : vector<128x128xf32>
    %c0_14 = arith.constant 0 : index
    %c0_15 = arith.constant 0 : index
    %35 = vector.load %arg4[%c0_14, %c0_15] : memref<128x128xf32, #tpu.memory_space<vmem>>, vector<128x128xf32>
    %cst_16 = arith.constant dense<0.000000e+00> : vector<128x128xf32>
    %36 = tpu.matmul %34, %35, %cst_16 {dimension_numbers = #tpu.dot_dimension_numbers<[1], [0], [0], [1], [0, 0, 1, 1], [], []>} : vector<128x128xf32>, vector<128x128xf32>, vector<128x128xf32> -> vector<128x128xf32>
    %c0_17 = arith.constant 0 : index
    %c0_18 = arith.constant 0 : index
    %37 = vector.load %arg5[%c0_17, %c0_18] : memref<1x128xf32, #tpu.memory_space<vmem>>, vector<1x128xf32>
    %38 = vector.broadcast %37 : vector<1x128xf32> to vector<128x128xf32>
    %39 = arith.addf %36, %38 : vector<128x128xf32>
    %c0_19 = arith.constant 0 : index
    %c0_20 = arith.constant 0 : index
    %40 = vector.load %arg6[%c0_19, %c0_20] : memref<128x128xf32, #tpu.memory_space<vmem>>, vector<128x128xf32>
    %cst_21 = arith.constant dense<0.000000e+00> : vector<128x128xf32>
    %41 = tpu.matmul %39, %40, %cst_21 {dimension_numbers = #tpu.dot_dimension_numbers<[1], [0], [0], [1], [0, 0, 1, 1], [], []>} : vector<128x128xf32>, vector<128x128xf32>, vector<128x128xf32> -> vector<128x128xf32>
    %c0_22 = arith.constant 0 : index
    %c0_23 = arith.constant 0 : index
    %42 = vector.load %arg7[%c0_22, %c0_23] : memref<1x128xf32, #tpu.memory_space<vmem>>, vector<1x128xf32>
    %43 = vector.broadcast %42 : vector<1x128xf32> to vector<128x128xf32>
    %44 = arith.addf %41, %43 : vector<128x128xf32>
    %cst_24 = arith.constant dense<0xFF800000> : vector<128xf32>
    %45 = vector.multi_reduction <maximumf>, %44, %cst_24 [1] : vector<128x128xf32> to vector<128xf32>
    %46 = vector.shape_cast %45 : vector<128xf32> to vector<128x1xf32>
    %47 = vector.broadcast %46 : vector<128x1xf32> to vector<128x128xf32>
    %48 = arith.subf %44, %47 : vector<128x128xf32>
    %49 = math.exp %48 : vector<128x128xf32>
    %cst_25 = arith.constant dense<0.000000e+00> : vector<128xf32>
    %50 = vector.multi_reduction <add>, %49, %cst_25 [1] : vector<128x128xf32> to vector<128xf32>
    %51 = vector.shape_cast %50 : vector<128xf32> to vector<128x1xf32>
    %52 = math.log %51 : vector<128x1xf32>
    %53 = vector.broadcast %52 : vector<128x1xf32> to vector<128x128xf32>
    %54 = arith.subf %48, %53 : vector<128x128xf32>
    %c0_26 = arith.constant 0 : index
    %c0_27 = arith.constant 0 : index
    %55 = vector.load %arg8[%c0_26, %c0_27] : memref<128x128xf32, #tpu.memory_space<vmem>>, vector<128x128xf32>
    tpu.vector_store %arg8[%c0_26, %c0_27], %54 {strides = array<i32>} : memref<128x128xf32, #tpu.memory_space<vmem>>, vector<128x128xf32>,
    %56 = arith.mulf %39, %39 : vector<128x128xf32>
    %cst_28 = arith.constant dense<0.000000e+00> : vector<128xf32>
    %57 = vector.multi_reduction <add>, %56, %cst_28 [1] : vector<128x128xf32> to vector<128xf32>
    %58 = vector.shape_cast %57 : vector<128xf32> to vector<128x1xf32>
    %cst_29 = arith.constant 1.000000e-30 : f32
    %59 = vector.broadcast %cst_29 : f32 to vector<128x1xf32>
    %60 = arith.addf %58, %59 : vector<128x1xf32>
    %61 = math.rsqrt %60 : vector<128x1xf32>
    %62 = vector.broadcast %61 : vector<128x1xf32> to vector<128x128xf32>
    %63 = arith.mulf %39, %62 : vector<128x128xf32>
    %c0_30 = arith.constant 0 : index
    %c0_31 = arith.constant 0 : index
    %64 = vector.load %arg9[%c0_30, %c0_31] : memref<128x128xf32, #tpu.memory_space<vmem>>, vector<128x128xf32>
    tpu.vector_store %arg9[%c0_30, %c0_31], %63 {strides = array<i32>} : memref<128x128xf32, #tpu.memory_space<vmem>>, vector<128x128xf32>,
    return
  }
  func.func @transform_0(%arg0: i32) -> (i32, i32) {
    %c0_i32 = arith.constant 0 : i32
    %c0_i32_0 = arith.constant 0 : i32
    return %arg0, %c0_i32 : i32, i32
  }
  func.func @transform_1(%arg0: i32) -> (i32, i32) {
    %c0_i32 = arith.constant 0 : i32
    %c0_i32_0 = arith.constant 0 : i32
    %c0_i32_1 = arith.constant 0 : i32
    return %c0_i32, %c0_i32_0 : i32, i32
  }
  func.func @transform_2(%arg0: i32) -> (i32, i32) {
    %c0_i32 = arith.constant 0 : i32
    %c0_i32_0 = arith.constant 0 : i32
    %c0_i32_1 = arith.constant 0 : i32
    return %c0_i32, %c0_i32_0 : i32, i32
  }
  func.func @transform_3(%arg0: i32) -> (i32, i32) {
    %c0_i32 = arith.constant 0 : i32
    %c0_i32_0 = arith.constant 0 : i32
    %c0_i32_1 = arith.constant 0 : i32
    return %c0_i32, %c0_i32_0 : i32, i32
  }
  func.func @transform_4(%arg0: i32) -> (i32, i32) {
    %c0_i32 = arith.constant 0 : i32
    %c0_i32_0 = arith.constant 0 : i32
    %c0_i32_1 = arith.constant 0 : i32
    return %c0_i32, %c0_i32_0 : i32, i32
  }
  func.func @transform_5(%arg0: i32) -> (i32, i32) {
    %c0_i32 = arith.constant 0 : i32
    %c0_i32_0 = arith.constant 0 : i32
    %c0_i32_1 = arith.constant 0 : i32
    return %c0_i32, %c0_i32_0 : i32, i32
  }
  func.func @transform_6(%arg0: i32) -> (i32, i32) {
    %c0_i32 = arith.constant 0 : i32
    %c0_i32_0 = arith.constant 0 : i32
    %c0_i32_1 = arith.constant 0 : i32
    return %c0_i32, %c0_i32_0 : i32, i32
  }
  func.func @transform_7(%arg0: i32) -> (i32, i32) {
    %c0_i32 = arith.constant 0 : i32
    %c0_i32_0 = arith.constant 0 : i32
    return %arg0, %c0_i32 : i32, i32
  }
  func.func @transform_8(%arg0: i32) -> (i32, i32) {
    %c0_i32 = arith.constant 0 : i32
    %c0_i32_0 = arith.constant 0 : i32
    return %arg0, %c0_i32 : i32, i32
  }
}

</mosaic_0001>

<bundles_post_ra>
// kernel: tpu_custom_call.1
= control target key start
LH: loop header
LB: loop body
LE: loop exit
PB: predicated region body
PF: predicated region fallthrough
CT: control target
= control target key end

     0   :  { %14 = vsyncpa [#allocation3], 0  ;;  %s3460_s0 = inlined_call_operand.hbm [shape: f32[128,128], index: 0, kind: input, shape index: {}]   ;;  %s3461_s1 = inlined_call_operand.hbm [shape: f32[128,128], index: 1, kind: input, shape index: {}]   ;;  %s3462_s2 = inlined_call_operand.vmem [shape: f32[1,128], index: 2, kind: input, shape index: {}]   ;;  %s3463_s3 = inlined_call_operand.hbm [shape: f32[128,128], index: 3, kind: input, shape index: {}]   ;;  %s3464_s4 = inlined_call_operand.vmem [shape: f32[1,128], index: 4, kind: input, shape index: {}]   ;;  %s3465_s5 = inlined_call_operand.hbm [shape: f32[128,128], index: 5, kind: input, shape index: {}]   ;;  %s3466_s6 = inlined_call_operand.vmem [shape: f32[1,128], index: 6, kind: input, shape index: {}]   ;;  %s3467_s7 = inlined_call_operand.hbm [shape: f32[128,128], index: 7, kind: output, shape index: {0}]   ;;  %s3468_s8 = inlined_call_operand.hbm [shape: f32[128,128], index: 8, kind: output, shape index: {1}]  }
   0x1   :  { %15 = vsyncpa [#allocation6], 0 }
   0x2   :  { %16 = vsyncpa [#allocation9], 0 }
   0x3   :  { %17 = vsyncpa [#allocation4], 0 }
   0x4   :  { %18 = vsyncpa [#allocation12], 0  ;;  %s36_s29 = sshll.u32 %s3461_s1, 4  ;;  %s2268_s30 = smov [#allocation5]   ;;  %s37_s29 = int_to_ptr.hbm [resolvable:$true] %s36_s29 }
   0x5   :  { %s38_s9 = sshll.u32 %s2268_s30, 4  ;;  %s23_s12 = sshll.u32 %s3460_s0, 4  ;;  %s39_s9 = int_to_ptr.vmem [resolvable:$true] %s38_s9  ;;  %s24_s12 = int_to_ptr.hbm [resolvable:$true] %s23_s12 }
   0x6   :  { %s2269_s13 = smov 128   ;;  %s2270_s14 = smov 8  }
   0x7   :  { %44 = dma.hbm_to_vmem [thread:$0]  %s37_s29, 2048, %s39_s9, [#allocation6], %s2269_s13, %s2269_s13, %s2270_s14  }
   0x8   :  { %s2271_s15 = smov [#allocation2]   ;;  %s51_s1 = sshll.u32 %s3463_s3, 4  ;;  %s52_s1 = int_to_ptr.hbm [resolvable:$true] %s51_s1 }
   0x9   :  { %s25_s16 = sshll.u32 %s2271_s15, 4  ;;  %s66_s20 = sshll.u32 %s3465_s5, 4  ;;  %s26_s16 = int_to_ptr.vmem [resolvable:$true] %s25_s16  ;;  %s67_s20 = int_to_ptr.hbm [resolvable:$true] %s66_s20 }
   0xa   :  { %31 = dma.hbm_to_vmem [thread:$0]  %s24_s12, 2048, %s26_s16, [#allocation3], %s2269_s13, %s2269_s13, %s2270_s14  }
   0xb   :  { %s2272_s21 = smov [#allocation7]   ;;  %s2273_s23 = smov [#allocation8]  }
   0xc   :  { %s53_s22 = sshll.u32 %s2272_s21, 4  ;;  %s68_s3 = sshll.u32 %s2273_s23, 4  ;;  %s54_s22 = int_to_ptr.vmem [resolvable:$true] %s53_s22  ;;  %s69_s3 = int_to_ptr.vmem [resolvable:$true] %s68_s3 }
   0xd   :  { %59 = dma.hbm_to_vmem [thread:$0]  %s52_s1, 2048, %s54_s22, [#allocation6], %s2269_s13, %s2269_s13, %s2270_s14  }
   0xe   :  { %74 = dma.hbm_to_vmem [thread:$0]  %s67_s20, 2048, %s69_s3, [#allocation9], %s2269_s13, %s2269_s13, %s2270_s14  }
   0xf   :  { %2258 = dma.done.wait [#allocation3], 2048  }
  0x10   :  { %2259 = vsyncadd [#allocation3], 4294965248 }
  0x11   :  { %2260 = dma.done.wait [#allocation6], 4096  }
  0x12   :  { %2261 = vsyncadd [#allocation6], 4294963200 }
  0x13   :  { %2262 = dma.done.wait [#allocation9], 2048  }
  0x14   :  { %2263 = vsyncadd [#allocation9], 4294965248  ;;  %v124_v0 = vld [vmem:[#allocation5 + $0x78] sm:$0xff]  ;;  %v123_v1 = vld [vmem:[#allocation5 + $0x70] sm:$0xff]  ;;  %s1858_s10 = sshll.u32 %s3468_s8, 4  ;;  %s2275_s8 = smov [#allocation10]   ;;  %s1859_s10 = int_to_ptr.hbm [resolvable:$true] %s1858_s10 }
  0x15   :  { %129 = vmatpush.msra.mxu0 %v124_v0  ;;  %1894 = vmatpush.msra.mxu3 %v124_v0  ;;  %v122_v2 = vld [vmem:[#allocation5 + $0x68] sm:$0xff]  ;;  %v121_v3 = vld [vmem:[#allocation5 + $0x60] sm:$0xff]  ;;  %v120_v4 = vld [vmem:[#allocation5 + $0x58] sm:$0xff]  ;;  %s1843_s11 = sshll.u32 %s2275_s8, 4  ;;  %s1845_s16 = sshll.u32 %s3467_s7, 4  ;;  %s1844_s11 = int_to_ptr.vmem [resolvable:$true] %s1843_s11  ;;  %s1846_s16 = int_to_ptr.hbm [resolvable:$true] %s1845_s16 }
  0x16   :  { %v119_v5 = vld [vmem:[#allocation5 + $0x50] sm:$0xff]  ;;  %v118_v6 = vld [vmem:[#allocation5 + $0x48] sm:$0xff]  ;;  %v117_v7 = vld [vmem:[#allocation5 + $0x40] sm:$0xff] }
  0x17   :  { %130 = vmatpush.msra.mxu0 %v123_v1  ;;  %1895 = vmatpush.msra.mxu3 %v123_v1  ;;  %v116_v8 = vld [vmem:[#allocation5 + $0x38] sm:$0xff]  ;;  %v115_v9 = vld [vmem:[#allocation5 + $0x30] sm:$0xff]  ;;  %v114_v10 = vld [vmem:[#allocation5 + $0x28] sm:$0xff] }
  0x18   :  { %v113_v11 = vld [vmem:[#allocation5 + $0x20] sm:$0xff]  ;;  %v112_v12 = vld [vmem:[#allocation5 + $0x18] sm:$0xff]  ;;  %v111_v13 = vld [vmem:[#allocation5 + $0x10] sm:$0xff] }
  0x19   :  { %131 = vmatpush.msra.mxu0 %v122_v2  ;;  %1896 = vmatpush.msra.mxu3 %v122_v2  ;;  %v110_v14 = vld [vmem:[#allocation5 + $0x8] sm:$0xff]  ;;  %v109_v15 = vld [vmem:[#allocation5] sm:$0xff]  ;;  %v95_v18 = vld [vmem:[#allocation2 + $0x10] sm:$0xff] }
  0x1a   :  { %v93_v16 = vld [vmem:[#allocation2] sm:$0xff]  ;;  %v94_v17 = vld [vmem:[#allocation2 + $0x8] sm:$0xff]  ;;  %v96_v20 = vld [vmem:[#allocation2 + $0x18] sm:$0xff] }
  0x1b   :  { %132 = vmatpush.msra.mxu0 %v121_v3  ;;  %1897 = vmatpush.msra.mxu3 %v121_v3  ;;  %v105_v19 = vld [vmem:[#allocation2 + $0x60] sm:$0xff]  ;;  %v106_v21 = vld [vmem:[#allocation2 + $0x68] sm:$0xff]  ;;  %v107_v23 = vld [vmem:[#allocation2 + $0x70] sm:$0xff] }
  0x1c   :  { %v97_v22 = vld [vmem:[#allocation2 + $0x20] sm:$0xff]  ;;  %v98_v24 = vld [vmem:[#allocation2 + $0x28] sm:$0xff]  ;;  %v108_v25 = vld [vmem:[#allocation2 + $0x78] sm:$0xff] }
  0x1d   :  { %133 = vmatpush.msra.mxu0 %v120_v4  ;;  %1898 = vmatpush.msra.mxu3 %v120_v4  ;;  %v99_v26 = vld [vmem:[#allocation2 + $0x30] sm:$0xff]  ;;  %v100_v27 = vld [vmem:[#allocation2 + $0x38] sm:$0xff]  ;;  %v101_v28 = vld [vmem:[#allocation2 + $0x40] sm:$0xff] }
  0x1e   :  { %v102_v29 = vld [vmem:[#allocation2 + $0x48] sm:$0xff]  ;;  %v103_v30 = vld [vmem:[#allocation2 + $0x50] sm:$0xff]  ;;  %v104_v31 = vld [vmem:[#allocation2 + $0x58] sm:$0xff] }
  0x1f   :  { %134 = vmatpush.msra.mxu0 %v119_v5  ;;  %1899 = vmatpush.msra.mxu3 %v119_v5  ;;  %v2348_v32 = vld [vmem:[%s3462_s2] ss:$0 sm:$0xff] }
  0x21   :  { %135 = vmatpush.msra.mxu0 %v118_v6  ;;  %1900 = vmatpush.msra.mxu3 %v118_v6 }
  0x23   :  { %136 = vmatpush.msra.mxu0 %v117_v7  ;;  %1901 = vmatpush.msra.mxu3 %v117_v7 }
  0x25   :  { %137 = vmatpush.msra.mxu0 %v116_v8  ;;  %1902 = vmatpush.msra.mxu3 %v116_v8 }
  0x27   :  { %138 = vmatpush.msra.mxu0 %v115_v9  ;;  %1903 = vmatpush.msra.mxu3 %v115_v9 }
  0x29   :  { %139 = vmatpush.msra.mxu0 %v114_v10  ;;  %1904 = vmatpush.msra.mxu3 %v114_v10 }
  0x2b   :  { %140 = vmatpush.msra.mxu0 %v113_v11  ;;  %1905 = vmatpush.msra.mxu3 %v113_v11 }
  0x2d   :  { %141 = vmatpush.msra.mxu0 %v112_v12  ;;  %1906 = vmatpush.msra.mxu3 %v112_v12 }
  0x2f   :  { %142 = vmatpush.msra.mxu0 %v111_v13  ;;  %1907 = vmatpush.msra.mxu3 %v111_v13 }
  0x31   :  { %143 = vmatpush.msra.mxu0 %v110_v14  ;;  %1908 = vmatpush.msra.mxu3 %v110_v14 }
  0x33   :  { %144 = vmatpush.msra.mxu0 %v109_v15  ;;  %1909 = vmatpush.msra.mxu3 %v109_v15 }
  0x34   :  { %145 = vmatmul.f32.vlgmr.msra.gmra.mxu0 %v93_v16  ;;  %181 = vmatmul.f32.vlgmr.msra.gmra.mxu3 %v105_v19 }
  0x3c   :  { %148 = vmatmul.f32.gmra.mxu0 %v94_v17  ;;  %184 = vmatmul.f32.gmra.mxu3 %v106_v21 }
  0x44   :  { %151 = vmatmul.f32.gmra.mxu0 %v95_v18  ;;  %187 = vmatmul.f32.gmra.mxu3 %v107_v23 }
  0x4c   :  { %154 = vmatmul.f32.gmra.mxu0 %v96_v20  ;;  %190 = vmatmul.f32.gmra.mxu3 %v108_v25 }
  0x54   :  { %157 = vmatmul.f32.gmra.mxu0 %v97_v22 }
  0x5c   :  { %160 = vmatmul.f32.gmra.mxu0 %v98_v24 }
  0x64   :  { %163 = vmatmul.f32.gmra.mxu0 %v99_v26 }
  0x6c   :  { %166 = vmatmul.f32.gmra.mxu0 %v100_v27 }
  0x74   :  { %169 = vmatmul.f32.gmra.mxu0 %v101_v28 }
  0x7c   :  { %172 = vmatmul.f32.gmra.mxu0 %v102_v29 }
  0x84   :  { %175 = vmatmul.f32.gmra.mxu0 %v103_v30 }
  0x8c   :  { %178 = vmatmul.f32.gmra.mxu0 %v104_v31 }
  0xb1   :  { %v146_v33 = vpop.f32.mrf.mxu0 }
  0xb2   :  { %v2351_v34 = vadd.f32 %v2348_v32, %v146_v33 }
  0xb4   :  { %v2354_v35 = vmul.f32 0.70710677, %v2351_v34 }
  0xb6   :  { %v226_v36 = vmul.f32 %v2354_v35, %v2354_v35 }
  0xb7   :  { %v182_v16 = vpop.f32.mrf.mxu3 }
  0xb8   :  { %v227_v37 = vmin.f32 %v226_v36, 16.0  ;;  %v2394_v21 = vadd.f32 %v2348_v32, %v182_v16 }
  0xb9   :  { %v149_v38 = vpop.f32.mrf.mxu0 }
  0xba   :  { %v228_v39 = vmul.f32 2.1237322e-06, %v227_v37  ;;  %v2359_v40 = vadd.f32 %v2348_v32, %v149_v38  ;;  %v239_v41 = vmul.f32 3.8918573e-05, %v227_v37  ;;  %v2410_v36 = vmul.f32 0.70710677, %v2394_v21 }
  0xbc   :  { %v229_v42 = vadd.f32 0.00028619796, %v228_v39  ;;  %v2362_v43 = vmul.f32 0.70710677, %v2359_v40  ;;  %v240_v44 = vadd.f32 0.001143296, %v239_v41 }
  0xbd   :  { %v2413_v39 = vmul.f32 0.5, %v2351_v34 }
  0xbe   :  { %v230_v45 = vmul.f32 %v229_v42, %v227_v37  ;;  %v266_v46 = vmul.f32 %v2362_v43, %v2362_v43  ;;  %v241_v47 = vmul.f32 %v240_v44, %v227_v37 }
  0xc0   :  { %v231_v48 = vadd.f32 0.0036580483, %v230_v45  ;;  %v2366_v49 = vmin.f32 %v266_v46, 16.0  ;;  %v242_v51 = vadd.f32 0.014752088, %v241_v47 }
  0xc1   :  { %v152_v50 = vpop.f32.mrf.mxu0 }
  0xc2   :  { %v232_v52 = vmul.f32 %v231_v48, %v227_v37  ;;  %v268_v53 = vmul.f32 2.1237322e-06, %v2366_v49  ;;  %v2370_v54 = vadd.f32 %v2348_v32, %v152_v50  ;;  %v279_v55 = vmul.f32 3.8918573e-05, %v2366_v49 }
  0xc3   :  { %v243_v56 = vmul.f32 %v242_v51, %v227_v37 }
  0xc4   :  { %v269_v57 = vadd.f32 0.00028619796, %v268_v53  ;;  %v2374_v58 = vmul.f32 0.70710677, %v2370_v54  ;;  %v280_v60 = vadd.f32 0.001143296, %v279_v55 }
  0xc5   :  { %v244_v59 = vadd.f32 0.112945676, %v243_v56  ;;  %v233_v61 = vadd.f32 0.05243302, %v232_v52  ;;  %v185_v52 = vpop.f32.mrf.mxu3 }
  0xc6   :  { %v270_v62 = vmul.f32 %v269_v57, %v2366_v49  ;;  %v306_v63 = vmul.f32 %v2374_v58, %v2374_v58  ;;  %v281_v1 = vmul.f32 %v280_v60, %v2366_v49  ;;  %v706_v57 = vmul.f32 %v2410_v36, %v2410_v36 }
  0xc7   :  { %v245_v0 = vmul.f32 %v244_v59, %v227_v37  ;;  %v234_v7 = vmul.f32 %v233_v61, %v227_v37 }
  0xc8   :  { %v271_v2 = vadd.f32 0.0036580483, %v270_v62  ;;  %v2380_v3 = vmin.f32 %v306_v63, 16.0  ;;  %v282_v6 = vadd.f32 0.014752088, %v281_v1  ;;  %v2432_v1 = vadd.f32 %v2348_v32, %v185_v52 }
  0xc9   :  { %v155_v4 = vpop.f32.mrf.mxu0  ;;  %v246_v5 = vadd.f32 0.4994258, %v245_v0  ;;  %v235_v17 = vadd.f32 0.18741608, %v234_v7 }
  0xca   :  { %v272_v8 = vmul.f32 %v271_v2, %v2366_v49  ;;  %v2384_v9 = vadd.f32 %v2348_v32, %v155_v4  ;;  %v308_v10 = vmul.f32 2.1237322e-06, %v2380_v3  ;;  %v283_v12 = vmul.f32 %v282_v6, %v2366_v49 }
  0xcb   :  { %v247_v11 = vmul.f32 %v246_v5, %v227_v37  ;;  %v236_v26 = vmul.f32 %v235_v17, %v227_v37  ;;  %v319_v31 = vmul.f32 3.8918573e-05, %v2380_v3  ;;  %v2448_v17 = vmul.f32 0.70710677, %v2432_v1 }
  0xcc   :  { %v273_v13 = vadd.f32 0.05243302, %v272_v8  ;;  %v2389_v14 = vmul.f32 0.70710677, %v2384_v9  ;;  %v284_v18 = vadd.f32 0.112945676, %v283_v12 }
  0xcd   :  { %v248_v15 = vadd.f32 1.0, %v247_v11  ;;  %v309_v19 = vadd.f32 0.00028619796, %v308_v10  ;;  %v237_v44 = vadd.f32 1.1283791, %v236_v26  ;;  %v2443_v12 = vmin.f32 %v706_v57, 16.0 }
  0xce   :  { %v346_v20 = vmul.f32 %v2389_v14, %v2389_v14  ;;  %v274_v22 = vmul.f32 %v273_v13, %v2366_v49  ;;  %v285_v25 = vmul.f32 %v284_v18, %v2366_v49  ;;  %v320_v53 = vadd.f32 0.001143296, %v319_v31 }
  0xcf   :  { %1953 = vrcp.f32 %v248_v15  ;;  %v310_v28 = vmul.f32 %v309_v19, %v2380_v3  ;;  %v258_v47 = vand.u32 2147483647, %v248_v15  ;;  %v260_v56 = vand.u32 2147483648, %v248_v15 }
  0xd0   :  { %v2397_v23 = vmin.f32 %v346_v20, 16.0  ;;  %v286_v30 = vadd.f32 0.4994258, %v285_v25  ;;  %v275_v37 = vadd.f32 0.18741608, %v274_v22  ;;  %v238_v2 = vmul.f32 %v237_v44, %v2354_v35 }
  0xd1   :  { %v158_v24 = vpop.f32.mrf.mxu0  ;;  %v311_v48 = vadd.f32 0.0036580483, %v310_v28  ;;  %vm254_vm1 = vweird.f32 %v248_v15  ;;  %vm259_vm3 = vcmp.eq.f32.partialorder %v258_v47, 8.507059e+37  ;;  %v261_v11 = vor.u32 1.1754944e-38, %v260_v56 }
  0xd2   :  { %v2401_v27 = vadd.f32 %v2348_v32, %v158_v24  ;;  %v348_v29 = vmul.f32 2.1237322e-06, %v2397_v23  ;;  %v287_v42 = vmul.f32 %v286_v30, %v2366_v49  ;;  %v276_v59 = vmul.f32 %v275_v37, %v2366_v49 }
  0xd3   :  { %v312_v4 = vmul.f32 %v311_v48, %v2380_v3  ;;  %v321_v49 = vmul.f32 %v320_v53, %v2380_v3  ;;  %v359_v5 = vmul.f32 3.8918573e-05, %v2397_v23  ;;  %v708_v28 = vmul.f32 2.1237322e-06, %v2443_v12 }
  0xd4   :  { %v2407_v33 = vmul.f32 0.70710677, %v2401_v27  ;;  %v349_v41 = vadd.f32 0.00028619796, %v348_v29  ;;  %v2419_v51 = vadd.f32 1.0, %v287_v42  ;;  %v746_v44 = vmul.f32 %v2448_v17, %v2448_v17 }
  0xd5   :  { %v1954_v38 = vpop.eup %1953  ;;  %v277_v35 = vadd.f32 1.1283791, %v276_v59  ;;  %v313_v19 = vadd.f32 0.05243302, %v312_v4  ;;  %v360_v22 = vadd.f32 0.001143296, %v359_v5 }
  0xd6   :  { %v386_v45 = vmul.f32 %v2407_v33, %v2407_v33  ;;  %v250_v46 = vmul.f32 %v1954_v38, %v248_v15  ;;  %v350_v50 = vmul.f32 %v349_v41, %v2397_v23  ;;  %vm255_vm0 = vweird.f32 %v1954_v38 }
  0xd7   :  { %1955 = vrcp.f32 %v2419_v51  ;;  %vm256_vm2 = vmor %vm254_vm1, %vm255_vm0  ;;  %v322_v15 = vadd.f32 0.014752088, %v321_v49  ;;  %vm294_vm4 = vweird.f32 %v2419_v51  ;;  %v298_v47 = vand.u32 2147483647, %v2419_v51 }
  0xd8   :  { %v2421_v55 = vmin.f32 %v386_v45, 16.0  ;;  %v251_v34 = vsub.f32 1.0, %v250_v46  ;;  %v351_v60 = vadd.f32 0.0036580483, %v350_v50  ;;  %v709_v45 = vadd.f32 0.00028619796, %v708_v28 }
  0xd9   :  { %v161_v61 = vpop.f32.mrf.mxu0  ;;  %v314_v48 = vmul.f32 %v313_v19, %v2380_v3  ;;  %v278_v4 = vmul.f32 %v277_v35, %v2362_v43  ;;  %vm299_vm7 = vcmp.eq.f32.partialorder %v298_v47, 8.507059e+37 }
  0xda   :  { %v388_v62 = vmul.f32 2.1237322e-06, %v2421_v55  ;;  %v2429_v63 = vadd.f32 %v2348_v32, %v161_v61  ;;  %v252_v0 = vmul.f32 %v1954_v38, %v251_v34  ;;  %v352_v10 = vmul.f32 %v351_v60, %v2397_v23 }
  0xdb   :  { %v710_v56 = vmul.f32 %v709_v45, %v2443_v12  ;;  %v315_v5 = vadd.f32 0.18741608, %v314_v48 }
  0xdc   :  { %v389_v6 = vadd.f32 0.00028619796, %v388_v62  ;;  %v2439_v7 = vmul.f32 0.70710677, %v2429_v63  ;;  %v253_v8 = vadd.f32 %v1954_v38, %v252_v0  ;;  %v353_v29 = vadd.f32 0.05243302, %v352_v10 }
  0xdd   :  { %v1956_v18 = vpop.eup %1955  ;;  %v711_v10 = vadd.f32 0.0036580483, %v710_v56  ;;  %v2520_v0 = vmul.f32 0.5, %v2401_v27 }
  0xde   :  { %v426_v13 = vmul.f32 %v2439_v7, %v2439_v7  ;;  %v257_v16 = vsel %vm256_vm2, %v1954_v38, %v253_v8  ;;  %v390_v24 = vmul.f32 %v389_v6, %v2421_v55  ;;  %v290_v31 = vmul.f32 %v1956_v18, %v2419_v51 }
  0xdf   :  { %v262_v20 = vsel %vm259_vm3, %v261_v11, %v257_v16  ;;  %v300_v38 = vand.u32 2147483648, %v2419_v51  ;;  %vm295_vm5 = vweird.f32 %v1956_v18  ;;  %v354_v60 = vmul.f32 %v353_v29, %v2397_v23 }
  0xe0   :  { %v2451_v25 = vmin.f32 %v426_v13, 16.0  ;;  %v263_v26 = vmul.f32 %v262_v20, %v238_v2  ;;  %v291_v46 = vsub.f32 1.0, %v290_v31  ;;  %v391_v50 = vadd.f32 0.0036580483, %v390_v24  ;;  %vm2476_vm6 = vmor %vm294_vm4, %vm295_vm5 }
  0xe1   :  { %v164_v30 = vpop.f32.mrf.mxu0  ;;  %v301_v59 = vor.u32 1.1754944e-38, %v300_v38  ;;  %v2480_v2 = vmin.f32 %v746_v44, 16.0  ;;  %v323_v8 = vmul.f32 %v322_v15, %v2380_v3  ;;  %v355_v13 = vadd.f32 0.18741608, %v354_v60 }
  0xe2   :  { %v428_v37 = vmul.f32 2.1237322e-06, %v2451_v25  ;;  %v2459_v41 = vadd.f32 %v2348_v32, %v164_v30  ;;  %v1878_v42 = vclamps-f32 %v263_v26, 1.0  ;;  %v292_v57 = vmul.f32 %v1956_v18, %v291_v46 }
  0xe3   :  { %v392_v6 = vmul.f32 %v391_v50, %v2421_v55  ;;  %v361_v16 = vmul.f32 %v360_v22, %v2397_v23  ;;  %v324_v20 = vadd.f32 0.112945676, %v323_v8  ;;  %v195_v24 = vmul.f32 0.5, %v2359_v40 }
  0xe4   :  { %v429_v52 = vadd.f32 0.00028619796, %v428_v37  ;;  %v866_v53 = vadd.f32 1.0, %v1878_v42  ;;  %v2466_v34 = vmul.f32 0.70710677, %v2459_v41  ;;  %v293_v49 = vadd.f32 %v1956_v18, %v292_v57  ;;  %v188_v42 = vpop.f32.mrf.mxu3 }
  0xe5   :  { %v316_v26 = vmul.f32 %v315_v5, %v2380_v3  ;;  %v393_v28 = vadd.f32 0.05243302, %v392_v6  ;;  %v712_v30 = vmul.f32 %v711_v10, %v2443_v12  ;;  %v2499_v38 = vmul.f32 0.5, %v2370_v54 }
  0xe6   :  { %v430_v61 = vmul.f32 %v429_v52, %v2451_v25  ;;  %v2472_v62 = vmul.f32 %v866_v53, %v2413_v39  ;;  %v748_v39 = vmul.f32 2.1237322e-06, %v2480_v2  ;;  %v466_v51 = vmul.f32 %v2466_v34, %v2466_v34 }
  0xe7   :  { %v297_v11 = vsel %vm2476_vm6, %v1956_v18, %v293_v49  ;;  %v325_v18 = vmul.f32 %v324_v20, %v2380_v3  ;;  %v356_v22 = vmul.f32 %v355_v13, %v2397_v23  ;;  %v362_v40 = vadd.f32 0.014752088, %v361_v16 }
  0xe8   :  { %898 = vadd.xlane.f32.xlu0 %v2472_v62  ;;  %v431_v43 = vadd.f32 0.0036580483, %v430_v61  ;;  %v302_v35 = vsel %vm299_vm7, %v301_v59, %v297_v11  ;;  %v749_v15 = vadd.f32 0.00028619796, %v748_v39  ;;  %v2494_v29 = vmin.f32 %v466_v51, 16.0 }
  0xe9   :  { %v303_v19 = vmul.f32 %v302_v35, %v278_v4  ;;  %v2504_v44 = vmul.f32 0.5, %v2384_v9  ;;  %v326_v47 = vadd.f32 0.4994258, %v325_v18  ;;  %v394_v48 = vmul.f32 %v393_v28, %v2421_v55 }
  0xea   :  { %v432_v37 = vmul.f32 %v431_v43, %v2451_v25  ;;  %v468_v45 = vmul.f32 2.1237322e-06, %v2494_v29  ;;  %v750_v50 = vmul.f32 %v749_v15, %v2480_v2  ;;  %v2510_v54 = vadd.f32 %v2348_v32, %v188_v42 }
  0xeb   :  { %v1879_v31 = vclamps-f32 %v303_v19, 1.0  ;;  %v363_v52 = vmul.f32 %v362_v40, %v2397_v23  ;;  %v317_v53 = vadd.f32 1.1283791, %v316_v26  ;;  %v713_v56 = vadd.f32 0.05243302, %v712_v30 }
  0xec   :  { %v327_v9 = vmul.f32 %v326_v47, %v2380_v3  ;;  %v357_v59 = vadd.f32 1.1283791, %v356_v22  ;;  %v433_v60 = vadd.f32 0.05243302, %v432_v37  ;;  %v2517_v61 = vmul.f32 0.70710677, %v2510_v54  ;;  %v191_v26 = vpop.f32.mrf.mxu3 }
  0xed   :  { %v867_v46 = vadd.f32 1.0, %v1879_v31  ;;  %v469_v4 = vadd.f32 0.00028619796, %v468_v45  ;;  %v364_v5 = vadd.f32 0.112945676, %v363_v52  ;;  %v2529_v51 = vmul.f32 %v317_v53, %v2374_v58 }
  0xee   :  { %v2523_v49 = vadd.f32 1.0, %v327_v9  ;;  %v395_v6 = vadd.f32 0.18741608, %v394_v48  ;;  %v751_v39 = vadd.f32 0.0036580483, %v750_v50  ;;  %v786_v8 = vmul.f32 %v2517_v61, %v2517_v61 }
  0xef   :  { %v2513_v57 = vmul.f32 %v867_v46, %v195_v24  ;;  %v399_v3 = vmul.f32 3.8918573e-05, %v2421_v55  ;;  %v2532_v10 = vmul.f32 0.5, %v2429_v63  ;;  %v714_v27 = vmul.f32 %v713_v56, %v2443_v12 }
  0xf0   :  { %1957 = vrcp.f32 %v2523_v49  ;;  %v434_v11 = vmul.f32 %v433_v60, %v2451_v25  ;;  %v2538_v13 = vmul.f32 0.5, %v2459_v41  ;;  %v2541_v43 = vmul.f32 0.5, %v2394_v21  ;;  %v167_v21 = vpop.f32.mrf.mxu0 }
  0xf1   :  { %900 = vadd.xlane.f32.xlu0 %v2513_v57  ;;  %v2544_v35 = vmul.f32 0.5, %v2432_v1  ;;  %v470_v58 = vmul.f32 %v469_v4, %v2494_v29  ;;  %v2547_v16 = vmin.f32 %v786_v8, 16.0  ;;  %v365_v63 = vmul.f32 %v364_v5, %v2397_v23 }
  0xf2   :  { %v400_v19 = vadd.f32 0.001143296, %v399_v3  ;;  %v2551_v20 = vmul.f32 %v357_v59, %v2389_v14  ;;  %v396_v24 = vmul.f32 %v395_v6, %v2421_v55  ;;  %v752_v41 = vmul.f32 %v751_v39, %v2480_v2 }
  0xf3   :  { %v439_v28 = vmul.f32 3.8918573e-05, %v2451_v25  ;;  %v715_v1 = vadd.f32 0.18741608, %v714_v27  ;;  %v788_v15 = vmul.f32 2.1237322e-06, %v2547_v16  ;;  %v2558_v31 = vadd.f32 %v2348_v32, %v191_v26 }
  0xf4   :  { %v366_v30 = vadd.f32 0.4994258, %v365_v63  ;;  %v435_v18 = vadd.f32 0.18741608, %v434_v11  ;;  %v2561_v22 = vadd.f32 %v2348_v32, %v167_v21  ;;  %v401_v14 = vmul.f32 %v400_v19, %v2421_v55 }
  0xf5   :  { %v440_v37 = vadd.f32 0.001143296, %v439_v28  ;;  %v471_v40 = vadd.f32 0.0036580483, %v470_v58  ;;  %vm334_vm8 = vweird.f32 %v2523_v49  ;;  %v789_v45 = vadd.f32 0.00028619796, %v788_v15 }
  0xf6   :  { %v1958_v42 = vpop.eup %1957  ;;  %v367_v46 = vmul.f32 %v366_v30, %v2397_v23  ;;  %v338_v48 = vand.u32 2147483647, %v2523_v49  ;;  %v340_v50 = vand.u32 2147483648, %v2523_v49  ;;  %v2570_v52 = vmul.f32 0.70710677, %v2558_v31 }
  0xf7   :  { %v330_v47 = vmul.f32 %v1958_v42, %v2523_v49  ;;  %vm335_vm9 = vweird.f32 %v1958_v42  ;;  %v790_v53 = vmul.f32 %v789_v45, %v2547_v16  ;;  %v2576_v9 = vmul.f32 0.70710677, %v2561_v22 }
  0xf8   :  { %v2573_v56 = vadd.f32 1.0, %v367_v46  ;;  %v826_v23 = vmul.f32 %v2570_v52, %v2570_v52  ;;  %v402_v60 = vadd.f32 0.014752088, %v401_v14  ;;  %v441_v4 = vmul.f32 %v440_v37, %v2451_v25  ;;  %vm2591_vm10 = vmor %vm334_vm8, %vm335_vm9 }
  0xf9   :  { %v331_v59 = vsub.f32 1.0, %v330_v47  ;;  %v2581_v5 = vadd.f32 1.1283791, %v396_v24  ;;  %v472_v6 = vmul.f32 %v471_v40, %v2494_v29  ;;  %v753_v39 = vadd.f32 0.05243302, %v752_v41 }
  0xfa   :  { %1959 = vrcp.f32 %v2573_v56  ;;  %v716_v8 = vmul.f32 %v715_v1, %v2443_v12  ;;  %v341_v27 = vor.u32 1.1754944e-38, %v340_v50  ;;  %v2586_v11 = vmin.f32 %v826_v23, 16.0  ;;  %v170_v23 = vpop.f32.mrf.mxu0 }
  0xfb   :  { %v332_v3 = vmul.f32 %v1958_v42, %v331_v59  ;;  %v791_v63 = vadd.f32 0.0036580483, %v790_v53  ;;  %v506_v19 = vmul.f32 %v2576_v9, %v2576_v9  ;;  %v403_v24 = vmul.f32 %v402_v60, %v2421_v55 }
  0xfc   :  { %v442_v41 = vadd.f32 0.014752088, %v441_v4  ;;  %v436_v26 = vmul.f32 %v435_v18, %v2451_v25  ;;  %vm339_vm11 = vcmp.eq.f32.partialorder %v338_v48, 8.507059e+37  ;;  %v828_v28 = vmul.f32 2.1237322e-06, %v2586_v11 }
  0xfd   :  { %v333_v21 = vadd.f32 %v1958_v42, %v332_v3  ;;  %v473_v1 = vadd.f32 0.05243302, %v472_v6  ;;  %vm374_vm12 = vweird.f32 %v2573_v56  ;;  %v2601_v49 = vmin.f32 %v506_v19, 16.0 }
  0xfe   :  { %v404_v15 = vadd.f32 0.112945676, %v403_v24  ;;  %v378_v14 = vand.u32 2147483647, %v2573_v56  ;;  %v829_v37 = vadd.f32 0.00028619796, %v828_v28  ;;  %v443_v40 = vmul.f32 %v442_v41, %v2451_v25 }
  0xff   :  { %v337_v30 = vsel %vm2591_vm10, %v1958_v42, %v333_v21  ;;  %v792_v46 = vmul.f32 %v791_v63, %v2547_v16  ;;  %v508_v47 = vmul.f32 2.1237322e-06, %v2601_v49  ;;  %v380_v59 = vand.u32 2147483648, %v2573_v56 }
 0x100   :  { %v1960_v45 = vpop.eup %1959  ;;  %v342_v18 = vsel %vm339_vm11, %v341_v27, %v337_v30  ;;  %v405_v48 = vmul.f32 %v404_v15, %v2421_v55  ;;  %v830_v42 = vmul.f32 %v829_v37, %v2586_v11  ;;  %v2615_v6 = vadd.f32 %v2348_v32, %v170_v23 }
 0x101   :  { %v343_v50 = vmul.f32 %v342_v18, %v2529_v51  ;;  %v370_v53 = vmul.f32 %v1960_v45, %v2573_v56  ;;  %vm375_vm13 = vweird.f32 %v1960_v45  ;;  %v509_v60 = vadd.f32 0.00028619796, %v508_v47 }
 0x102   :  { %v406_v4 = vadd.f32 0.4994258, %v405_v48  ;;  %v831_v58 = vadd.f32 0.0036580483, %v830_v42  ;;  %v444_v63 = vadd.f32 0.112945676, %v443_v40  ;;  %v754_v19 = vmul.f32 %v753_v39, %v2480_v2  ;;  %vm2628_vm14 = vmor %vm374_vm12, %vm375_vm13 }
 0x103   :  { %v1880_v3 = vclamps-f32 %v343_v50, 1.0  ;;  %v371_v27 = vsub.f32 1.0, %v370_v53  ;;  %v793_v51 = vadd.f32 0.05243302, %v792_v46  ;;  %v510_v24 = vmul.f32 %v509_v60, %v2601_v49 }
 0x104   :  { %v407_v41 = vmul.f32 %v406_v4, %v2421_v55  ;;  %v832_v15 = vmul.f32 %v831_v58, %v2586_v11  ;;  %v2622_v30 = vmul.f32 0.70710677, %v2615_v6  ;;  %v474_v37 = vmul.f32 %v473_v1, %v2494_v29 }
 0x105   :  { %v868_v21 = vadd.f32 1.0, %v1880_v3  ;;  %v372_v28 = vmul.f32 %v1960_v45, %v371_v27  ;;  %v381_v39 = vor.u32 1.1754944e-38, %v380_v59  ;;  %v445_v55 = vmul.f32 %v444_v63, %v2451_v25 }
 0x106   :  { %v408_v18 = vadd.f32 1.0, %v407_v41  ;;  %v717_v46 = vadd.f32 1.1283791, %v716_v8  ;;  %vm379_vm15 = vcmp.eq.f32.partialorder %v378_v14, 8.507059e+37  ;;  %v437_v50 = vadd.f32 1.1283791, %v436_v26 }
 0x107   :  { %v2634_v47 = vmul.f32 %v868_v21, %v2499_v38  ;;  %v373_v48 = vadd.f32 %v1960_v45, %v372_v28  ;;  %v511_v53 = vadd.f32 0.0036580483, %v510_v24  ;;  %v546_v56 = vmul.f32 %v2622_v30, %v2622_v30 }
 0x108   :  { %1961 = vrcp.f32 %v408_v18  ;;  %v755_v1 = vadd.f32 0.18741608, %v754_v19  ;;  %v794_v59 = vmul.f32 %v793_v51, %v2547_v16  ;;  %v833_v8 = vadd.f32 0.05243302, %v832_v15 }
 0x109   :  { %902 = vadd.xlane.f32.xlu1 %v2634_v47  ;;  %v377_v42 = vsel %vm2628_vm14, %v1960_v45, %v373_v48  ;;  %v475_v23 = vadd.f32 0.18741608, %v474_v37  ;;  %v446_v60 = vadd.f32 0.4994258, %v445_v55  ;;  %v479_v14 = vmul.f32 3.8918573e-05, %v2494_v29  ;;  %v173_v37 = vpop.f32.mrf.mxu0 }
 0x10a   :  { %v382_v38 = vsel %vm379_vm15, %v381_v39, %v377_v42  ;;  %v398_v26 = vmul.f32 %v2581_v5, %v2407_v33  ;;  %v2646_v4 = vmul.f32 %v717_v46, %v2410_v36  ;;  %v719_v27 = vmul.f32 3.8918573e-05, %v2443_v12 }
 0x10b   :  { %v383_v3 = vmul.f32 %v382_v38, %v2551_v20  ;;  %v2651_v58 = vmul.f32 %v437_v50, %v2439_v7  ;;  %v512_v45 = vmul.f32 %v511_v53, %v2601_v49  ;;  %v2654_v63 = vmin.f32 %v546_v56, 16.0 }
 0x10c   :  { %v447_v19 = vmul.f32 %v446_v60, %v2451_v25  ;;  %v756_v51 = vmul.f32 %v755_v1, %v2480_v2  ;;  %v795_v24 = vadd.f32 0.18741608, %v794_v59  ;;  %v834_v36 = vmul.f32 %v833_v8, %v2586_v11 }
 0x10d   :  { %v1881_v33 = vclamps-f32 %v383_v3, 1.0  ;;  %v476_v20 = vmul.f32 %v475_v23, %v2494_v29  ;;  %v548_v41 = vmul.f32 2.1237322e-06, %v2654_v63  ;;  %v480_v7 = vadd.f32 0.001143296, %v479_v14 }
 0x10e   :  { %v1962_v5 = vpop.eup %1961  ;;  %v2661_v21 = vadd.f32 1.0, %v447_v19  ;;  %vm414_vm0 = vweird.f32 %v408_v18  ;;  %v720_v40 = vadd.f32 0.001143296, %v719_v27  ;;  %v513_v25 = vadd.f32 0.05243302, %v512_v45 }
 0x10f   :  { %v869_v28 = vadd.f32 1.0, %v1881_v33  ;;  %v410_v15 = vmul.f32 %v1962_v5, %v408_v18  ;;  %v418_v39 = vand.u32 2147483647, %v408_v18  ;;  %v420_v55 = vand.u32 2147483648, %v408_v18 }
 0x110   :  { %1963 = vrcp.f32 %v2661_v21  ;;  %v835_v48 = vadd.f32 0.18741608, %v834_v36  ;;  %vm415_vm1 = vweird.f32 %v1962_v5  ;;  %v2667_v53 = vadd.f32 1.1283791, %v756_v51 }
 0x111   :  { %v2665_v46 = vmul.f32 %v869_v28, %v2504_v44  ;;  %v411_v50 = vsub.f32 1.0, %v410_v15  ;;  %v549_v56 = vadd.f32 0.00028619796, %v548_v41  ;;  %v2670_v1 = vadd.f32 %v2348_v32, %v173_v37  ;;  %vm2680_vm2 = vmor %vm414_vm0, %vm415_vm1 }
 0x112   :  { %v481_v59 = vmul.f32 %v480_v7, %v2494_v29  ;;  %v2673_v42 = vadd.f32 1.1283791, %v476_v20  ;;  %v796_v8 = vmul.f32 %v795_v24, %v2547_v16  ;;  %v721_v44 = vmul.f32 %v720_v40, %v2443_v12 }
 0x113   :  { %904 = vadd.xlane.f32.xlu1 %v2665_v46  ;;  %v412_v23 = vmul.f32 %v1962_v5, %v411_v50  ;;  %v514_v38 = vmul.f32 %v513_v25, %v2601_v49  ;;  %vm2684_vm3 = vcmp.eq.f32.partialorder %v418_v39, 8.507059e+37  ;;  %v421_v3 = vor.u32 1.1754944e-38, %v420_v55 }
 0x114   :  { %v482_v27 = vadd.f32 0.014752088, %v481_v59  ;;  %v836_v45 = vmul.f32 %v835_v48, %v2586_v11  ;;  %v722_v51 = vadd.f32 0.014752088, %v721_v44  ;;  %v759_v24 = vmul.f32 3.8918573e-05, %v2480_v2 }
 0x115   :  { %v413_v19 = vadd.f32 %v1962_v5, %v412_v23  ;;  %v550_v36 = vmul.f32 %v549_v56, %v2654_v63  ;;  %v2692_v18 = vmul.f32 0.70710677, %v2670_v1  ;;  %v799_v41 = vmul.f32 3.8918573e-05, %v2547_v16 }
 0x116   :  { %v1964_v33 = vpop.eup %1963  ;;  %v483_v20 = vmul.f32 %v482_v27, %v2494_v29  ;;  %vm454_vm4 = vweird.f32 %v2661_v21  ;;  %v458_v15 = vand.u32 2147483647, %v2661_v21  ;;  %v460_v40 = vand.u32 2147483648, %v2661_v21 }
 0x117   :  { %v417_v7 = vsel %vm2680_vm2, %v1962_v5, %v413_v19  ;;  %v450_v28 = vmul.f32 %v1964_v33, %v2661_v21  ;;  %v723_v39 = vmul.f32 %v722_v51, %v2443_v12  ;;  %vm455_vm5 = vweird.f32 %v1964_v33 }
 0x118   :  { %v422_v37 = vsel %vm2684_vm3, %v421_v3, %v417_v7  ;;  %v484_v25 = vadd.f32 0.112945676, %v483_v20  ;;  %v760_v50 = vadd.f32 0.001143296, %v759_v24  ;;  %v586_v5 = vmul.f32 %v2692_v18, %v2692_v18  ;;  %vm2711_vm6 = vmor %vm454_vm4, %vm455_vm5 }
 0x119   :  { %v423_v55 = vmul.f32 %v422_v37, %v398_v26  ;;  %v451_v48 = vsub.f32 1.0, %v450_v28  ;;  %v724_v59 = vadd.f32 0.112945676, %v723_v39  ;;  %v800_v23 = vadd.f32 0.001143296, %v799_v41 }
 0x11a   :  { %v485_v56 = vmul.f32 %v484_v25, %v2494_v29  ;;  %v551_v60 = vadd.f32 0.0036580483, %v550_v36  ;;  %v761_v3 = vmul.f32 %v760_v50, %v2480_v2  ;;  %v461_v26 = vor.u32 1.1754944e-38, %v460_v40 }
 0x11b   :  { %v1882_v44 = vclamps-f32 %v423_v55, 1.0  ;;  %v452_v14 = vmul.f32 %v1964_v33, %v451_v48  ;;  %v725_v51 = vmul.f32 %v724_v59, %v2443_v12  ;;  %v801_v24 = vmul.f32 %v800_v23, %v2547_v16 }
 0x11c   :  { %v486_v19 = vadd.f32 0.4994258, %v485_v56  ;;  %vm459_vm7 = vcmp.eq.f32.partialorder %v458_v15, 8.507059e+37  ;;  %v762_v41 = vadd.f32 0.014752088, %v761_v3  ;;  %v2717_v36 = vmin.f32 %v586_v5, 16.0 }
 0x11d   :  { %v870_v20 = vadd.f32 1.0, %v1882_v44  ;;  %v453_v7 = vadd.f32 %v1964_v33, %v452_v14  ;;  %v726_v37 = vadd.f32 0.4994258, %v725_v51  ;;  %v802_v21 = vadd.f32 0.014752088, %v801_v24 }
 0x11e   :  { %v487_v28 = vmul.f32 %v486_v19, %v2494_v29  ;;  %v763_v39 = vmul.f32 %v762_v41, %v2480_v2  ;;  %v839_v55 = vmul.f32 3.8918573e-05, %v2586_v11  ;;  %v588_v15 = vmul.f32 2.1237322e-06, %v2717_v36 }
 0x11f   :  { %v2721_v25 = vmul.f32 %v870_v20, %v2520_v0  ;;  %v457_v40 = vsel %vm2711_vm6, %v1964_v33, %v453_v7  ;;  %v727_v5 = vmul.f32 %v726_v37, %v2443_v12  ;;  %v797_v29 = vadd.f32 1.1283791, %v796_v8 }
 0x120   :  { %v462_v48 = vsel %vm459_vm7, %v461_v26, %v457_v40  ;;  %v2728_v50 = vadd.f32 1.0, %v487_v28  ;;  %v764_v56 = vadd.f32 0.112945676, %v763_v39  ;;  %v803_v59 = vmul.f32 %v802_v21, %v2547_v16 }
 0x121   :  { %906 = vadd.xlane.f32.xlu2 %v2721_v25  ;;  %v463_v0 = vmul.f32 %v462_v48, %v2651_v58  ;;  %v2736_v33 = vmul.f32 %v2667_v53, %v2448_v17  ;;  %v837_v23 = vadd.f32 1.1283791, %v836_v45  ;;  %v515_v44 = vadd.f32 0.18741608, %v514_v38 }
 0x122   :  { %1965 = vrcp.f32 %v2728_v50  ;;  %v552_v14 = vmul.f32 %v551_v60, %v2654_v63  ;;  %v728_v12 = vadd.f32 1.0, %v727_v5  ;;  %v765_v8 = vmul.f32 %v764_v56, %v2480_v2 }
 0x123   :  { %v1883_v3 = vclamps-f32 %v463_v0, 1.0  ;;  %v2743_v58 = vmul.f32 %v2673_v42, %v2466_v34  ;;  %v589_v27 = vadd.f32 0.00028619796, %v588_v15  ;;  %v804_v26 = vadd.f32 0.112945676, %v803_v59 }
 0x124   :  { %v840_v19 = vadd.f32 0.001143296, %v839_v55  ;;  %v2746_v17 = vmul.f32 %v797_v29, %v2517_v61  ;;  %v500_v38 = vand.u32 2147483648, %v2728_v50  ;;  %1967 = vrcp.f32 %v728_v12 }
 0x125   :  { %v871_v53 = vadd.f32 1.0, %v1883_v3  ;;  %v2750_v45 = vmul.f32 %v837_v23, %v2570_v52  ;;  %v2753_v60 = vmul.f32 %v515_v44, %v2601_v49  ;;  %v766_v51 = vadd.f32 0.4994258, %v765_v8 }
 0x126   :  { %v805_v34 = vmul.f32 %v804_v26, %v2547_v16  ;;  %v2756_v42 = vadd.f32 0.05243302, %v552_v14  ;;  %v841_v61 = vmul.f32 %v840_v19, %v2586_v11  ;;  %v519_v20 = vmul.f32 3.8918573e-05, %v2601_v49 }
 0x127   :  { %v2759_v24 = vmul.f32 %v871_v53, %v2532_v10  ;;  %v590_v41 = vmul.f32 %v589_v27, %v2717_v36  ;;  %vm494_vm8 = vweird.f32 %v2728_v50  ;;  %v767_v52 = vmul.f32 %v766_v51, %v2480_v2 }
 0x128   :  { %v1966_v7 = vpop.eup %1965  ;;  %v806_v28 = vadd.f32 0.4994258, %v805_v34  ;;  %v498_v21 = vand.u32 2147483647, %v2728_v50  ;;  %v501_v10 = vor.u32 1.1754944e-38, %v500_v38  ;;  %vm734_vm9 = vweird.f32 %v728_v12 }
 0x129   :  { %908 = vadd.xlane.f32.xlu2 %v2759_v24  ;;  %v490_v37 = vmul.f32 %v1966_v7, %v2728_v50  ;;  %v842_v40 = vadd.f32 0.014752088, %v841_v61  ;;  %v768_v39 = vadd.f32 1.0, %v767_v52  ;;  %v520_v48 = vadd.f32 0.001143296, %v519_v20 }
 0x12a   :  { %v807_v55 = vmul.f32 %v806_v28, %v2547_v16  ;;  %v1968_v15 = vpop.eup %1967  ;;  %vm495_vm10 = vweird.f32 %v1966_v7  ;;  %v559_v2 = vmul.f32 3.8918573e-05, %v2654_v63  ;;  %v738_v56 = vand.u32 2147483647, %v728_v12 }
 0x12b   :  { %v491_v5 = vsub.f32 1.0, %v490_v37  ;;  %v843_v29 = vmul.f32 %v842_v40, %v2586_v11  ;;  %v730_v0 = vmul.f32 %v1968_v15, %v728_v12  ;;  %v740_v59 = vand.u32 2147483648, %v728_v12  ;;  %vm2774_vm12 = vmor %vm494_vm8, %vm495_vm10  ;;  %v176_v12 = vpop.f32.mrf.mxu0 }
 0x12c   :  { %1969 = vrcp.f32 %v768_v39  ;;  %vm735_vm11 = vweird.f32 %v1968_v15  ;;  %v778_v44 = vand.u32 2147483647, %v768_v39  ;;  %v780_v14 = vand.u32 2147483648, %v768_v39 }
 0x12d   :  { %v492_v23 = vmul.f32 %v1966_v7, %v491_v5  ;;  %v731_v3 = vsub.f32 1.0, %v730_v0  ;;  %v2778_v8 = vadd.f32 1.0, %v807_v55  ;;  %v844_v27 = vadd.f32 0.112945676, %v843_v29  ;;  %vm2792_vm15 = vmor %vm734_vm9, %vm735_vm11 }
 0x12e   :  { %v521_v26 = vmul.f32 %v520_v48, %v2601_v49  ;;  %v2781_v19 = vadd.f32 0.0036580483, %v590_v41  ;;  %vm499_vm13 = vcmp.eq.f32.partialorder %v498_v21, 8.507059e+37  ;;  %v560_v38 = vadd.f32 0.001143296, %v559_v2 }
 0x12f   :  { %v493_v53 = vadd.f32 %v1966_v7, %v492_v23  ;;  %v732_v51 = vmul.f32 %v1968_v15, %v731_v3  ;;  %vm2783_vm14 = vcmp.eq.f32.partialorder %v738_v56, 8.507059e+37  ;;  %v741_v50 = vor.u32 1.1754944e-38, %v740_v59 }
 0x130   :  { %1971 = vrcp.f32 %v2778_v8  ;;  %vm774_vm0 = vweird.f32 %v768_v39  ;;  %vm2796_vm1 = vcmp.eq.f32.partialorder %v778_v44, 8.507059e+37  ;;  %v845_v52 = vmul.f32 %v844_v27, %v2586_v11 }
 0x131   :  { %v497_v61 = vsel %vm2774_vm12, %v1966_v7, %v493_v53  ;;  %v733_v21 = vadd.f32 %v1968_v15, %v732_v51  ;;  %v781_v40 = vor.u32 1.1754944e-38, %v780_v14  ;;  %v522_v55 = vadd.f32 0.014752088, %v521_v26 }
 0x132   :  { %v1970_v28 = vpop.eup %1969  ;;  %v502_v37 = vsel %vm499_vm13, %v501_v10, %v497_v61  ;;  %vm814_vm2 = vweird.f32 %v2778_v8  ;;  %v561_v5 = vmul.f32 %v560_v38, %v2654_v63  ;;  %v818_v2 = vand.u32 2147483647, %v2778_v8 }
 0x133   :  { %v503_v7 = vmul.f32 %v502_v37, %v2743_v58  ;;  %v770_v48 = vmul.f32 %v1970_v28, %v768_v39  ;;  %v737_v29 = vsel %vm2792_vm15, %v1968_v15, %v733_v21  ;;  %v2808_v0 = vadd.f32 %v2348_v32, %v176_v12 }
 0x134   :  { %v846_v10 = vadd.f32 0.4994258, %v845_v52  ;;  %v742_v59 = vsel %vm2783_vm14, %v741_v50, %v737_v29  ;;  %vm775_vm3 = vweird.f32 %v1970_v28  ;;  %v523_v16 = vmul.f32 %v522_v55, %v2601_v49  ;;  %v179_v55 = vpop.f32.mrf.mxu0 }
 0x135   :  { %v1884_v56 = vclamps-f32 %v503_v7, 1.0  ;;  %v771_v58 = vsub.f32 1.0, %v770_v48  ;;  %v743_v44 = vmul.f32 %v742_v59, %v2646_v4  ;;  %v2814_v14 = vmul.f32 0.70710677, %v2808_v0  ;;  %vm2820_vm4 = vmor %vm774_vm0, %vm775_vm3 }
 0x136   :  { %v1972_v23 = vpop.eup %1971  ;;  %v847_v15 = vmul.f32 %v846_v10, %v2586_v11  ;;  %v562_v26 = vadd.f32 0.014752088, %v561_v5  ;;  %v820_v4 = vand.u32 2147483648, %v2778_v8  ;;  %v554_v20 = vmul.f32 %v2756_v42, %v2654_v63 }
 0x137   :  { %v872_v3 = vadd.f32 1.0, %v1884_v56  ;;  %v772_v32 = vmul.f32 %v1970_v28, %v771_v58  ;;  %v810_v27 = vmul.f32 %v1972_v23, %v2778_v8  ;;  %v1890_v53 = vclamps-f32 %v743_v44, 1.0 }
 0x138   :  { %v626_v51 = vmul.f32 %v2814_v14, %v2814_v14  ;;  %v848_v34 = vadd.f32 1.0, %v847_v15  ;;  %vm815_vm5 = vweird.f32 %v1972_v23  ;;  %v524_v7 = vadd.f32 0.112945676, %v523_v16 }
 0x139   :  { %v2828_v11 = vmul.f32 %v872_v3, %v2538_v13  ;;  %v773_v50 = vadd.f32 %v1970_v28, %v772_v32  ;;  %v811_v61 = vsub.f32 1.0, %v810_v27  ;;  %v878_v39 = vadd.f32 1.0, %v1890_v53  ;;  %vm2842_vm6 = vmor %vm814_vm2, %vm815_vm5 }
 0x13a   :  { %v2832_v52 = vmin.f32 %v626_v51, 16.0  ;;  %1973 = vrcp.f32 %v848_v34  ;;  %v563_v13 = vmul.f32 %v562_v26, %v2654_v63  ;;  %v821_v12 = vor.u32 1.1754944e-38, %v820_v4 }
 0x13b   :  { %910 = vadd.xlane.f32.xlu1 %v2828_v11  ;;  %v777_v37 = vsel %vm2820_vm4, %v1970_v28, %v773_v50  ;;  %v812_v21 = vmul.f32 %v1972_v23, %v811_v61  ;;  %v2113_v28 = vld [vmem:[%s3462_s2] ss:$0 sm:$0xff]  ;;  %v592_v10 = vmul.f32 %v2781_v19, %v2717_v36  ;;  %vm819_vm7 = vcmp.eq.f32.partialorder %v818_v2, 8.507059e+37 }
 0x13c   :  { %v782_v48 = vsel %vm2796_vm1, %v781_v40, %v777_v37  ;;  %v628_v5 = vmul.f32 2.1237322e-06, %v2832_v52  ;;  %v2850_v29 = vadd.f32 %v2113_v28, %v179_v55  ;;  %v2856_v8 = vmul.f32 %v878_v39, %v2541_v43 }
 0x13d   :  { %v783_v41 = vmul.f32 %v782_v48, %v2736_v33  ;;  %v813_v40 = vadd.f32 %v1972_v23, %v812_v21  ;;  %v599_v58 = vmul.f32 3.8918573e-05, %v2717_v36  ;;  %v525_v16 = vmul.f32 %v524_v7, %v2601_v49 }
 0x13e   :  { %v629_v56 = vadd.f32 0.00028619796, %v628_v5  ;;  %v2859_v59 = vmul.f32 0.70710677, %v2850_v29  ;;  %v564_v19 = vadd.f32 0.112945676, %v563_v13  ;;  %vm854_vm8 = vweird.f32 %v848_v34 }
 0x13f   :  { %v1891_v44 = vclamps-f32 %v783_v41, 1.0  ;;  %v817_v15 = vsel %vm2842_vm6, %v1972_v23, %v813_v40  ;;  %v858_v32 = vand.u32 2147483647, %v848_v34  ;;  %v555_v27 = vadd.f32 0.18741608, %v554_v20 }
 0x140   :  { %v1974_v3 = vpop.eup %1973  ;;  %v822_v33 = vsel %vm819_vm7, %v821_v12, %v817_v15  ;;  %v630_v2 = vmul.f32 %v629_v56, %v2832_v52  ;;  %v666_v43 = vmul.f32 %v2859_v59, %v2859_v59  ;;  %v860_v53 = vand.u32 2147483648, %v848_v34 }
 0x141   :  { %v850_v26 = vmul.f32 %v1974_v3, %v848_v34  ;;  %v879_v38 = vadd.f32 1.0, %v1891_v44  ;;  %v823_v4 = vmul.f32 %v822_v33, %v2746_v17  ;;  %vm855_vm9 = vweird.f32 %v1974_v3 }
 0x142   :  { %v526_v23 = vadd.f32 0.4994258, %v525_v16  ;;  %v631_v51 = vadd.f32 0.0036580483, %v630_v2  ;;  %v2870_v61 = vmin.f32 %v666_v43, 16.0  ;;  %v565_v39 = vmul.f32 %v564_v19, %v2654_v63  ;;  %vm2885_vm11 = vmor %vm854_vm8, %vm855_vm9 }
 0x143   :  { %922 = vadd.xlane.f32.xlu1 %v2856_v8  ;;  %v851_v50 = vsub.f32 1.0, %v850_v26  ;;  %v593_v37 = vadd.f32 0.05243302, %v592_v10  ;;  %vm2873_vm10 = vcmp.eq.f32.partialorder %v858_v32, 8.507059e+37  ;;  %v600_v55 = vadd.f32 0.001143296, %v599_v58 }
 0x144   :  { %v527_v20 = vmul.f32 %v526_v23, %v2601_v49  ;;  %v668_v17 = vmul.f32 2.1237322e-06, %v2870_v61  ;;  %v566_v13 = vadd.f32 0.4994258, %v565_v39  ;;  %v639_v48 = vmul.f32 3.8918573e-05, %v2832_v52 }
 0x145   :  { %v852_v7 = vmul.f32 %v1974_v3, %v851_v50  ;;  %v2881_v42 = vmul.f32 %v879_v38, %v2544_v35  ;;  %v861_v5 = vor.u32 1.1754944e-38, %v860_v53  ;;  %v601_v49 = vmul.f32 %v600_v55, %v2717_v36 }
 0x146   :  { %v528_v28 = vadd.f32 1.0, %v527_v20  ;;  %v1892_v10 = vclamps-f32 %v823_v4, 1.0  ;;  %v632_v41 = vmul.f32 %v631_v51, %v2832_v52  ;;  %v567_v56 = vmul.f32 %v566_v13, %v2654_v63 }
 0x147   :  { %v853_v40 = vadd.f32 %v1974_v3, %v852_v7  ;;  %v208_v58 = vmul.f32 0.5, %v2510_v54  ;;  %v517_v35 = vadd.f32 1.1283791, %v2753_v60  ;;  %v946_v44 = vlaneseq }
 0x148   :  { %1975 = vrcp.f32 %v528_v28  ;;  %v669_v15 = vadd.f32 0.00028619796, %v668_v17  ;;  %v2896_v16 = vadd.f32 1.0, %v567_v56  ;;  %v640_v19 = vadd.f32 0.001143296, %v639_v48 }
 0x149   :  { %v857_v34 = vsel %vm2885_vm11, %v1974_v3, %v853_v40  ;;  %v556_v33 = vmul.f32 %v555_v27, %v2654_v63  ;;  %v594_v2 = vmul.f32 %v593_v37, %v2717_v36  ;;  %v602_v43 = vadd.f32 0.014752088, %v601_v49 }
 0x14a   :  { %v862_v32 = vsel %vm2873_vm10, %v861_v5, %v857_v34  ;;  %v880_v54 = vadd.f32 1.0, %v1892_v10  ;;  %v633_v60 = vadd.f32 0.05243302, %v632_v41  ;;  %1977 = vrcp.f32 %v2896_v16 }
 0x14b   :  { %924 = vadd.xlane.f32.xlu1 %v2881_v42  ;;  %v863_v26 = vmul.f32 %v862_v32, %v2750_v45  ;;  %v2905_v3 = vand.u32 127, %v946_v44  ;;  %v209_v53 = vmul.f32 0.5, %v2558_v31  ;;  %v670_v63 = vmul.f32 %v669_v15, %v2870_v61 }
 0x14c   :  { %v603_v27 = vmul.f32 %v602_v43, %v2717_v36  ;;  %v641_v38 = vmul.f32 %v640_v19, %v2832_v52  ;;  %v518_v23 = vmul.f32 %v517_v35, %v2576_v9  ;;  %v557_v51 = vadd.f32 1.1283791, %v556_v33 }
 0x14d   :  { %v1893_v50 = vclamps-f32 %v863_v26, 1.0  ;;  %v540_v39 = vand.u32 2147483648, %v528_v28  ;;  %v595_v37 = vadd.f32 0.18741608, %v594_v2  ;;  %v2912_v45 = vmul.f32 %v880_v54, %v208_v58 }
 0x14e   :  { %v1976_v4 = vpop.eup %1975  ;;  %v634_v21 = vmul.f32 %v633_v60, %v2832_v52  ;;  %vm948_vm12 = vcmp.lt.s32.totalorder %v2905_v3, 32  ;;  %vm534_vm13 = vweird.f32 %v528_v28  ;;  %v538_v31 = vand.u32 2147483647, %v528_v28 }
 0x14f   :  { %v530_v20 = vmul.f32 %v1976_v4, %v528_v28  ;;  %v604_v55 = vadd.f32 0.112945676, %v603_v27  ;;  %v642_v7 = vadd.f32 0.014752088, %v641_v38  ;;  %v671_v13 = vadd.f32 0.0036580483, %v670_v63 }
 0x150   :  { %v1978_v17 = vpop.eup %1977  ;;  %vm535_vm14 = vweird.f32 %v1976_v4  ;;  %v679_v9 = vmul.f32 3.8918573e-05, %v2870_v61  ;;  %v881_v12 = vadd.f32 1.0, %v1893_v50  ;;  %v541_v5 = vor.u32 1.1754944e-38, %v540_v39 }
 0x151   :  { %v531_v48 = vsub.f32 1.0, %v530_v20  ;;  %v570_v49 = vmul.f32 %v1978_v17, %v2896_v16  ;;  %v605_v10 = vmul.f32 %v604_v55, %v2717_v36  ;;  %vm574_vm15 = vweird.f32 %v2896_v16  ;;  %vm2923_vm0 = vmor %vm534_vm13, %vm535_vm14 }
 0x152   :  { %v643_v40 = vmul.f32 %v642_v7, %v2832_v52  ;;  %v680_v56 = vadd.f32 0.001143296, %v679_v9  ;;  %vm575_vm1 = vweird.f32 %v1978_v17  ;;  %v580_v44 = vand.u32 2147483648, %v2896_v16 }
 0x153   :  { %926 = vadd.xlane.f32.xlu1 %v2912_v45  ;;  %v532_v41 = vmul.f32 %v1976_v4, %v531_v48  ;;  %v571_v35 = vsub.f32 1.0, %v570_v49  ;;  %v606_v34 = vadd.f32 0.4994258, %v605_v10  ;;  %vm539_vm2 = vcmp.eq.f32.partialorder %v538_v31, 8.507059e+37  ;;  %vm2937_vm3 = vmor %vm574_vm15, %vm575_vm1 }
 0x154   :  { %v644_v19 = vadd.f32 0.112945676, %v643_v40  ;;  %v681_v33 = vmul.f32 %v680_v56, %v2870_v61  ;;  %v2929_v2 = vmul.f32 %v881_v12, %v209_v53  ;;  %v578_v28 = vand.u32 2147483647, %v2896_v16 }
 0x155   :  { %v533_v15 = vadd.f32 %v1976_v4, %v532_v41  ;;  %v572_v43 = vmul.f32 %v1978_v17, %v571_v35  ;;  %v607_v54 = vmul.f32 %v606_v34, %v2717_v36  ;;  %v581_v39 = vor.u32 1.1754944e-38, %v580_v44 }
 0x156   :  { %v645_v27 = vmul.f32 %v644_v19, %v2832_v52  ;;  %v682_v53 = vadd.f32 0.014752088, %v681_v33  ;;  %vm579_vm4 = vcmp.eq.f32.partialorder %v578_v28, 8.507059e+37  ;;  %v558_v12 = vmul.f32 %v557_v51, %v2622_v30 }
 0x157   :  { %v537_v26 = vsel %vm2923_vm0, %v1976_v4, %v533_v15  ;;  %v573_v50 = vadd.f32 %v1978_v17, %v572_v43  ;;  %v608_v20 = vadd.f32 1.0, %v607_v54  ;;  %v672_v4 = vmul.f32 %v671_v13, %v2870_v61 }
 0x158   :  { %v542_v38 = vsel %vm539_vm2, %v541_v5, %v537_v26  ;;  %v646_v7 = vadd.f32 0.4994258, %v645_v27  ;;  %v683_v48 = vmul.f32 %v682_v53, %v2870_v61  ;;  %v596_v13 = vmul.f32 %v595_v37, %v2717_v36 }
 0x159   :  { %v543_v55 = vmul.f32 %v542_v38, %v518_v23  ;;  %v577_v16 = vsel %vm2937_vm3, %v1978_v17, %v573_v50  ;;  %1979 = vrcp.f32 %v608_v20  ;;  %v635_v49 = vadd.f32 0.18741608, %v634_v21 }
 0x15a   :  { %v647_v5 = vmul.f32 %v646_v7, %v2832_v52  ;;  %v582_v17 = vsel %vm579_vm4, %v581_v39, %v577_v16  ;;  %v684_v10 = vadd.f32 0.112945676, %v683_v48  ;;  %v673_v41 = vadd.f32 0.05243302, %v672_v4 }
 0x15b   :  { %v899_v32 = vpop.xlane.xlu0 %898  ;;  %928 = vadd.xlane.f32.xlu1 %v2929_v2  ;;  %v1885_v23 = vclamps-f32 %v543_v55, 1.0  ;;  %v201_v35 = vmul.f32 0.5, %v2561_v22  ;;  %v583_v51 = vmul.f32 %v582_v17, %v558_v12  ;;  %v597_v44 = vadd.f32 1.1283791, %v596_v13 }
 0x15c   :  { %v930_v60 = vmul.f32 0.03125, %v899_v32  ;;  %v648_v40 = vadd.f32 1.0, %v647_v5  ;;  %v685_v56 = vmul.f32 %v684_v10, %v2870_v61  ;;  %v636_v34 = vmul.f32 %v635_v49, %v2832_v52 }
 0x15d   :  { %v873_v30 = vadd.f32 1.0, %v1885_v23  ;;  %v674_v37 = vmul.f32 %v673_v41, %v2870_v61  ;;  %vm614_vm5 = vweird.f32 %v608_v20  ;;  %v620_v33 = vand.u32 2147483648, %v608_v20 }
 0x15e   :  { %v949_v31 = vsub.f32 %v2472_v62, %v930_v60  ;;  %1981 = vrcp.f32 %v648_v40  ;;  %v686_v36 = vadd.f32 0.4994258, %v685_v56  ;;  %v618_v43 = vand.u32 2147483647, %v608_v20 }
 0x15f   :  { %v1980_v58 = vpop.eup %1979  ;;  %v2963_v54 = vmul.f32 %v873_v30, %v201_v35  ;;  %v1886_v60 = vclamps-f32 %v583_v51, 1.0  ;;  %v202_v52 = vmul.f32 0.5, %v2615_v6  ;;  %v598_v26 = vmul.f32 %v597_v44, %v2692_v18 }
 0x160   :  { %v2950_v9 = vsel %vm948_vm12, %v949_v31, 0.0  ;;  %v610_v19 = vmul.f32 %v1980_v58, %v608_v20  ;;  %vm615_vm6 = vweird.f32 %v1980_v58  ;;  %v687_v28 = vmul.f32 %v686_v36, %v2870_v61 }
 0x161   :  { %v981_v62 = vmul.f32 %v2950_v9, %v2950_v9  ;;  %v637_v38 = vadd.f32 1.1283791, %v636_v34  ;;  %v675_v50 = vadd.f32 0.18741608, %v674_v37  ;;  %vm2974_vm7 = vmor %vm614_vm5, %vm615_vm6  ;;  %v621_v6 = vor.u32 1.1754944e-38, %v620_v33 }
 0x162   :  { %v611_v32 = vsub.f32 1.0, %v610_v19  ;;  %v688_v27 = vadd.f32 1.0, %v687_v28  ;;  %vm619_vm8 = vcmp.eq.f32.partialorder %v618_v43, 8.507059e+37  ;;  %v874_v7 = vadd.f32 1.0, %v1886_v60 }
 0x163   :  { %997 = vadd.xlane.f32.xlu0 %v981_v62  ;;  %vm654_vm9 = vweird.f32 %v648_v40  ;;  %v660_v48 = vand.u32 2147483648, %v648_v40  ;;  %v658_v16 = vand.u32 2147483647, %v648_v40  ;;  %v676_v62 = vmul.f32 %v675_v50, %v2870_v61 }
 0x164   :  { %v901_v15 = vpop.xlane.xlu0 %900  ;;  %v612_v63 = vmul.f32 %v1980_v58, %v611_v32  ;;  %v1982_v53 = vpop.eup %1981  ;;  %1983 = vrcp.f32 %v688_v27  ;;  %v2983_v13 = vmul.f32 %v874_v7, %v202_v52  ;;  %v638_v17 = vmul.f32 %v637_v38, %v2814_v14 }
 0x165   :  { %v931_v21 = vmul.f32 0.03125, %v901_v15  ;;  %v650_v55 = vmul.f32 %v1982_v53, %v648_v40  ;;  %vm655_vm10 = vweird.f32 %v1982_v53  ;;  %v661_v49 = vor.u32 1.1754944e-38, %v660_v48 }
 0x166   :  { %v613_v31 = vadd.f32 %v1980_v58, %v612_v63  ;;  %vm656_vm11 = vmor %vm654_vm9, %vm655_vm10  ;;  %vm659_vm13 = vcmp.eq.f32.partialorder %v658_v16, 8.507059e+37  ;;  %v677_v40 = vadd.f32 1.1283791, %v676_v62  ;;  %vm694_vm14 = vweird.f32 %v688_v27 }
 0x167   :  { %v950_v22 = vsub.f32 %v2513_v57, %v931_v21  ;;  %v651_v20 = vsub.f32 1.0, %v650_v55  ;;  %v700_v44 = vand.u32 2147483648, %v688_v27  ;;  %v698_v19 = vand.u32 2147483647, %v688_v27 }
 0x168   :  { %v617_v4 = vsel %vm2974_vm7, %v1980_v58, %v613_v31  ;;  %v203_v58 = vmul.f32 0.5, %v2670_v1  ;;  %v678_v33 = vmul.f32 %v677_v40, %v2859_v59  ;;  %v204_v43 = vmul.f32 0.5, %v2808_v0 }
 0x169   :  { %v2970_v39 = vsel %vm948_vm12, %v950_v22, 0.0  ;;  %v622_v12 = vsel %vm619_vm8, %v621_v6, %v617_v4  ;;  %v652_v5 = vmul.f32 %v1982_v53, %v651_v20  ;;  %v701_v21 = vor.u32 1.1754944e-38, %v700_v44  ;;  %v1247_v44 = vld [vmem:[#allocation7 + $0x50] sm:$0xff] }
 0x16a   :  { %v982_v18 = vmul.f32 %v2970_v39, %v2970_v39  ;;  %v623_v23 = vmul.f32 %v622_v12, %v598_v26  ;;  %v1984_v56 = vpop.eup %1983  ;;  %vm699_vm1 = vcmp.eq.f32.partialorder %v698_v19, 8.507059e+37  ;;  %v205_v59 = vmul.f32 0.5, %v2850_v29  ;;  %v1243_v19 = vld [vmem:[#allocation7 + $0x30] sm:$0xff] }
 0x16b   :  { %912 = vadd.xlane.f32.xlu0 %v2963_v54  ;;  %v653_v41 = vadd.f32 %v1982_v53, %v652_v5  ;;  %v690_v30 = vmul.f32 %v1984_v56, %v688_v27  ;;  %vm695_vm15 = vweird.f32 %v1984_v56 }
 0x16c   :  { %999 = vadd.xlane.f32.xlu2 %v982_v18  ;;  %v1887_v10 = vclamps-f32 %v623_v23, 1.0  ;;  %vm696_vm0 = vmor %vm694_vm14, %vm695_vm15 }
 0x16d   :  { %v657_v35 = vsel %vm656_vm11, %v1982_v53, %v653_v41  ;;  %v691_v15 = vsub.f32 1.0, %v690_v30 }
 0x16e   :  { %v875_v61 = vadd.f32 1.0, %v1887_v10  ;;  %v662_v51 = vsel %vm659_vm13, %v661_v49, %v657_v35  ;;  %v1251_v10 = vld [vmem:[#allocation7 + $0x70] sm:$0xff] }
 0x16f   :  { %v663_v34 = vmul.f32 %v662_v51, %v638_v17  ;;  %v692_v14 = vmul.f32 %v1984_v56, %v691_v15  ;;  %v1252_v17 = vld [vmem:[#allocation7 + $0x78] sm:$0xff]  ;;  %v1245_v15 = vld [vmem:[#allocation7 + $0x40] sm:$0xff] }
 0x170   :  { %v2988_v36 = vmul.f32 %v875_v61, %v203_v58  ;;  %1257 = vmatpush.msra.mxu1 %v1252_v17  ;;  %1910 = vmatpush.msrb.mxu3 %v1252_v17  ;;  %v1249_v58 = vld [vmem:[#allocation7 + $0x60] sm:$0xff]  ;;  %v1248_v51 = vld [vmem:[#allocation7 + $0x58] sm:$0xff] }
 0x171   :  { %v1888_v37 = vclamps-f32 %v663_v34, 1.0  ;;  %v693_v1 = vadd.f32 %v1984_v56, %v692_v14  ;;  %v1246_v34 = vld [vmem:[#allocation7 + $0x48] sm:$0xff] }
 0x172   :  { %1258 = vmatpush.msra.mxu1 %v1251_v10  ;;  %1911 = vmatpush.msrb.mxu3 %v1251_v10  ;;  %v1242_v14 = vld [vmem:[#allocation7 + $0x28] sm:$0xff] }
 0x173   :  { %914 = vadd.xlane.f32.xlu0 %v2983_v13  ;;  %v697_v32 = vsel %vm696_vm0, %v1984_v56, %v693_v1  ;;  %v876_v28 = vadd.f32 1.0, %v1888_v37 }
 0x174   :  { %v702_v22 = vsel %vm699_vm1, %v701_v21, %v697_v32 }
 0x175   :  { %v703_v60 = vmul.f32 %v702_v22, %v678_v33  ;;  %v2993_v26 = vmul.f32 %v876_v28, %v204_v43  ;;  %v1241_v33 = vld [vmem:[#allocation7 + $0x20] sm:$0xff] }
 0x177   :  { %v1889_v63 = vclamps-f32 %v703_v60, 1.0 }
 0x179   :  { %v877_v38 = vadd.f32 1.0, %v1889_v63 }
 0x17b   :  { %916 = vadd.xlane.f32.xlu0 %v2988_v36  ;;  %v3004_v57 = vmul.f32 %v877_v38, %v205_v59 }
 0x17c   :  { %v903_v52 = vpop.xlane.xlu1 %902 }
 0x17d   :  { %v932_v27 = vmul.f32 0.03125, %v903_v52 }
 0x17f   :  { %v951_v53 = vsub.f32 %v2634_v47, %v932_v27 }
 0x181   :  { %v3000_v50 = vsel %vm948_vm12, %v951_v53, 0.0 }
 0x182   :  { %v983_v0 = vmul.f32 %v3000_v50, %v3000_v50 }
 0x183   :  { %918 = vadd.xlane.f32.xlu0 %v2993_v26 }
 0x184   :  { %1001 = vadd.xlane.f32.xlu2 %v983_v0 }
 0x186   :  { %v905_v6 = vpop.xlane.xlu1 %904 }
 0x187   :  { %v933_v18 = vmul.f32 0.03125, %v905_v6 }
 0x189   :  { %v952_v31 = vsub.f32 %v2665_v46, %v933_v18 }
 0x18b   :  { %920 = vadd.xlane.f32.xlu0 %v3004_v57  ;;  %v3010_v47 = vsel %vm948_vm12, %v952_v31, 0.0 }
 0x18c   :  { %v984_v29 = vmul.f32 %v3010_v47, %v3010_v47 }
 0x18e   :  { %1003 = vadd.xlane.f32.xlu2 %v984_v29 }
 0x194   :  { %v907_v55 = vpop.xlane.xlu2 %906 }
 0x195   :  { %v934_v7 = vmul.f32 0.03125, %v907_v55  ;;  %v1240_v55 = vld [vmem:[#allocation7 + $0x18] sm:$0xff] }
 0x197   :  { %v953_v48 = vsub.f32 %v2721_v25, %v934_v7  ;;  %v1239_v7 = vld [vmem:[#allocation7 + $0x10] sm:$0xff] }
 0x199   :  { %v3017_v4 = vsel %vm948_vm12, %v953_v48, 0.0 }
 0x19a   :  { %v985_v20 = vmul.f32 %v3017_v4, %v3017_v4 }
 0x19c   :  { %v909_v46 = vpop.xlane.xlu2 %908  ;;  %1005 = vadd.xlane.f32.xlu2 %v985_v20 }
 0x19d   :  { %v935_v16 = vmul.f32 0.03125, %v909_v46 }
 0x19f   :  { %v954_v12 = vsub.f32 %v2759_v24, %v935_v16  ;;  %v1250_v24 = vld [vmem:[#allocation7 + $0x68] sm:$0xff] }
 0x1a0   :  { %1259 = vmatpush.msra.mxu1 %v1250_v24  ;;  %1912 = vmatpush.msrb.mxu3 %v1250_v24  ;;  %v1238_v16 = vld [vmem:[#allocation7 + $0x8] sm:$0xff] }
 0x1a1   :  { %v3024_v62 = vsel %vm948_vm12, %v954_v12, 0.0 }
 0x1a2   :  { %v986_v23 = vmul.f32 %v3024_v62, %v3024_v62  ;;  %1260 = vmatpush.msra.mxu1 %v1249_v58  ;;  %1913 = vmatpush.msrb.mxu3 %v1249_v58 }
 0x1a4   :  { %1007 = vadd.xlane.f32.xlu2 %v986_v23  ;;  %1261 = vmatpush.msra.mxu1 %v1248_v51 }
 0x1a5   :  { %1914 = vmatpush.msrb.mxu3 %v1248_v51 }
 0x1a6   :  { %1262 = vmatpush.msra.mxu1 %v1247_v44 }
 0x1a7   :  { %1915 = vmatpush.msrb.mxu3 %v1247_v44 }
 0x1a8   :  { %1263 = vmatpush.msra.mxu1 %v1246_v34 }
 0x1a9   :  { %1916 = vmatpush.msrb.mxu3 %v1246_v34 }
 0x1aa   :  { %1264 = vmatpush.msra.mxu1 %v1245_v15 }
 0x1ab   :  { %1917 = vmatpush.msrb.mxu3 %v1245_v15 }
 0x1ae   :  { %v911_v25 = vpop.xlane.xlu1 %910 }
 0x1af   :  { %v936_v5 = vmul.f32 0.03125, %v911_v25  ;;  %v1237_v25 = vld [vmem:[#allocation7] sm:$0xff] }
 0x1b1   :  { %v955_v49 = vsub.f32 %v2828_v11, %v936_v5 }
 0x1b3   :  { %v3031_v41 = vsel %vm948_vm12, %v955_v49, 0.0 }
 0x1b4   :  { %v987_v56 = vmul.f32 %v3031_v41, %v3031_v41 }
 0x1b6   :  { %1009 = vadd.xlane.f32.xlu1 %v987_v56  ;;  %v923_v40 = vpop.xlane.xlu1 %922 }
 0x1b7   :  { %v942_v35 = vmul.f32 0.03125, %v923_v40 }
 0x1b9   :  { %v961_v11 = vsub.f32 %v2856_v8, %v942_v35  ;;  %v1244_v8 = vld [vmem:[#allocation7 + $0x38] sm:$0xff] }
 0x1ba   :  { %1265 = vmatpush.msra.mxu1 %v1244_v8  ;;  %1918 = vmatpush.msrb.mxu3 %v1244_v8 }
 0x1bb   :  { %v3038_v30 = vsel %vm948_vm12, %v961_v11, 0.0 }
 0x1bc   :  { %v993_v61 = vmul.f32 %v3038_v30, %v3038_v30  ;;  %1266 = vmatpush.msra.mxu1 %v1243_v19  ;;  %1919 = vmatpush.msrb.mxu3 %v1243_v19 }
 0x1be   :  { %1021 = vadd.xlane.f32.xlu0 %v993_v61  ;;  %1267 = vmatpush.msra.mxu1 %v1242_v14  ;;  %v925_v52 = vpop.xlane.xlu1 %924 }
 0x1bf   :  { %1920 = vmatpush.msrb.mxu3 %v1242_v14  ;;  %v943_v0 = vmul.f32 0.03125, %v925_v52 }
 0x1c0   :  { %1268 = vmatpush.msra.mxu1 %v1241_v33 }
 0x1c1   :  { %1921 = vmatpush.msrb.mxu3 %v1241_v33 }
 0x1c2   :  { %1269 = vmatpush.msra.mxu1 %v1240_v55 }
 0x1c3   :  { %1922 = vmatpush.msrb.mxu3 %v1240_v55 }
 0x1c4   :  { %1270 = vmatpush.msra.mxu1 %v1239_v7 }
 0x1c5   :  { %1923 = vmatpush.msrb.mxu3 %v1239_v7 }
 0x1c6   :  { %v927_v46 = vpop.xlane.xlu1 %926  ;;  %1271 = vmatpush.msra.mxu1 %v1238_v16 }
 0x1c7   :  { %1924 = vmatpush.msrb.mxu3 %v1238_v16  ;;  %v944_v17 = vmul.f32 0.03125, %v927_v46 }
 0x1c8   :  { %1272 = vmatpush.msra.mxu1 %v1237_v25 }
 0x1c9   :  { %1925 = vmatpush.msrb.mxu3 %v1237_v25  ;;  %v963_v35 = vsub.f32 %v2912_v45, %v944_v17 }
 0x1cb   :  { %v3077_v14 = vsel %vm948_vm12, %v963_v35, 0.0 }
 0x1ce   :  { %v929_v51 = vpop.xlane.xlu1 %928 }
 0x1cf   :  { %v945_v8 = vmul.f32 0.03125, %v929_v51 }
 0x1d6   :  { %v998_v37 = vpop.xlane.xlu0 %997 }
 0x1d7   :  { %v1029_v21 = vmul.f32 0.03125, %v998_v37 }
 0x1d9   :  { %v1045_v1 = vadd.f32 1e-06, %v1029_v21 }
 0x1db   :  { %1985 = vrsqrt.f32 %v1045_v1  ;;  %vm1067_vm3 = vweird.f32 %v1045_v1 }
 0x1de   :  { %v913_v22 = vpop.xlane.xlu0 %912 }
 0x1df   :  { %v1000_v32 = vpop.xlane.xlu2 %999  ;;  %v937_v27 = vmul.f32 0.03125, %v913_v22 }
 0x1e0   :  { %v1030_v43 = vmul.f32 0.03125, %v1000_v32 }
 0x1e1   :  { %v1986_v28 = vpop.eup %1985  ;;  %v956_v59 = vsub.f32 %v2963_v54, %v937_v27  ;;  %v962_v54 = vsub.f32 %v2881_v42, %v943_v0 }
 0x1e2   :  { %v3042_v60 = vadd.f32 1e-06, %v1030_v43  ;;  %v1062_v63 = vmul.f32 %v1986_v28, %v1045_v1  ;;  %vm1068_vm2 = vweird.f32 %v1986_v28  ;;  %v964_v1 = vsub.f32 %v2929_v2, %v945_v8 }
 0x1e3   :  { %v3052_v31 = vsel %vm948_vm12, %v956_v59, 0.0  ;;  %v3061_v49 = vsel %vm948_vm12, %v962_v54, 0.0  ;;  %vm1069_vm4 = vmor %vm1067_vm3, %vm1068_vm2 }
 0x1e4   :  { %1987 = vrsqrt.f32 %v3042_v60  ;;  %v1063_v53 = vmul.f32 %v1986_v28, %v1062_v63  ;;  %v988_v48 = vmul.f32 %v3052_v31, %v3052_v31  ;;  %v994_v24 = vmul.f32 %v3061_v49, %v3061_v49 }
 0x1e5   :  { %vm1077_vm6 = vweird.f32 %v3042_v60 }
 0x1e6   :  { %v1064_v6 = vmul.f32 0.5, %v1063_v53  ;;  %v915_v29 = vpop.xlane.xlu0 %914  ;;  %1011 = vadd.xlane.f32.xlu2 %v988_v48 }
 0x1e7   :  { %v938_v20 = vmul.f32 0.03125, %v915_v29 }
 0x1e8   :  { %v1065_v12 = vsub.f32 1.5, %v1064_v6 }
 0x1e9   :  { %v957_v5 = vsub.f32 %v2983_v13, %v938_v20 }
 0x1ea   :  { %v3046_v38 = vpop.eup %1987  ;;  %v1066_v10 = vmul.f32 %v1986_v28, %v1065_v12 }
 0x1eb   :  { %v1072_v18 = vmul.f32 %v3046_v38, %v3042_v60  ;;  %v3067_v56 = vsel %vm948_vm12, %v957_v5, 0.0  ;;  %vm1078_vm5 = vweird.f32 %v3046_v38  ;;  %v3095_v60 = vsel %vm948_vm12, %v964_v1, 0.0  ;;  %v1336_v1 = vld [vmem:[#allocation8 + $0x70] sm:$0xff] }
 0x1ec   :  { %v989_v13 = vmul.f32 %v3067_v56, %v3067_v56  ;;  %v1070_v40 = vsel %vm1069_vm4, %v1986_v28, %v1066_v10  ;;  %vm1079_vm7 = vmor %vm1077_vm6, %vm1078_vm5 }
 0x1ed   :  { %v1073_v23 = vmul.f32 %v3046_v38, %v1072_v18  ;;  %v1221_v61 = vmul.f32 %v1070_v40, %v2950_v9 }
 0x1ee   :  { %v917_v58 = vpop.xlane.xlu0 %916  ;;  %1023 = vadd.xlane.f32.xlu2 %v994_v24  ;;  %1013 = vadd.xlane.f32.xlu1 %v989_v13 }
 0x1ef   :  { %v1074_v42 = vmul.f32 0.5, %v1073_v23  ;;  %v939_v11 = vmul.f32 0.03125, %v917_v58  ;;  %1273 = vmatmul.f32.vlgmr.msra.gmra.mxu1 %v1221_v61 }
 0x1f1   :  { %v1075_v44 = vsub.f32 1.5, %v1074_v42  ;;  %v958_v34 = vsub.f32 %v2988_v36, %v939_v11  ;;  %v995_v36 = vmul.f32 %v3077_v14, %v3077_v14 }
 0x1f3   :  { %v1076_v45 = vmul.f32 %v3046_v38, %v1075_v44  ;;  %v3083_v37 = vsel %vm948_vm12, %v958_v34, 0.0 }
 0x1f4   :  { %v990_v21 = vmul.f32 %v3083_v37, %v3083_v37 }
 0x1f5   :  { %v1080_v33 = vsel %vm1079_vm7, %v3046_v38, %v1076_v45 }
 0x1f6   :  { %v1222_v32 = vmul.f32 %v1080_v33, %v2970_v39  ;;  %1025 = vadd.xlane.f32.xlu1 %v995_v36  ;;  %1015 = vadd.xlane.f32.xlu0 %v990_v21  ;;  %v919_v43 = vpop.xlane.xlu0 %918  ;;  %v996_v39 = vmul.f32 %v3095_v60, %v3095_v60  ;;  %v1337_v33 = vld [vmem:[#allocation8 + $0x78] sm:$0xff] }
 0x1f7   :  { %v1002_v15 = vpop.xlane.xlu2 %1001  ;;  %v940_v28 = vmul.f32 0.03125, %v919_v43  ;;  %1342 = vmatpush.msra.mxu2 %v1337_v33  ;;  %1926 = vmatpush.msra.mxu3 %v1337_v33 }
 0x1f8   :  { %v1031_v19 = vmul.f32 0.03125, %v1002_v15  ;;  %1276 = vmatmul.f32.gmra.mxu1 %v1222_v32 }
 0x1f9   :  { %v959_v22 = vsub.f32 %v2993_v26, %v940_v28  ;;  %v1335_v28 = vld [vmem:[#allocation8 + $0x68] sm:$0xff]  ;;  %1343 = vmatpush.msra.mxu2 %v1336_v1  ;;  %1927 = vmatpush.msra.mxu3 %v1336_v1 }
 0x1fa   :  { %v1047_v9 = vadd.f32 1e-06, %v1031_v19 }
 0x1fb   :  { %v3099_v2 = vsel %vm948_vm12, %v959_v22, 0.0  ;;  %1344 = vmatpush.msra.mxu2 %v1335_v28  ;;  %1928 = vmatpush.msra.mxu3 %v1335_v28 }
 0x1fc   :  { %1989 = vrsqrt.f32 %v1047_v9  ;;  %v991_v59 = vmul.f32 %v3099_v2, %v3099_v2  ;;  %vm1087_vm9 = vweird.f32 %v1047_v9 }
 0x1fe   :  { %1027 = vadd.xlane.f32.xlu0 %v996_v39  ;;  %1017 = vadd.xlane.f32.xlu2 %v991_v59  ;;  %v921_v0 = vpop.xlane.xlu0 %920 }
 0x1ff   :  { %v941_v6 = vmul.f32 0.03125, %v921_v0 }
 0x201   :  { %v1004_v52 = vpop.xlane.xlu2 %1003  ;;  %v960_v29 = vsub.f32 %v3004_v57, %v941_v6 }
 0x202   :  { %v1990_v63 = vpop.eup %1989  ;;  %v1032_v27 = vmul.f32 0.03125, %v1004_v52  ;;  %v1334_v52 = vld [vmem:[#allocation8 + $0x60] sm:$0xff] }
 0x203   :  { %v1082_v53 = vmul.f32 %v1990_v63, %v1047_v9  ;;  %vm1088_vm8 = vweird.f32 %v1990_v63  ;;  %v3108_v7 = vsel %vm948_vm12, %v960_v29, 0.0  ;;  %1345 = vmatpush.msra.mxu2 %v1334_v52  ;;  %1929 = vmatpush.msra.mxu3 %v1334_v52 }
 0x204   :  { %v1048_v38 = vadd.f32 1e-06, %v1032_v27  ;;  %v992_v20 = vmul.f32 %v3108_v7, %v3108_v7  ;;  %vm1089_vm10 = vmor %vm1087_vm9, %vm1088_vm8 }
 0x205   :  { %v1083_v26 = vmul.f32 %v1990_v63, %v1082_v53 }
 0x206   :  { %1991 = vrsqrt.f32 %v1048_v38  ;;  %1019 = vadd.xlane.f32.xlu1 %v992_v20  ;;  %vm1097_vm11 = vweird.f32 %v1048_v38 }
 0x207   :  { %v1084_v18 = vmul.f32 0.5, %v1083_v26 }
 0x209   :  { %v1085_v55 = vsub.f32 1.5, %v1084_v18 }
 0x20b   :  { %v1086_v48 = vmul.f32 %v1990_v63, %v1085_v55 }
 0x20c   :  { %v1992_v54 = vpop.eup %1991 }
 0x20d   :  { %v1092_v46 = vmul.f32 %v1992_v54, %v1048_v38  ;;  %v1090_v16 = vsel %vm1089_vm10, %v1990_v63, %v1086_v48  ;;  %vm1098_vm12 = vweird.f32 %v1992_v54  ;;  %v1333_v63 = vld [vmem:[#allocation8 + $0x58] sm:$0xff] }
 0x20e   :  { %v1223_v12 = vmul.f32 %v1090_v16, %v3000_v50  ;;  %vm1099_vm13 = vmor %vm1097_vm11, %vm1098_vm12  ;;  %1346 = vmatpush.msra.mxu2 %v1333_v63  ;;  %1930 = vmatpush.msra.mxu3 %v1333_v63 }
 0x20f   :  { %v1093_v23 = vmul.f32 %v1992_v54, %v1092_v46  ;;  %v1006_v57 = vpop.xlane.xlu2 %1005 }
 0x210   :  { %v1033_v25 = vmul.f32 0.03125, %v1006_v57  ;;  %1279 = vmatmul.f32.gmra.mxu1 %v1223_v12  ;;  %v1332_v57 = vld [vmem:[#allocation8 + $0x50] sm:$0xff] }
 0x211   :  { %v1094_v5 = vmul.f32 0.5, %v1093_v23  ;;  %1347 = vmatpush.msra.mxu2 %v1332_v57  ;;  %1931 = vmatpush.msra.mxu3 %v1332_v57 }
 0x212   :  { %v1049_v3 = vadd.f32 1e-06, %v1033_v25  ;;  %v1331_v25 = vld [vmem:[#allocation8 + $0x48] sm:$0xff] }
 0x213   :  { %v1095_v17 = vsub.f32 1.5, %v1094_v5  ;;  %v1330_v5 = vld [vmem:[#allocation8 + $0x40] sm:$0xff]  ;;  %1348 = vmatpush.msra.mxu2 %v1331_v25  ;;  %1932 = vmatpush.msra.mxu3 %v1331_v25 }
 0x214   :  { %1993 = vrsqrt.f32 %v1049_v3  ;;  %vm1107_vm15 = vweird.f32 %v1049_v3 }
 0x215   :  { %v1096_v42 = vmul.f32 %v1992_v54, %v1095_v17  ;;  %1349 = vmatpush.msra.mxu2 %v1330_v5  ;;  %1933 = vmatpush.msra.mxu3 %v1330_v5  ;;  %v1327_v17 = vld [vmem:[#allocation8 + $0x28] sm:$0xff] }
 0x217   :  { %v1008_v10 = vpop.xlane.xlu2 %1007  ;;  %v1100_v24 = vsel %vm1099_vm13, %v1992_v54, %v1096_v42  ;;  %v1326_v42 = vld [vmem:[#allocation8 + $0x20] sm:$0xff] }
 0x218   :  { %v1034_v13 = vmul.f32 0.03125, %v1008_v10  ;;  %v1224_v58 = vmul.f32 %v1100_v24, %v3010_v47 }
 0x21a   :  { %v1994_v40 = vpop.eup %1993  ;;  %v1050_v35 = vadd.f32 1e-06, %v1034_v13  ;;  %1282 = vmatmul.f32.gmra.mxu1 %v1224_v58  ;;  %v1324_v58 = vld [vmem:[#allocation8 + $0x10] sm:$0xff] }
 0x21b   :  { %v1102_v50 = vmul.f32 %v1994_v40, %v1049_v3  ;;  %vm1108_vm14 = vweird.f32 %v1994_v40  ;;  %v1329_v3 = vld [vmem:[#allocation8 + $0x38] sm:$0xff] }
 0x21c   :  { %1995 = vrsqrt.f32 %v1050_v35  ;;  %vm1109_vm0 = vmor %vm1107_vm15, %vm1108_vm14  ;;  %vm1117_vm2 = vweird.f32 %v1050_v35  ;;  %1350 = vmatpush.msra.mxu2 %v1329_v3  ;;  %1934 = vmatpush.msra.mxu3 %v1329_v3 }
 0x21d   :  { %v1103_v11 = vmul.f32 %v1994_v40, %v1102_v50 }
 0x21f   :  { %v1104_v61 = vmul.f32 0.5, %v1103_v11 }
 0x221   :  { %v1105_v51 = vsub.f32 1.5, %v1104_v61 }
 0x222   :  { %v1996_v44 = vpop.eup %1995 }
 0x223   :  { %v1112_v34 = vmul.f32 %v1996_v44, %v1050_v35  ;;  %v1106_v15 = vmul.f32 %v1994_v40, %v1105_v51  ;;  %vm1118_vm1 = vweird.f32 %v1996_v44  ;;  %v1322_v35 = vld [vmem:[#allocation8] sm:$0xff] }
 0x224   :  { %vm1119_vm3 = vmor %vm1117_vm2, %vm1118_vm1 }
 0x225   :  { %v1113_v8 = vmul.f32 %v1996_v44, %v1112_v34  ;;  %v1110_v19 = vsel %vm1109_vm0, %v1994_v40, %v1106_v15  ;;  %v1323_v40 = vld [vmem:[#allocation8 + $0x8] sm:$0xff] }
 0x226   :  { %v1225_v45 = vmul.f32 %v1110_v19, %v3017_v4 }
 0x227   :  { %v1114_v9 = vmul.f32 0.5, %v1113_v8 }
 0x228   :  { %1285 = vmatmul.f32.gmra.mxu1 %v1225_v45 }
 0x229   :  { %v1115_v47 = vsub.f32 1.5, %v1114_v9  ;;  %v1010_v36 = vpop.xlane.xlu1 %1009 }
 0x22a   :  { %v1035_v21 = vmul.f32 0.03125, %v1010_v36  ;;  %v3124_v36 = vld [vmem:[%s3464_s4] ss:$0 sm:$0xff] }
 0x22b   :  { %v1116_v32 = vmul.f32 %v1996_v44, %v1115_v47 }
 0x22c   :  { %v1051_v43 = vadd.f32 1e-06, %v1035_v21 }
 0x22d   :  { %v1120_v22 = vsel %vm1119_vm3, %v1996_v44, %v1116_v32 }
 0x22e   :  { %1997 = vrsqrt.f32 %v1051_v43  ;;  %v1226_v4 = vmul.f32 %v1120_v22, %v3024_v62  ;;  %vm1127_vm5 = vweird.f32 %v1051_v43 }
 0x230   :  { %1288 = vmatmul.f32.gmra.mxu1 %v1226_v4 }
 0x231   :  { %v1022_v27 = vpop.xlane.xlu0 %1021 }
 0x232   :  { %v1041_v53 = vmul.f32 0.03125, %v1022_v27 }
 0x234   :  { %v1998_v39 = vpop.eup %1997  ;;  %v1057_v59 = vadd.f32 1e-06, %v1041_v53 }
 0x235   :  { %v1122_v38 = vmul.f32 %v1998_v39, %v1051_v43  ;;  %vm1128_vm4 = vweird.f32 %v1998_v39 }
 0x236   :  { %1999 = vrsqrt.f32 %v1057_v59  ;;  %vm1129_vm6 = vmor %vm1127_vm5, %vm1128_vm4  ;;  %vm1187_vm8 = vweird.f32 %v1057_v59 }
 0x237   :  { %v1123_v26 = vmul.f32 %v1998_v39, %v1122_v38 }
 0x239   :  { %v1124_v0 = vmul.f32 0.5, %v1123_v26 }
 0x23b   :  { %v1125_v6 = vsub.f32 1.5, %v1124_v0 }
 0x23c   :  { %v2000_v62 = vpop.eup %1999 }
 0x23d   :  { %v1182_v18 = vmul.f32 %v2000_v62, %v1057_v59  ;;  %v1126_v29 = vmul.f32 %v1998_v39, %v1125_v6  ;;  %vm1188_vm7 = vweird.f32 %v2000_v62 }
 0x23e   :  { %vm1189_vm9 = vmor %vm1187_vm8, %vm1188_vm7 }
 0x23f   :  { %v1183_v55 = vmul.f32 %v2000_v62, %v1182_v18  ;;  %v1130_v48 = vsel %vm1129_vm6, %v1998_v39, %v1126_v29 }
 0x240   :  { %v1227_v20 = vmul.f32 %v1130_v48, %v3031_v41  ;;  %v1328_v41 = vld [vmem:[#allocation8 + $0x30] sm:$0xff] }
 0x241   :  { %v1184_v54 = vmul.f32 0.5, %v1183_v55  ;;  %1351 = vmatpush.msra.mxu2 %v1328_v41  ;;  %1935 = vmatpush.msra.mxu3 %v1328_v41 }
 0x242   :  { %1291 = vmatmul.f32.gmra.mxu1 %v1227_v20 }
 0x243   :  { %v1185_v46 = vsub.f32 1.5, %v1184_v54  ;;  %1352 = vmatpush.msra.mxu2 %v1327_v17  ;;  %1936 = vmatpush.msra.mxu3 %v1327_v17 }
 0x245   :  { %v1186_v16 = vmul.f32 %v2000_v62, %v1185_v46  ;;  %1353 = vmatpush.msra.mxu2 %v1326_v42  ;;  %1937 = vmatpush.msra.mxu3 %v1326_v42 }
 0x247   :  { %v1190_v12 = vsel %vm1189_vm9, %v2000_v62, %v1186_v16 }
 0x248   :  { %v1233_v23 = vmul.f32 %v1190_v12, %v3038_v30  ;;  %v1325_v30 = vld [vmem:[#allocation8 + $0x18] sm:$0xff] }
 0x249   :  { %1354 = vmatpush.msra.mxu2 %v1325_v30  ;;  %1938 = vmatpush.msra.mxu3 %v1325_v30 }
 0x24a   :  { %1309 = vmatmul.f32.vlgmr.msrb.gmra.mxu3 %v1233_v23 }
 0x24b   :  { %1355 = vmatpush.msra.mxu2 %v1324_v58  ;;  %1939 = vmatpush.msra.mxu3 %v1324_v58 }
 0x24d   :  { %1356 = vmatpush.msra.mxu2 %v1323_v40  ;;  %1940 = vmatpush.msra.mxu3 %v1323_v40 }
 0x24f   :  { %1357 = vmatpush.msra.mxu2 %v1322_v35  ;;  %1941 = vmatpush.msra.mxu3 %v1322_v35 }
 0x259   :  { %v1012_v10 = vpop.xlane.xlu2 %1011 }
 0x25a   :  { %v1036_v24 = vmul.f32 0.03125, %v1012_v10 }
 0x25c   :  { %v1052_v13 = vadd.f32 1e-06, %v1036_v24 }
 0x25e   :  { %2001 = vrsqrt.f32 %v1052_v13  ;;  %vm1137_vm12 = vweird.f32 %v1052_v13 }
 0x261   :  { %v1024_v50 = vpop.xlane.xlu2 %1023  ;;  %v1014_v61 = vpop.xlane.xlu1 %1013 }
 0x262   :  { %v1042_v11 = vmul.f32 0.03125, %v1024_v50  ;;  %v1037_v51 = vmul.f32 0.03125, %v1014_v61 }
 0x264   :  { %v2002_v44 = vpop.eup %2001  ;;  %v3118_v34 = vadd.f32 1e-06, %v1042_v11  ;;  %v1053_v8 = vadd.f32 1e-06, %v1037_v51 }
 0x265   :  { %v1132_v15 = vmul.f32 %v2002_v44, %v1052_v13  ;;  %vm1138_vm10 = vweird.f32 %v2002_v44 }
 0x266   :  { %2003 = vrsqrt.f32 %v3118_v34  ;;  %vm1139_vm11 = vmor %vm1137_vm12, %vm1138_vm10  ;;  %vm1147_vm15 = vweird.f32 %v1053_v8  ;;  %vm1197_vm0 = vweird.f32 %v3118_v34 }
 0x267   :  { %v1133_v19 = vmul.f32 %v2002_v44, %v1132_v15  ;;  %2005 = vrsqrt.f32 %v1053_v8 }
 0x269   :  { %v1134_v45 = vmul.f32 0.5, %v1133_v19  ;;  %v1026_v9 = vpop.xlane.xlu1 %1025  ;;  %v1016_v47 = vpop.xlane.xlu0 %1015 }
 0x26a   :  { %v1043_v33 = vmul.f32 0.03125, %v1026_v9  ;;  %v1038_v1 = vmul.f32 0.03125, %v1016_v47 }
 0x26b   :  { %v1135_v21 = vsub.f32 1.5, %v1134_v45 }
 0x26c   :  { %v2004_v32 = vpop.eup %2003  ;;  %v3127_v22 = vadd.f32 1e-06, %v1043_v33  ;;  %v3129_v4 = vadd.f32 1e-06, %v1038_v1  ;;  %v1274_v52 = vpop.f32.mrf.mxu1 }
 0x26d   :  { %v2006_v43 = vpop.eup %2005  ;;  %v1192_v28 = vmul.f32 %v2004_v32, %v3118_v34  ;;  %v1136_v63 = vmul.f32 %v2002_v44, %v1135_v21  ;;  %v3132_v53 = vadd.f32 %v3124_v36, %v1274_v52  ;;  %vm1198_vm14 = vweird.f32 %v2004_v32 }
 0x26e   :  { %v1142_v27 = vmul.f32 %v2006_v43, %v1053_v8  ;;  %2007 = vrsqrt.f32 %v3127_v22  ;;  %vm1148_vm13 = vweird.f32 %v2006_v43  ;;  %vm1199_vm2 = vmor %vm1197_vm0, %vm1198_vm14  ;;  %vm1207_vm5 = vweird.f32 %v3127_v22 }
 0x26f   :  { %v1193_v39 = vmul.f32 %v2004_v32, %v1192_v28  ;;  %2009 = vrsqrt.f32 %v3129_v4  ;;  %1358 = vmatmul.f32.vlgmr.msra.gmra.mxu2 %v3132_v53  ;;  %v1583_v38 = vmul.f32 %v3132_v53, %v3132_v53  ;;  %v1140_v26 = vsel %vm1139_vm11, %v2002_v44, %v1136_v63  ;;  %vm1149_vm1 = vmor %vm1147_vm15, %vm1148_vm13 }
 0x270   :  { %v1143_v59 = vmul.f32 %v2006_v43, %v1142_v27  ;;  %v1228_v6 = vmul.f32 %v1140_v26, %v3052_v31  ;;  %vm1157_vm6 = vweird.f32 %v3129_v4 }
 0x271   :  { %v1194_v0 = vmul.f32 0.5, %v1193_v39  ;;  %1599 = vadd.xlane.f32.xlu2 %v1583_v38  ;;  %v1018_v18 = vpop.xlane.xlu2 %1017  ;;  %v1028_v29 = vpop.xlane.xlu0 %1027 }
 0x272   :  { %v1144_v62 = vmul.f32 0.5, %v1143_v59  ;;  %v1039_v48 = vmul.f32 0.03125, %v1018_v18  ;;  %v1044_v20 = vmul.f32 0.03125, %v1028_v29  ;;  %1294 = vmatmul.f32.gmra.mxu1 %v1228_v6 }
 0x273   :  { %v1195_v55 = vsub.f32 1.5, %v1194_v0 }
 0x274   :  { %v1145_v54 = vsub.f32 1.5, %v1144_v62  ;;  %v2008_v46 = vpop.eup %2007  ;;  %v3140_v16 = vadd.f32 1e-06, %v1039_v48  ;;  %v3142_v12 = vadd.f32 1e-06, %v1044_v20 }
 0x275   :  { %v1277_v23 = vpop.f32.mrf.mxu1  ;;  %v1196_v57 = vmul.f32 %v2004_v32, %v1195_v55  ;;  %v2010_v25 = vpop.eup %2009  ;;  %v1202_v31 = vmul.f32 %v2008_v46, %v3127_v22  ;;  %vm1208_vm3 = vweird.f32 %v2008_v46 }
 0x276   :  { %v3146_v5 = vadd.f32 %v3124_v36, %v1277_v23  ;;  %v1146_v3 = vmul.f32 %v2006_v43, %v1145_v54  ;;  %v1152_v41 = vmul.f32 %v2010_v25, %v3129_v4  ;;  %2011 = vrsqrt.f32 %v3140_v16  ;;  %vm1209_vm7 = vmor %vm1207_vm5, %vm1208_vm3 }
 0x277   :  { %v1203_v17 = vmul.f32 %v2008_v46, %v1202_v31  ;;  %2013 = vrsqrt.f32 %v3142_v12  ;;  %v1200_v13 = vsel %vm1199_vm2, %v2004_v32, %v1196_v57  ;;  %vm1158_vm4 = vweird.f32 %v2010_v25 }
 0x278   :  { %1361 = vmatmul.f32.gmra.mxu2 %v3146_v5  ;;  %v1584_v42 = vmul.f32 %v3146_v5, %v3146_v5  ;;  %v1150_v30 = vsel %vm1149_vm1, %v2006_v43, %v1146_v3  ;;  %v1153_v10 = vmul.f32 %v2010_v25, %v1152_v41  ;;  %v1234_v35 = vmul.f32 %v1200_v13, %v3061_v49  ;;  %vm1159_vm8 = vmor %vm1157_vm6, %vm1158_vm4 }
 0x279   :  { %v1229_v24 = vmul.f32 %v1150_v30, %v3067_v56  ;;  %v1204_v58 = vmul.f32 0.5, %v1203_v17  ;;  %v1020_v40 = vpop.xlane.xlu1 %1019  ;;  %vm1167_vm12 = vweird.f32 %v3140_v16  ;;  %vm1217_vm11 = vweird.f32 %v3142_v12 }
 0x27a   :  { %1601 = vadd.xlane.f32.xlu0 %v1584_v42  ;;  %v1154_v50 = vmul.f32 0.5, %v1153_v10  ;;  %v1040_v11 = vmul.f32 0.03125, %v1020_v40  ;;  %1312 = vmatmul.f32.gmra.mxu3 %v1234_v35  ;;  %v3207_v40 = vld [vmem:[%s3466_s6] ss:$0 sm:$0xff]  ;;  %s2274_s6 = smov [#allocation11]  }
 0x27b   :  { %1297 = vmatmul.f32.gmra.mxu1 %v1229_v24  ;;  %v1205_v61 = vsub.f32 1.5, %v1204_v58  ;;  %s1856_s29 = sshll.u32 %s2274_s6, 4  ;;  %s1857_s29 = int_to_ptr.vmem [resolvable:$true] %s1856_s29 }
 0x27c   :  { %v2012_v51 = vpop.eup %2011  ;;  %v1155_v44 = vsub.f32 1.5, %v1154_v50  ;;  %v1056_v34 = vadd.f32 1e-06, %v1040_v11 }
 0x27d   :  { %v2014_v15 = vpop.eup %2013  ;;  %v1162_v56 = vmul.f32 %v2012_v51, %v3140_v16  ;;  %v1206_v8 = vmul.f32 %v2008_v46, %v1205_v61  ;;  %vm1168_vm9 = vweird.f32 %v2012_v51 }
 0x27e   :  { %v1212_v49 = vmul.f32 %v2014_v15, %v3142_v12  ;;  %2015 = vrsqrt.f32 %v1056_v34  ;;  %v1156_v19 = vmul.f32 %v2010_v25, %v1155_v44  ;;  %vm1218_vm10 = vweird.f32 %v2014_v15  ;;  %vm1169_vm13 = vmor %vm1167_vm12, %vm1168_vm9 }
 0x27f   :  { %v1163_v45 = vmul.f32 %v2012_v51, %v1162_v56  ;;  %v1210_v9 = vsel %vm1209_vm7, %v2008_v46, %v1206_v8  ;;  %vm1219_vm14 = vmor %vm1217_vm11, %vm1218_vm10  ;;  %vm1177_vm0 = vweird.f32 %v1056_v34 }
 0x280   :  { %v1213_v47 = vmul.f32 %v2014_v15, %v1212_v49  ;;  %v1160_v21 = vsel %vm1159_vm8, %v2010_v25, %v1156_v19  ;;  %v1235_v33 = vmul.f32 %v1210_v9, %v3077_v14 }
 0x281   :  { %v1164_v1 = vmul.f32 0.5, %v1163_v45  ;;  %v1230_v32 = vmul.f32 %v1160_v21, %v3083_v37 }
 0x282   :  { %v1214_v43 = vmul.f32 0.5, %v1213_v47  ;;  %1315 = vmatmul.f32.gmra.mxu3 %v1235_v33 }
 0x283   :  { %v1165_v28 = vsub.f32 1.5, %v1164_v1  ;;  %1300 = vmatmul.f32.gmra.mxu1 %v1230_v32 }
 0x284   :  { %v2016_v22 = vpop.eup %2015  ;;  %v1215_v4 = vsub.f32 1.5, %v1214_v43 }
 0x285   :  { %v1172_v52 = vmul.f32 %v2016_v22, %v1056_v34  ;;  %v1166_v63 = vmul.f32 %v2012_v51, %v1165_v28  ;;  %vm1178_vm15 = vweird.f32 %v2016_v22 }
 0x286   :  { %v1216_v14 = vmul.f32 %v2014_v15, %v1215_v4  ;;  %vm1179_vm1 = vmor %vm1177_vm0, %vm1178_vm15 }
 0x287   :  { %v1173_v39 = vmul.f32 %v2016_v22, %v1172_v52  ;;  %v1170_v59 = vsel %vm1169_vm13, %v2012_v51, %v1166_v63 }
 0x288   :  { %v1231_v38 = vmul.f32 %v1170_v59, %v3099_v2  ;;  %v1220_v26 = vsel %vm1219_vm14, %v2014_v15, %v1216_v14 }
 0x289   :  { %v1174_v0 = vmul.f32 0.5, %v1173_v39  ;;  %v1236_v62 = vmul.f32 %v1220_v26, %v3095_v60 }
 0x28b   :  { %v1175_v18 = vsub.f32 1.5, %v1174_v0  ;;  %1303 = vmatmul.f32.gmra.mxu1 %v1231_v38  ;;  %1318 = vmatmul.f32.gmra.mxu3 %v1236_v62 }
 0x28d   :  { %v1280_v27 = vpop.f32.mrf.mxu1  ;;  %v1176_v29 = vmul.f32 %v2016_v22, %v1175_v18 }
 0x28e   :  { %v3168_v37 = vadd.f32 %v3124_v36, %v1280_v27 }
 0x28f   :  { %v1180_v55 = vsel %vm1179_vm1, %v2016_v22, %v1176_v29 }
 0x290   :  { %1364 = vmatmul.f32.gmra.mxu2 %v3168_v37  ;;  %v1585_v6 = vmul.f32 %v3168_v37, %v3168_v37  ;;  %v1232_v2 = vmul.f32 %v1180_v55, %v3108_v7 }
 0x292   :  { %1603 = vadd.xlane.f32.xlu1 %v1585_v6 }
 0x293   :  { %1306 = vmatmul.f32.gmra.mxu1 %v1232_v2 }
 0x297   :  { %v1283_v48 = vpop.f32.mrf.mxu1 }
 0x298   :  { %v3177_v20 = vadd.f32 %v3124_v36, %v1283_v48 }
 0x29a   :  { %1367 = vmatmul.f32.gmra.mxu2 %v3177_v20  ;;  %v1586_v60 = vmul.f32 %v3177_v20, %v3177_v20 }
 0x29c   :  { %1605 = vadd.xlane.f32.xlu2 %v1586_v60 }
 0x2a5   :  { %v1286_v54 = vpop.f32.mrf.mxu1 }
 0x2a6   :  { %v3183_v46 = vadd.f32 %v3124_v36, %v1286_v54 }
 0x2a8   :  { %1370 = vmatmul.f32.gmra.mxu2 %v3183_v46  ;;  %v1587_v16 = vmul.f32 %v3183_v46, %v3183_v46 }
 0x2aa   :  { %1607 = vadd.xlane.f32.xlu0 %v1587_v16 }
 0x2ad   :  { %v1289_v7 = vpop.f32.mrf.mxu1 }
 0x2ae   :  { %v3189_v12 = vadd.f32 %v3124_v36, %v1289_v7 }
 0x2b0   :  { %1373 = vmatmul.f32.gmra.mxu2 %v3189_v12  ;;  %v1588_v23 = vmul.f32 %v3189_v12, %v3189_v12 }
 0x2b2   :  { %1609 = vadd.xlane.f32.xlu1 %v1588_v23 }
 0x2bf   :  { %v1292_v57 = vpop.f32.mrf.mxu1 }
 0x2c0   :  { %v3195_v25 = vadd.f32 %v3124_v36, %v1292_v57 }
 0x2c2   :  { %1376 = vmatmul.f32.gmra.mxu2 %v3195_v25  ;;  %v1589_v31 = vmul.f32 %v3195_v25, %v3195_v25 }
 0x2c4   :  { %1611 = vadd.xlane.f32.xlu2 %v1589_v31 }
 0x2cd   :  { %v1310_v3 = vpop.f32.mrf.mxu3 }
 0x2ce   :  { %v3201_v41 = vadd.f32 %v3124_v36, %v1310_v3 }
 0x2d0   :  { %1394 = vmatmul.f32.vlgmr.msra.gmra.mxu3 %v3201_v41 }
 0x2e4   :  { %v1600_v17 = vpop.xlane.xlu2 %1599 }
 0x2e5   :  { %v1631_v42 = vadd.f32 1e-30, %v1600_v17 }
 0x2e7   :  { %2017 = vrsqrt.f32 %v1631_v42  ;;  %vm1653_vm3 = vweird.f32 %v1631_v42 }
 0x2ed   :  { %v1602_v30 = vpop.xlane.xlu0 %1601  ;;  %v2018_v10 = vpop.eup %2017 }
 0x2ee   :  { %v1632_v24 = vadd.f32 1e-30, %v1602_v30  ;;  %v1648_v13 = vmul.f32 %v2018_v10, %v1631_v42  ;;  %vm1654_vm2 = vweird.f32 %v2018_v10 }
 0x2ef   :  { %v1295_v58 = vpop.f32.mrf.mxu1  ;;  %vm1655_vm4 = vmor %vm1653_vm3, %vm1654_vm2 }
 0x2f0   :  { %2019 = vrsqrt.f32 %v1632_v24  ;;  %v1649_v35 = vmul.f32 %v2018_v10, %v1648_v13  ;;  %v3210_v50 = vadd.f32 %v3124_v36, %v1295_v58  ;;  %vm1663_vm6 = vweird.f32 %v1632_v24 }
 0x2f2   :  { %v1650_v11 = vmul.f32 0.5, %v1649_v35  ;;  %v1359_v61 = vpop.f32.mrf.mxu2  ;;  %1379 = vmatmul.f32.gmra.mxu2 %v3210_v50  ;;  %v1590_v51 = vmul.f32 %v3210_v50, %v3210_v50 }
 0x2f3   :  { %v3216_v44 = vadd.f32 %v3207_v40, %v1359_v61 }
 0x2f4   :  { %v1651_v34 = vsub.f32 1.5, %v1650_v11  ;;  %1613 = vadd.xlane.f32.xlu0 %v1590_v51 }
 0x2f5   :  { %1407 = vmax.xlane.f32.xlu2 %v3216_v44 }
 0x2f6   :  { %v2020_v15 = vpop.eup %2019  ;;  %v1652_v56 = vmul.f32 %v2018_v10, %v1651_v34 }
 0x2f7   :  { %v1658_v8 = vmul.f32 %v2020_v15, %v1632_v24  ;;  %vm1664_vm5 = vweird.f32 %v2020_v15 }
 0x2f8   :  { %v1298_v49 = vpop.f32.mrf.mxu1  ;;  %v1656_v19 = vsel %vm1655_vm4, %v2018_v10, %v1652_v56  ;;  %vm1665_vm7 = vmor %vm1663_vm6, %vm1664_vm5 }
 0x2f9   :  { %v1659_v45 = vmul.f32 %v2020_v15, %v1658_v8  ;;  %v3220_v9 = vadd.f32 %v3124_v36, %v1298_v49  ;;  %v1807_v47 = vmul.f32 %v1656_v19, %v3132_v53 }
 0x2fb   :  { %v1660_v21 = vmul.f32 0.5, %v1659_v45  ;;  %v1362_v33 = vpop.f32.mrf.mxu2  ;;  %1382 = vmatmul.f32.gmra.mxu2 %v3220_v9  ;;  %v1591_v1 = vmul.f32 %v3220_v9, %v3220_v9  ;;  %1823 = vst [vmem:[#allocation11] sm:$0xff] %v1807_v47 }
 0x2fc   :  { %v3227_v32 = vadd.f32 %v3207_v40, %v1362_v33 }
 0x2fd   :  { %v1661_v43 = vsub.f32 1.5, %v1660_v21  ;;  %1615 = vadd.xlane.f32.xlu1 %v1591_v1  ;;  %v1313_v53 = vpop.f32.mrf.mxu3 }
 0x2fe   :  { %1409 = vmax.xlane.f32.xlu0 %v3227_v32  ;;  %v3231_v52 = vadd.f32 %v3124_v36, %v1313_v53 }
 0x2ff   :  { %v1662_v28 = vmul.f32 %v2020_v15, %v1661_v43 }
 0x300   :  { %v1301_v27 = vpop.f32.mrf.mxu1  ;;  %1397 = vmatmul.f32.gmra.mxu3 %v3231_v52 }
 0x301   :  { %v1666_v63 = vsel %vm1665_vm7, %v2020_v15, %v1662_v28  ;;  %v3235_v39 = vadd.f32 %v3124_v36, %v1301_v27 }
 0x302   :  { %v1808_v14 = vmul.f32 %v1666_v63, %v3146_v5 }
 0x303   :  { %1385 = vmatmul.f32.gmra.mxu2 %v3235_v39 }
 0x304   :  { %1824 = vst [vmem:[#allocation11 + $0x8] sm:$0xff] %v1808_v14 }
 0x305   :  { %v1604_v22 = vpop.xlane.xlu1 %1603  ;;  %v1316_v59 = vpop.f32.mrf.mxu3 }
 0x306   :  { %v1633_v4 = vadd.f32 1e-30, %v1604_v22  ;;  %v3240_v26 = vadd.f32 %v3124_v36, %v1316_v59 }
 0x308   :  { %2021 = vrsqrt.f32 %v1633_v4  ;;  %v1304_v62 = vpop.f32.mrf.mxu1  ;;  %1400 = vmatmul.f32.gmra.mxu3 %v3240_v26  ;;  %vm1673_vm9 = vweird.f32 %v1633_v4 }
 0x309   :  { %v3243_v5 = vadd.f32 %v3124_v36, %v1304_v62 }
 0x30b   :  { %1388 = vmatmul.f32.gmra.mxu2 %v3243_v5 }
 0x30e   :  { %v2022_v38 = vpop.eup %2021  ;;  %v1319_v54 = vpop.f32.mrf.mxu3 }
 0x30f   :  { %v1668_v0 = vmul.f32 %v2022_v38, %v1633_v4  ;;  %v1606_v6 = vpop.xlane.xlu2 %1605  ;;  %vm1674_vm8 = vweird.f32 %v2022_v38  ;;  %v3252_v7 = vadd.f32 %v3124_v36, %v1319_v54 }
 0x310   :  { %v1634_v18 = vadd.f32 1e-30, %v1606_v6  ;;  %v1307_v23 = vpop.f32.mrf.mxu1  ;;  %vm1675_vm10 = vmor %vm1673_vm9, %vm1674_vm8 }
 0x311   :  { %v1669_v29 = vmul.f32 %v2022_v38, %v1668_v0  ;;  %v3255_v31 = vadd.f32 %v3124_v36, %v1307_v23  ;;  %1403 = vmatmul.f32.gmra.mxu3 %v3252_v7 }
 0x312   :  { %2023 = vrsqrt.f32 %v1634_v18  ;;  %vm1683_vm11 = vweird.f32 %v1634_v18 }
 0x313   :  { %v1670_v55 = vmul.f32 0.5, %v1669_v29  ;;  %v1365_v48 = vpop.f32.mrf.mxu2  ;;  %1391 = vmatmul.f32.gmra.mxu2 %v3255_v31 }
 0x314   :  { %v3248_v2 = vadd.f32 %v3207_v40, %v1365_v48 }
 0x315   :  { %v1671_v60 = vsub.f32 1.5, %v1670_v55 }
 0x316   :  { %1411 = vmax.xlane.f32.xlu1 %v3248_v2 }
 0x317   :  { %v1672_v16 = vmul.f32 %v2022_v38, %v1671_v60 }
 0x318   :  { %v2024_v57 = vpop.eup %2023 }
 0x319   :  { %v1676_v3 = vsel %vm1675_vm10, %v2022_v38, %v1672_v16  ;;  %v1678_v17 = vmul.f32 %v2024_v57, %v1634_v18  ;;  %vm1684_vm12 = vweird.f32 %v2024_v57 }
 0x31a   :  { %v1809_v42 = vmul.f32 %v1676_v3, %v3168_v37  ;;  %vm1685_vm13 = vmor %vm1683_vm11, %vm1684_vm12 }
 0x31b   :  { %v1679_v30 = vmul.f32 %v2024_v57, %v1678_v17 }
 0x31c   :  { %1825 = vst [vmem:[#allocation11 + $0x10] sm:$0xff] %v1809_v42 }
 0x31d   :  { %v1680_v10 = vmul.f32 0.5, %v1679_v30  ;;  %v1608_v24 = vpop.xlane.xlu0 %1607 }
 0x31e   :  { %v1635_v13 = vadd.f32 1e-30, %v1608_v24 }
 0x31f   :  { %v1681_v58 = vsub.f32 1.5, %v1680_v10 }
 0x320   :  { %2025 = vrsqrt.f32 %v1635_v13  ;;  %vm1693_vm15 = vweird.f32 %v1635_v13 }
 0x321   :  { %v1682_v35 = vmul.f32 %v2024_v57, %v1681_v58 }
 0x323   :  { %v1686_v36 = vsel %vm1685_vm13, %v2024_v57, %v1682_v35 }
 0x324   :  { %v1810_v11 = vmul.f32 %v1686_v36, %v3177_v20 }
 0x325   :  { %v1610_v61 = vpop.xlane.xlu1 %1609 }
 0x326   :  { %v2026_v51 = vpop.eup %2025  ;;  %1826 = vst [vmem:[#allocation11 + $0x18] sm:$0xff] %v1810_v11  ;;  %v1636_v37 = vadd.f32 1e-30, %v1610_v61 }
 0x327   :  { %v1688_v34 = vmul.f32 %v2026_v51, %v1635_v13  ;;  %vm1694_vm14 = vweird.f32 %v2026_v51 }
 0x328   :  { %2027 = vrsqrt.f32 %v1636_v37  ;;  %vm1695_vm0 = vmor %vm1693_vm15, %vm1694_vm14  ;;  %vm1703_vm2 = vweird.f32 %v1636_v37 }
 0x329   :  { %v1689_v15 = vmul.f32 %v2026_v51, %v1688_v34 }
 0x32b   :  { %v1690_v56 = vmul.f32 0.5, %v1689_v15 }
 0x32d   :  { %v1691_v8 = vsub.f32 1.5, %v1690_v56 }
 0x32e   :  { %v2028_v49 = vpop.eup %2027 }
 0x32f   :  { %v1692_v19 = vmul.f32 %v2026_v51, %v1691_v8  ;;  %v1698_v45 = vmul.f32 %v2028_v49, %v1636_v37  ;;  %vm1704_vm1 = vweird.f32 %v2028_v49 }
 0x330   :  { %vm1705_vm3 = vmor %vm1703_vm2, %vm1704_vm1 }
 0x331   :  { %v1696_v47 = vsel %vm1695_vm0, %v2026_v51, %v1692_v19  ;;  %v1699_v21 = vmul.f32 %v2028_v49, %v1698_v45 }
 0x332   :  { %v1811_v33 = vmul.f32 %v1696_v47, %v3183_v46 }
 0x333   :  { %v1700_v20 = vmul.f32 0.5, %v1699_v21 }
 0x334   :  { %1827 = vst [vmem:[#allocation11 + $0x20] sm:$0xff] %v1811_v33 }
 0x335   :  { %v1701_v1 = vsub.f32 1.5, %v1700_v20 }
 0x337   :  { %v1702_v43 = vmul.f32 %v2028_v49, %v1701_v1  ;;  %v1612_v28 = vpop.xlane.xlu2 %1611 }
 0x338   :  { %v1637_v22 = vadd.f32 1e-30, %v1612_v28 }
 0x339   :  { %v1706_v53 = vsel %vm1705_vm3, %v2028_v49, %v1702_v43  ;;  %v1593_v43 = vmul.f32 %v3243_v5, %v3243_v5 }
 0x33a   :  { %v1812_v4 = vmul.f32 %v1706_v53, %v3189_v12  ;;  %2029 = vrsqrt.f32 %v1637_v22  ;;  %vm1713_vm5 = vweird.f32 %v1637_v22  ;;  %v1368_v12 = vpop.f32.mrf.mxu2 }
 0x33b   :  { %v3269_v29 = vadd.f32 %v3207_v40, %v1368_v12 }
 0x33c   :  { %1828 = vst [vmem:[#allocation11 + $0x28] sm:$0xff] %v1812_v4 }
 0x340   :  { %v2030_v63 = vpop.eup %2029 }
 0x341   :  { %v1708_v27 = vmul.f32 %v2030_v63, %v1637_v22  ;;  %vm1714_vm4 = vweird.f32 %v2030_v63 }
 0x342   :  { %vm1715_vm6 = vmor %vm1713_vm5, %vm1714_vm4  ;;  %v1371_v55 = vpop.f32.mrf.mxu2 }
 0x343   :  { %v1709_v14 = vmul.f32 %v2030_v63, %v1708_v27  ;;  %v3279_v19 = vadd.f32 %v3207_v40, %v1371_v55 }
 0x345   :  { %v1710_v59 = vmul.f32 0.5, %v1709_v14 }
 0x347   :  { %v1711_v38 = vsub.f32 1.5, %v1710_v59 }
 0x349   :  { %v1712_v46 = vmul.f32 %v2030_v63, %v1711_v38 }
 0x34b   :  { %v1716_v0 = vsel %vm1715_vm6, %v2030_v63, %v1712_v46  ;;  %v1594_v63 = vmul.f32 %v3255_v31, %v3255_v31 }
 0x34c   :  { %v1813_v6 = vmul.f32 %v1716_v0, %v3195_v25  ;;  %v1374_v25 = vpop.f32.mrf.mxu2 }
 0x34e   :  { %1829 = vst [vmem:[#allocation11 + $0x30] sm:$0xff] %v1813_v6  ;;  %v1596_v6 = vmul.f32 %v3231_v52, %v3231_v52 }
 0x353   :  { %v1395_v62 = vpop.f32.mrf.mxu3 }
 0x354   :  { %v3265_v18 = vadd.f32 %v3207_v40, %v1395_v62  ;;  %v1377_v13 = vpop.f32.mrf.mxu2  ;;  %v1592_v62 = vmul.f32 %v3235_v39, %v3235_v39 }
 0x355   :  { %v3304_v28 = vadd.f32 %v3207_v40, %v1377_v13 }
 0x356   :  { %1431 = vmax.xlane.f32.xlu2 %v3265_v18 }
 0x35e   :  { %1413 = vmax.xlane.f32.xlu2 %v3269_v29 }
 0x367   :  { %v1614_v48 = vpop.xlane.xlu0 %1613 }
 0x368   :  { %v1638_v60 = vadd.f32 1e-30, %v1614_v48  ;;  %v1408_v53 = vpop.xlane.xlu2 %1407 }
 0x369   :  { %v3318_v14 = vsub.f32 %v3216_v44, %v1408_v53 }
 0x36a   :  { %2031 = vrsqrt.f32 %v1638_v60  ;;  %vm1723_vm8 = vweird.f32 %v1638_v60 }
 0x36b   :  { %v1455_v38 = vmul.f32 1.442695, %v3318_v14 }
 0x370   :  { %v1616_v54 = vpop.xlane.xlu1 %1615  ;;  %v2032_v16 = vpop.eup %2031 }
 0x371   :  { %v1639_v23 = vadd.f32 1e-30, %v1616_v54  ;;  %v1718_v57 = vmul.f32 %v2032_v16, %v1638_v60  ;;  %vm1724_vm7 = vweird.f32 %v2032_v16  ;;  %v1410_v46 = vpop.xlane.xlu0 %1409  ;;  %v1595_v60 = vmul.f32 %v3201_v41, %v3201_v41 }
 0x372   :  { %vm1725_vm9 = vmor %vm1723_vm8, %vm1724_vm7  ;;  %v3331_v44 = vsub.f32 %v3227_v32, %v1410_v46 }
 0x373   :  { %2033 = vrsqrt.f32 %v1639_v23  ;;  %v1719_v3 = vmul.f32 %v2032_v16, %v1718_v57  ;;  %vm1733_vm12 = vweird.f32 %v1639_v23 }
 0x374   :  { %2035 = vpow2.f32 %v1455_v38  ;;  %v1457_v12 = vmul.f32 1.442695, %v3331_v44 }
 0x375   :  { %v1720_v17 = vmul.f32 0.5, %v1719_v3  ;;  %v1380_v37 = vpop.f32.mrf.mxu2 }
 0x376   :  { %v3290_v47 = vadd.f32 %v3207_v40, %v1380_v37  ;;  %2037 = vpow2.f32 %v1457_v12 }
 0x377   :  { %v1721_v42 = vsub.f32 1.5, %v1720_v17 }
 0x379   :  { %v2034_v30 = vpop.eup %2033  ;;  %v1722_v10 = vmul.f32 %v2032_v16, %v1721_v42 }
 0x37a   :  { %v1728_v24 = vmul.f32 %v2034_v30, %v1639_v23  ;;  %vm1734_vm10 = vweird.f32 %v2034_v30  ;;  %v2036_v55 = vpop.eup %2035 }
 0x37b   :  { %v1726_v58 = vsel %vm1725_vm9, %v2032_v16, %v1722_v10  ;;  %vm1735_vm11 = vmor %vm1733_vm12, %vm1734_vm10 }
 0x37c   :  { %v1729_v35 = vmul.f32 %v2034_v30, %v1728_v24  ;;  %v1814_v36 = vmul.f32 %v1726_v58, %v3210_v50  ;;  %v2038_v16 = vpop.eup %2037 }
 0x37e   :  { %v1730_v11 = vmul.f32 0.5, %v1729_v35  ;;  %1830 = vst [vmem:[#allocation11 + $0x38] sm:$0xff] %v1814_v36  ;;  %v1383_v49 = vpop.f32.mrf.mxu2 }
 0x37f   :  { %v3299_v1 = vadd.f32 %v3207_v40, %v1383_v49 }
 0x380   :  { %v1731_v61 = vsub.f32 1.5, %v1730_v11 }
 0x382   :  { %v1732_v51 = vmul.f32 %v2034_v30, %v1731_v61 }
 0x383   :  { %v1398_v56 = vpop.f32.mrf.mxu3 }
 0x384   :  { %v1736_v34 = vsel %vm1735_vm11, %v2034_v30, %v1732_v51  ;;  %v3275_v8 = vadd.f32 %v3207_v40, %v1398_v56 }
 0x385   :  { %v1815_v15 = vmul.f32 %v1736_v34, %v3220_v9  ;;  %v3287_v9 = vadd.f32 %v3207_v40, %v1374_v25  ;;  %v1598_v25 = vmul.f32 %v3252_v7, %v3252_v7 }
 0x386   :  { %1433 = vmax.xlane.f32.xlu0 %v3275_v8  ;;  %v1386_v33 = vpop.f32.mrf.mxu2 }
 0x387   :  { %1831 = vst [vmem:[#allocation11 + $0x40] sm:$0xff] %v1815_v15  ;;  %v3314_v27 = vadd.f32 %v3207_v40, %v1386_v33 }
 0x389   :  { %v1412_v48 = vpop.xlane.xlu1 %1411 }
 0x38a   :  { %v3339_v54 = vsub.f32 %v3248_v2, %v1412_v48 }
 0x38b   :  { %v1401_v50 = vpop.f32.mrf.mxu3 }
 0x38c   :  { %v3282_v45 = vadd.f32 %v3207_v40, %v1401_v50  ;;  %v1459_v32 = vmul.f32 1.442695, %v3339_v54 }
 0x38e   :  { %1435 = vmax.xlane.f32.xlu1 %v3282_v45  ;;  %1415 = vmax.xlane.f32.xlu0 %v3279_v19  ;;  %v1389_v22 = vpop.f32.mrf.mxu2  ;;  %2039 = vpow2.f32 %v1459_v32 }
 0x38f   :  { %v3309_v4 = vadd.f32 %v3207_v40, %v1389_v22 }
 0x394   :  { %v1404_v21 = vpop.f32.mrf.mxu3  ;;  %v2040_v17 = vpop.eup %2039 }
 0x395   :  { %v3293_v20 = vadd.f32 %v3207_v40, %v1404_v21 }
 0x396   :  { %1417 = vmax.xlane.f32.xlu1 %v3287_v9  ;;  %1421 = vmax.xlane.f32.xlu0 %v3290_v47  ;;  %v1392_v59 = vpop.f32.mrf.mxu2 }
 0x397   :  { %1437 = vmax.xlane.f32.xlu2 %v3293_v20  ;;  %v3323_v0 = vadd.f32 %v3207_v40, %v1392_v59  ;;  %v1597_v40 = vmul.f32 %v3240_v26, %v3240_v26 }
 0x39e   :  { %1423 = vmax.xlane.f32.xlu1 %v3299_v1  ;;  %1619 = vadd.xlane.f32.xlu0 %v1593_v43 }
 0x39f   :  { %1419 = vmax.xlane.f32.xlu2 %v3304_v28 }
 0x3a6   :  { %1621 = vadd.xlane.f32.xlu1 %v1594_v63  ;;  %1427 = vmax.xlane.f32.xlu0 %v3309_v4 }
 0x3a7   :  { %1425 = vmax.xlane.f32.xlu2 %v3314_v27 }
 0x3ae   :  { %1429 = vmax.xlane.f32.xlu1 %v3323_v0  ;;  %1625 = vadd.xlane.f32.xlu0 %v1596_v6 }
 0x3af   :  { %1617 = vadd.xlane.f32.xlu2 %v1592_v62 }
 0x3b6   :  { %1627 = vadd.xlane.f32.xlu1 %v1597_v40  ;;  %1487 = vadd.xlane.f32.xlu0 %v2036_v55 }
 0x3b7   :  { %1623 = vadd.xlane.f32.xlu2 %v1595_v60 }
 0x3be   :  { %1489 = vadd.xlane.f32.xlu1 %v2038_v16 }
 0x3bf   :  { %1629 = vadd.xlane.f32.xlu2 %v1598_v25 }
 0x3c7   :  { %1491 = vadd.xlane.f32.xlu2 %v2040_v17 }
 0x3c9   :  { %v1432_v23 = vpop.xlane.xlu2 %1431 }
 0x3ca   :  { %v3345_v57 = vsub.f32 %v3265_v18, %v1432_v23 }
 0x3cc   :  { %v1479_v3 = vmul.f32 1.442695, %v3345_v57 }
 0x3ce   :  { %2041 = vpow2.f32 %v1479_v3 }
 0x3d1   :  { %v1414_v2 = vpop.xlane.xlu2 %1413 }
 0x3d2   :  { %v3349_v42 = vsub.f32 %v3269_v29, %v1414_v2 }
 0x3d4   :  { %v2042_v30 = vpop.eup %2041  ;;  %v1461_v10 = vmul.f32 1.442695, %v3349_v42 }
 0x3d5   :  { %1511 = vadd.xlane.f32.xlu1 %v2042_v30 }
 0x3d6   :  { %2043 = vpow2.f32 %v1461_v10 }
 0x3dc   :  { %v2044_v24 = vpop.eup %2043 }
 0x3dd   :  { %1493 = vadd.xlane.f32.xlu0 %v2044_v24 }
 0x3f9   :  { %v1434_v13 = vpop.xlane.xlu0 %1433 }
 0x3fa   :  { %v3374_v22 = vsub.f32 %v3275_v8, %v1434_v13 }
 0x401   :  { %v3352_v58 = vpop.xlane.xlu1 %1435  ;;  %v1416_v18 = vpop.xlane.xlu0 %1415 }
 0x402   :  { %v3355_v35 = vsub.f32 %v3279_v19, %v1416_v18 }
 0x404   :  { %v1463_v36 = vmul.f32 1.442695, %v3355_v35 }
 0x406   :  { %2045 = vpow2.f32 %v1463_v36 }
 0x409   :  { %v1418_v11 = vpop.xlane.xlu1 %1417  ;;  %v1422_v29 = vpop.xlane.xlu0 %1421 }
 0x40a   :  { %v3359_v61 = vsub.f32 %v3287_v9, %v1418_v11  ;;  %v1438_v51 = vpop.xlane.xlu2 %1437  ;;  %v3362_v37 = vsub.f32 %v3290_v47, %v1422_v29 }
 0x40b   :  { %v3379_v46 = vsub.f32 %v3293_v20, %v1438_v51 }
 0x40c   :  { %v1465_v34 = vmul.f32 1.442695, %v3359_v61  ;;  %v1469_v15 = vmul.f32 1.442695, %v3362_v37  ;;  %v2046_v56 = vpop.eup %2045 }
 0x40d   :  { %1495 = vadd.xlane.f32.xlu1 %v2046_v56  ;;  %v1485_v16 = vmul.f32 1.442695, %v3379_v46 }
 0x40e   :  { %2047 = vpow2.f32 %v1465_v34  ;;  %v3406_v34 = vsub.f32 %v3282_v45, %v3352_v58 }
 0x40f   :  { %2049 = vpow2.f32 %v1469_v15 }
 0x411   :  { %v1424_v49 = vpop.xlane.xlu1 %1423  ;;  %v1620_v50 = vpop.xlane.xlu0 %1619 }
 0x412   :  { %v3367_v19 = vsub.f32 %v3299_v1, %v1424_v49  ;;  %v1420_v21 = vpop.xlane.xlu2 %1419  ;;  %v1641_v9 = vadd.f32 1e-30, %v1620_v50  ;;  %v1481_v1 = vmul.f32 1.442695, %v3374_v22 }
 0x413   :  { %v3370_v33 = vsub.f32 %v3304_v28, %v1420_v21 }
 0x414   :  { %v2048_v47 = vpop.eup %2047  ;;  %v1471_v43 = vmul.f32 1.442695, %v3367_v19  ;;  %2051 = vrsqrt.f32 %v1641_v9  ;;  %vm1753_vm14 = vweird.f32 %v1641_v9 }
 0x415   :  { %v1467_v53 = vmul.f32 1.442695, %v3370_v33  ;;  %1497 = vadd.xlane.f32.xlu2 %v2048_v47  ;;  %v2050_v63 = vpop.eup %2049 }
 0x416   :  { %2053 = vpow2.f32 %v1471_v43  ;;  %1501 = vadd.xlane.f32.xlu1 %v2050_v63  ;;  %v1483_v43 = vmul.f32 1.442695, %v3406_v34 }
 0x417   :  { %2055 = vpow2.f32 %v1467_v53 }
 0x419   :  { %v1622_v59 = vpop.xlane.xlu1 %1621  ;;  %v1428_v38 = vpop.xlane.xlu0 %1427 }
 0x41a   :  { %v2052_v28 = vpop.eup %2051  ;;  %v3381_v6 = vadd.f32 1e-30, %v1622_v59  ;;  %v1426_v62 = vpop.xlane.xlu2 %1425  ;;  %v3384_v8 = vsub.f32 %v3309_v4, %v1428_v38 }
 0x41b   :  { %v1748_v12 = vmul.f32 %v2052_v28, %v1641_v9  ;;  %v3387_v40 = vsub.f32 %v3314_v27, %v1426_v62  ;;  %vm1754_vm13 = vweird.f32 %v2052_v28 }
 0x41c   :  { %v2054_v55 = vpop.eup %2053  ;;  %2057 = vrsqrt.f32 %v3381_v6  ;;  %v1475_v48 = vmul.f32 1.442695, %v3384_v8  ;;  %vm1755_vm15 = vmor %vm1753_vm14, %vm1754_vm13  ;;  %vm1763_vm1 = vweird.f32 %v3381_v6 }
 0x41d   :  { %v2056_v60 = vpop.eup %2055  ;;  %2059 = vpow2.f32 %v1481_v1  ;;  %v1749_v32 = vmul.f32 %v2052_v28, %v1748_v12  ;;  %v1473_v20 = vmul.f32 1.442695, %v3387_v40  ;;  %1503 = vadd.xlane.f32.xlu2 %v2054_v55 }
 0x41e   :  { %2061 = vpow2.f32 %v1475_v48  ;;  %1499 = vadd.xlane.f32.xlu0 %v2056_v60 }
 0x41f   :  { %v1750_v4 = vmul.f32 0.5, %v1749_v32  ;;  %2063 = vpow2.f32 %v1473_v20 }
 0x420   :  { %2065 = vpow2.f32 %v1485_v16 }
 0x421   :  { %v1751_v25 = vsub.f32 1.5, %v1750_v4  ;;  %v1430_v27 = vpop.xlane.xlu1 %1429  ;;  %v1626_v23 = vpop.xlane.xlu0 %1625 }
 0x422   :  { %v2058_v3 = vpop.eup %2057  ;;  %v3394_v17 = vsub.f32 %v3323_v0, %v1430_v27  ;;  %v1618_v2 = vpop.xlane.xlu2 %1617  ;;  %v3396_v30 = vadd.f32 1e-30, %v1626_v23 }
 0x423   :  { %v2060_v10 = vpop.eup %2059  ;;  %v1752_v24 = vmul.f32 %v2052_v28, %v1751_v25  ;;  %v1758_v13 = vmul.f32 %v2058_v3, %v3381_v6  ;;  %v3399_v18 = vadd.f32 1e-30, %v1618_v2  ;;  %vm1764_vm0 = vweird.f32 %v2058_v3 }
 0x424   :  { %v2062_v36 = vpop.eup %2061  ;;  %v1477_v11 = vmul.f32 1.442695, %v3394_v17  ;;  %2067 = vrsqrt.f32 %v3396_v30  ;;  %vm1765_vm2 = vmor %vm1763_vm1, %vm1764_vm0  ;;  %vm1783_vm5 = vweird.f32 %v3396_v30 }
 0x425   :  { %v2064_v29 = vpop.eup %2063  ;;  %v1756_v51 = vsel %vm1755_vm15, %v2052_v28, %v1752_v24  ;;  %v1759_v0 = vmul.f32 %v2058_v3, %v1758_v13  ;;  %2069 = vrsqrt.f32 %v3399_v18  ;;  %1513 = vadd.xlane.f32.xlu2 %v2060_v10  ;;  %1507 = vadd.xlane.f32.xlu1 %v2062_v36  ;;  %vm1743_vm6 = vweird.f32 %v3399_v18 }
 0x426   :  { %v1817_v15 = vmul.f32 %v1756_v51, %v3243_v5  ;;  %2071 = vpow2.f32 %v1477_v11  ;;  %1505 = vadd.xlane.f32.xlu0 %v2064_v29  ;;  %v2066_v49 = vpop.eup %2065 }
 0x427   :  { %v1760_v56 = vmul.f32 0.5, %v1759_v0 }
 0x428   :  { %1833 = vst [vmem:[#allocation11 + $0x50] sm:$0xff] %v1817_v15 }
 0x429   :  { %v1761_v50 = vsub.f32 1.5, %v1760_v56  ;;  %v1628_v21 = vpop.xlane.xlu1 %1627  ;;  %v1488_v9 = vpop.xlane.xlu0 %1487 }
 0x42a   :  { %v2068_v47 = vpop.eup %2067  ;;  %v3410_v53 = vadd.f32 1e-30, %v1628_v21  ;;  %v1624_v63 = vpop.xlane.xlu2 %1623  ;;  %2073 = vlog2.f32 %v1488_v9 }
 0x42b   :  { %v2070_v45 = vpop.eup %2069  ;;  %v1762_v58 = vmul.f32 %v2058_v3, %v1761_v50  ;;  %v1778_v5 = vmul.f32 %v2068_v47, %v3396_v30  ;;  %v3414_v1 = vadd.f32 1e-30, %v1624_v63  ;;  %vm1784_vm3 = vweird.f32 %v2068_v47 }
 0x42c   :  { %v2072_v59 = vpop.eup %2071  ;;  %v1738_v38 = vmul.f32 %v2070_v45, %v3399_v18  ;;  %2075 = vrsqrt.f32 %v3410_v53  ;;  %vm1744_vm4 = vweird.f32 %v2070_v45  ;;  %vm1785_vm7 = vmor %vm1783_vm5, %vm1784_vm3  ;;  %vm1793_vm12 = vweird.f32 %v3410_v53 }
 0x42d   :  { %v1766_v28 = vsel %vm1765_vm2, %v2058_v3, %v1762_v58  ;;  %v1779_v62 = vmul.f32 %v2068_v47, %v1778_v5  ;;  %2077 = vrsqrt.f32 %v3414_v1  ;;  %1517 = vadd.xlane.f32.xlu1 %v2066_v49  ;;  %vm1745_vm8 = vmor %vm1743_vm6, %vm1744_vm4  ;;  %vm1773_vm13 = vweird.f32 %v3414_v1 }
 0x42e   :  { %v1818_v12 = vmul.f32 %v1766_v28, %v3255_v31  ;;  %v1739_v55 = vmul.f32 %v2070_v45, %v1738_v38  ;;  %1509 = vadd.xlane.f32.xlu0 %v2072_v59  ;;  %2079 = vpow2.f32 %v1483_v43 }
 0x42f   :  { %v1780_v6 = vmul.f32 0.5, %v1779_v62 }
 0x430   :  { %v2074_v48 = vpop.eup %2073  ;;  %1834 = vst [vmem:[#allocation11 + $0x58] sm:$0xff] %v1818_v12  ;;  %v1740_v60 = vmul.f32 0.5, %v1739_v55 }
 0x431   :  { %v1781_v32 = vsub.f32 1.5, %v1780_v6  ;;  %v1520_v20 = vmul.f32 0.6931472, %v2074_v48  ;;  %v1490_v16 = vpop.xlane.xlu1 %1489 }
 0x432   :  { %v2076_v4 = vpop.eup %2075  ;;  %v1741_v25 = vsub.f32 1.5, %v1740_v60  ;;  %v1630_v27 = vpop.xlane.xlu2 %1629  ;;  %2081 = vlog2.f32 %v1490_v16 }
 0x433   :  { %v2078_v23 = vpop.eup %2077  ;;  %v1782_v3 = vmul.f32 %v2068_v47, %v1781_v32  ;;  %v1788_v31 = vmul.f32 %v2076_v4, %v3410_v53  ;;  %v1551_v2 = vsub.f32 %v3318_v14, %v1520_v20  ;;  %v1646_v13 = vadd.f32 1e-30, %v1630_v27 }
 0x434   :  { %v1742_v10 = vmul.f32 %v2070_v45, %v1741_v25  ;;  %v1768_v24 = vmul.f32 %v2078_v23, %v3414_v1  ;;  %v2080_v36 = vpop.eup %2079  ;;  %vm1794_vm9 = vweird.f32 %v2076_v4  ;;  %vm1774_vm10 = vweird.f32 %v2078_v23 }
 0x435   :  { %v1786_v11 = vsel %vm1785_vm7, %v2068_v47, %v1782_v3  ;;  %v1789_v29 = vmul.f32 %v2076_v4, %v1788_v31  ;;  %1567 = vst [vmem:[#allocation10] sm:$0xff] %v1551_v2  ;;  %2083 = vrsqrt.f32 %v1646_v13  ;;  %vm1795_vm11 = vmor %vm1793_vm12, %vm1794_vm9  ;;  %vm1803_vm0 = vweird.f32 %v1646_v13 }
 0x436   :  { %v1746_v51 = vsel %vm1745_vm8, %v2070_v45, %v1742_v10  ;;  %v1820_v30 = vmul.f32 %v1786_v11, %v3231_v52  ;;  %v1769_v0 = vmul.f32 %v2078_v23, %v1768_v24  ;;  %1515 = vadd.xlane.f32.xlu0 %v2080_v36  ;;  %vm1775_vm14 = vmor %vm1773_vm13, %vm1774_vm10 }
 0x437   :  { %v1816_v14 = vmul.f32 %v1746_v51, %v3235_v39  ;;  %v1790_v15 = vmul.f32 0.5, %v1789_v29 }
 0x438   :  { %v2082_v18 = vpop.eup %2081  ;;  %1836 = vst [vmem:[#allocation11 + $0x68] sm:$0xff] %v1820_v30  ;;  %v1770_v56 = vmul.f32 0.5, %v1769_v0 }
 0x439   :  { %1832 = vst [vmem:[#allocation11 + $0x48] sm:$0xff] %v1816_v14  ;;  %v1791_v49 = vsub.f32 1.5, %v1790_v15  ;;  %v1522_v50 = vmul.f32 0.6931472, %v2082_v18 }
 0x43a   :  { %v1771_v21 = vsub.f32 1.5, %v1770_v56  ;;  %v1492_v9 = vpop.xlane.xlu2 %1491 }
 0x43b   :  { %v1792_v47 = vmul.f32 %v2076_v4, %v1791_v49  ;;  %v1552_v52 = vsub.f32 %v3331_v44, %v1522_v50  ;;  %2085 = vlog2.f32 %v1492_v9  ;;  %v2084_v43 = vpop.eup %2083 }
 0x43c   :  { %v1772_v39 = vmul.f32 %v2078_v23, %v1771_v21  ;;  %v1798_v45 = vmul.f32 %v2084_v43, %v1646_v13  ;;  %vm1804_vm15 = vweird.f32 %v2084_v43 }
 0x43d   :  { %v1796_v63 = vsel %vm1795_vm11, %v2076_v4, %v1792_v47  ;;  %1568 = vst [vmem:[#allocation10 + $0x8] sm:$0xff] %v1552_v52  ;;  %vm1805_vm1 = vmor %vm1803_vm0, %vm1804_vm15 }
 0x43e   :  { %v1821_v58 = vmul.f32 %v1796_v63, %v3240_v26  ;;  %v1776_v5 = vsel %vm1775_vm14, %v2078_v23, %v1772_v39  ;;  %v1799_v38 = vmul.f32 %v2084_v43, %v1798_v45 }
 0x43f   :  { %v1819_v59 = vmul.f32 %v1776_v5, %v3201_v41 }
 0x440   :  { %1837 = vst [vmem:[#allocation11 + $0x70] sm:$0xff] %v1821_v58  ;;  %v1800_v44 = vmul.f32 0.5, %v1799_v38 }
 0x441   :  { %v2086_v28 = vpop.eup %2085  ;;  %1835 = vst [vmem:[#allocation11 + $0x60] sm:$0xff] %v1819_v59 }
 0x442   :  { %v1524_v62 = vmul.f32 0.6931472, %v2086_v28  ;;  %v1801_v12 = vsub.f32 1.5, %v1800_v44 }
 0x444   :  { %v1553_v1 = vsub.f32 %v3339_v54, %v1524_v62  ;;  %v1802_v55 = vmul.f32 %v2084_v43, %v1801_v12 }
 0x446   :  { %1569 = vst [vmem:[#allocation10 + $0x10] sm:$0xff] %v1553_v1  ;;  %v1806_v26 = vsel %vm1805_vm1, %v2084_v43, %v1802_v55 }
 0x447   :  { %v1822_v6 = vmul.f32 %v1806_v26, %v3252_v7 }
 0x448   :  { %v1512_v53 = vpop.xlane.xlu1 %1511 }
 0x449   :  { %2087 = vlog2.f32 %v1512_v53  ;;  %1838 = vst [vmem:[#allocation11 + $0x78] sm:$0xff] %v1822_v6 }
 0x44a   :  { %1864 = dma.vmem_to_hbm [thread:$0]  %s1857_s29, 2048, %s1859_s10, [#allocation12], %s2269_s13, %s2269_s13, %s2270_s14  }
 0x44f   :  { %v2088_v41 = vpop.eup %2087 }
 0x450   :  { %v1494_v48 = vpop.xlane.xlu0 %1493  ;;  %v1544_v60 = vmul.f32 0.6931472, %v2088_v41 }
 0x451   :  { %2089 = vlog2.f32 %v1494_v48 }
 0x452   :  { %v1563_v54 = vsub.f32 %v3345_v57, %v1544_v60 }
 0x454   :  { %1579 = vst [vmem:[#allocation10 + $0x60] sm:$0xff] %v1563_v54 }
 0x457   :  { %v2090_v32 = vpop.eup %2089 }
 0x458   :  { %v1526_v20 = vmul.f32 0.6931472, %v2090_v32 }
 0x45a   :  { %v1554_v16 = vsub.f32 %v3349_v42, %v1526_v20 }
 0x45c   :  { %1570 = vst [vmem:[#allocation10 + $0x18] sm:$0xff] %v1554_v16 }
 0x480   :  { %v1496_v4 = vpop.xlane.xlu1 %1495 }
 0x481   :  { %2091 = vlog2.f32 %v1496_v4 }
 0x487   :  { %v2092_v7 = vpop.eup %2091 }
 0x488   :  { %v1498_v25 = vpop.xlane.xlu2 %1497  ;;  %v1528_v27 = vmul.f32 0.6931472, %v2092_v7 }
 0x489   :  { %2093 = vlog2.f32 %v1498_v25  ;;  %v1502_v23 = vpop.xlane.xlu1 %1501 }
 0x48a   :  { %v1555_v3 = vsub.f32 %v3355_v35, %v1528_v27  ;;  %2095 = vlog2.f32 %v1502_v23 }
 0x48c   :  { %1571 = vst [vmem:[#allocation10 + $0x20] sm:$0xff] %v1555_v3 }
 0x48f   :  { %v2094_v57 = vpop.eup %2093 }
 0x490   :  { %v1530_v31 = vmul.f32 0.6931472, %v2094_v57  ;;  %v1504_v2 = vpop.xlane.xlu2 %1503  ;;  %v2096_v10 = vpop.eup %2095 }
 0x491   :  { %2097 = vlog2.f32 %v1504_v2  ;;  %v1500_v24 = vpop.xlane.xlu0 %1499  ;;  %v1534_v13 = vmul.f32 0.6931472, %v2096_v10 }
 0x492   :  { %v1556_v42 = vsub.f32 %v3359_v61, %v1530_v31  ;;  %2099 = vlog2.f32 %v1500_v24 }
 0x493   :  { %v1558_v36 = vsub.f32 %v3362_v37, %v1534_v13 }
 0x494   :  { %1572 = vst [vmem:[#allocation10 + $0x28] sm:$0xff] %v1556_v42 }
 0x495   :  { %1574 = vst [vmem:[#allocation10 + $0x38] sm:$0xff] %v1558_v36 }
 0x497   :  { %v2098_v11 = vpop.eup %2097 }
 0x498   :  { %v2100_v29 = vpop.eup %2099  ;;  %v1536_v51 = vmul.f32 0.6931472, %v2098_v11  ;;  %v1514_v35 = vpop.xlane.xlu2 %1513 }
 0x499   :  { %v1508_v30 = vpop.xlane.xlu1 %1507  ;;  %v1532_v0 = vmul.f32 0.6931472, %v2100_v29  ;;  %2101 = vlog2.f32 %v1514_v35  ;;  %v1506_v14 = vpop.xlane.xlu0 %1505 }
 0x49a   :  { %v1559_v15 = vsub.f32 %v3367_v19, %v1536_v51  ;;  %2103 = vlog2.f32 %v1508_v30 }
 0x49b   :  { %v1557_v18 = vsub.f32 %v3370_v33, %v1532_v0  ;;  %2105 = vlog2.f32 %v1506_v14 }
 0x49c   :  { %1575 = vst [vmem:[#allocation10 + $0x40] sm:$0xff] %v1559_v15 }
 0x49d   :  { %1573 = vst [vmem:[#allocation10 + $0x30] sm:$0xff] %v1557_v18 }
 0x49f   :  { %v2102_v61 = vpop.eup %2101 }
 0x4a0   :  { %v2104_v56 = vpop.eup %2103  ;;  %v1546_v37 = vmul.f32 0.6931472, %v2102_v61 }
 0x4a1   :  { %v1518_v49 = vpop.xlane.xlu1 %1517  ;;  %v2106_v50 = vpop.eup %2105  ;;  %v1540_v21 = vmul.f32 0.6931472, %v2104_v56 }
 0x4a2   :  { %2107 = vlog2.f32 %v1518_v49  ;;  %v1510_v9 = vpop.xlane.xlu0 %1509  ;;  %v1564_v47 = vsub.f32 %v3374_v22, %v1546_v37  ;;  %v1538_v52 = vmul.f32 0.6931472, %v2106_v50 }
 0x4a3   :  { %2109 = vlog2.f32 %v1510_v9  ;;  %v1561_v19 = vsub.f32 %v3384_v8, %v1540_v21 }
 0x4a4   :  { %1580 = vst [vmem:[#allocation10 + $0x68] sm:$0xff] %v1564_v47  ;;  %v1560_v33 = vsub.f32 %v3387_v40, %v1538_v52 }
 0x4a5   :  { %1577 = vst [vmem:[#allocation10 + $0x50] sm:$0xff] %v1561_v19 }
 0x4a6   :  { %1576 = vst [vmem:[#allocation10 + $0x48] sm:$0xff] %v1560_v33 }
 0x4a8   :  { %v2108_v43 = vpop.eup %2107 }
 0x4a9   :  { %v2110_v39 = vpop.eup %2109  ;;  %v1550_v63 = vmul.f32 0.6931472, %v2108_v43 }
 0x4aa   :  { %v1542_v45 = vmul.f32 0.6931472, %v2110_v39  ;;  %v1516_v58 = vpop.xlane.xlu0 %1515 }
 0x4ab   :  { %v1566_v5 = vsub.f32 %v3379_v46, %v1550_v63  ;;  %2111 = vlog2.f32 %v1516_v58 }
 0x4ac   :  { %v1562_v59 = vsub.f32 %v3394_v17, %v1542_v45 }
 0x4ad   :  { %1582 = vst [vmem:[#allocation10 + $0x78] sm:$0xff] %v1566_v5 }
 0x4ae   :  { %1578 = vst [vmem:[#allocation10 + $0x58] sm:$0xff] %v1562_v59 }
 0x4b1   :  { %v2112_v22 = vpop.eup %2111 }
 0x4b2   :  { %v1548_v8 = vmul.f32 0.6931472, %v2112_v22 }
 0x4b4   :  { %v1565_v40 = vsub.f32 %v3406_v34, %v1548_v8 }
 0x4b6   :  { %1581 = vst [vmem:[#allocation10 + $0x70] sm:$0xff] %v1565_v40 }
 0x4b7   :  { %1851 = dma.vmem_to_hbm [thread:$0]  %s1844_s11, 2048, %s1846_s16, [#allocation4], %s2269_s13, %s2269_s13, %s2270_s14  }
 0x4b8   :  { %2264 = dma.done.wait [#allocation4], 2048  }
 0x4b9   :  { %2265 = vsyncadd [#allocation4], 4294965248 }
 0x4ba   :  { %2266 = dma.done.wait [#allocation12], 2048  }
 0x4bb   :  { %2267 = vsyncadd [#allocation12], 4294965248 }
 0x4bc   :  { %1873 = vsyncpa [#allocation3], 1 }
 0x4bd   :  { %1874 = vsyncpa [#allocation6], 1 }
 0x4be   :  { %1875 = vsyncpa [#allocation9], 1 }
 0x4bf   :  { %1876 = vsyncpa [#allocation4], 1 }
 0x4c0   :  { %1877 = vsyncpa [#allocation12], 1 }

// kernel: tpu_custom_call.1
= control target key start
LH: loop header
LB: loop body
LE: loop exit
PB: predicated region body
PF: predicated region fallthrough
CT: control target
= control target key end

     0   :  { %14 = vsyncpa [#allocation3], 0  ;;  %s3460_s0 = inlined_call_operand.hbm [shape: f32[128,128], index: 0, kind: input, shape index: {}]   ;;  %s3461_s1 = inlined_call_operand.hbm [shape: f32[128,128], index: 1, kind: input, shape index: {}]   ;;  %s3462_s2 = inlined_call_operand.vmem [shape: f32[1,128], index: 2, kind: input, shape index: {}]   ;;  %s3463_s3 = inlined_call_operand.hbm [shape: f32[128,128], index: 3, kind: input, shape index: {}]   ;;  %s3464_s4 = inlined_call_operand.vmem [shape: f32[1,128], index: 4, kind: input, shape index: {}]   ;;  %s3465_s5 = inlined_call_operand.hbm [shape: f32[128,128], index: 5, kind: input, shape index: {}]   ;;  %s3466_s6 = inlined_call_operand.vmem [shape: f32[1,128], index: 6, kind: input, shape index: {}]   ;;  %s3467_s7 = inlined_call_operand.hbm [shape: f32[128,128], index: 7, kind: output, shape index: {0}]   ;;  %s3468_s8 = inlined_call_operand.hbm [shape: f32[128,128], index: 8, kind: output, shape index: {1}]  }
   0x1   :  { %15 = vsyncpa [#allocation6], 0 }
   0x2   :  { %16 = vsyncpa [#allocation9], 0 }
   0x3   :  { %17 = vsyncpa [#allocation4], 0 }
   0x4   :  { %18 = vsyncpa [#allocation12], 0  ;;  %s36_s29 = sshll.u32 %s3461_s1, 4  ;;  %s2268_s30 = smov [#allocation5]   ;;  %s37_s29 = int_to_ptr.hbm [resolvable:$true] %s36_s29 }
   0x5   :  { %s38_s9 = sshll.u32 %s2268_s30, 4  ;;  %s23_s12 = sshll.u32 %s3460_s0, 4  ;;  %s39_s9 = int_to_ptr.vmem [resolvable:$true] %s38_s9  ;;  %s24_s12 = int_to_ptr.hbm [resolvable:$true] %s23_s12 }
   0x6   :  { %s2269_s13 = smov 128   ;;  %s2270_s14 = smov 8  }
   0x7   :  { %44 = dma.hbm_to_vmem [thread:$0]  %s37_s29, 2048, %s39_s9, [#allocation6], %s2269_s13, %s2269_s13, %s2270_s14  }
   0x8   :  { %s2271_s15 = smov [#allocation2]   ;;  %s51_s1 = sshll.u32 %s3463_s3, 4  ;;  %s52_s1 = int_to_ptr.hbm [resolvable:$true] %s51_s1 }
   0x9   :  { %s25_s16 = sshll.u32 %s2271_s15, 4  ;;  %s66_s20 = sshll.u32 %s3465_s5, 4  ;;  %s26_s16 = int_to_ptr.vmem [resolvable:$true] %s25_s16  ;;  %s67_s20 = int_to_ptr.hbm [resolvable:$true] %s66_s20 }
   0xa   :  { %31 = dma.hbm_to_vmem [thread:$0]  %s24_s12, 2048, %s26_s16, [#allocation3], %s2269_s13, %s2269_s13, %s2270_s14  }
   0xb   :  { %s2272_s21 = smov [#allocation7]   ;;  %s2273_s23 = smov [#allocation8]  }
   0xc   :  { %s53_s22 = sshll.u32 %s2272_s21, 4  ;;  %s68_s3 = sshll.u32 %s2273_s23, 4  ;;  %s54_s22 = int_to_ptr.vmem [resolvable:$true] %s53_s22  ;;  %s69_s3 = int_to_ptr.vmem [resolvable:$true] %s68_s3 }
   0xd   :  { %59 = dma.hbm_to_vmem [thread:$0]  %s52_s1, 2048, %s54_s22, [#allocation6], %s2269_s13, %s2269_s13, %s2270_s14  }
   0xe   :  { %74 = dma.hbm_to_vmem [thread:$0]  %s67_s20, 2048, %s69_s3, [#allocation9], %s2269_s13, %s2269_s13, %s2270_s14  }
   0xf   :  { %2258 = dma.done.wait [#allocation3], 2048  }
  0x10   :  { %2259 = vsyncadd [#allocation3], 4294965248 }
  0x11   :  { %2260 = dma.done.wait [#allocation6], 4096  }
  0x12   :  { %2261 = vsyncadd [#allocation6], 4294963200 }
  0x13   :  { %2262 = dma.done.wait [#allocation9], 2048  }
  0x14   :  { %2263 = vsyncadd [#allocation9], 4294965248  ;;  %v124_v0 = vld [vmem:[#allocation5 + $0x78] sm:$0xff]  ;;  %v123_v1 = vld [vmem:[#allocation5 + $0x70] sm:$0xff]  ;;  %s1858_s10 = sshll.u32 %s3468_s8, 4  ;;  %s2275_s8 = smov [#allocation10]   ;;  %s1859_s10 = int_to_ptr.hbm [resolvable:$true] %s1858_s10 }
  0x15   :  { %129 = vmatpush.msra.mxu0 %v124_v0  ;;  %1894 = vmatpush.msra.mxu3 %v124_v0  ;;  %v122_v2 = vld [vmem:[#allocation5 + $0x68] sm:$0xff]  ;;  %v121_v3 = vld [vmem:[#allocation5 + $0x60] sm:$0xff]  ;;  %v120_v4 = vld [vmem:[#allocation5 + $0x58] sm:$0xff]  ;;  %s1843_s11 = sshll.u32 %s2275_s8, 4  ;;  %s1845_s16 = sshll.u32 %s3467_s7, 4  ;;  %s1844_s11 = int_to_ptr.vmem [resolvable:$true] %s1843_s11  ;;  %s1846_s16 = int_to_ptr.hbm [resolvable:$true] %s1845_s16 }
  0x16   :  { %v119_v5 = vld [vmem:[#allocation5 + $0x50] sm:$0xff]  ;;  %v118_v6 = vld [vmem:[#allocation5 + $0x48] sm:$0xff]  ;;  %v117_v7 = vld [vmem:[#allocation5 + $0x40] sm:$0xff] }
  0x17   :  { %130 = vmatpush.msra.mxu0 %v123_v1  ;;  %1895 = vmatpush.msra.mxu3 %v123_v1  ;;  %v116_v8 = vld [vmem:[#allocation5 + $0x38] sm:$0xff]  ;;  %v115_v9 = vld [vmem:[#allocation5 + $0x30] sm:$0xff]  ;;  %v114_v10 = vld [vmem:[#allocation5 + $0x28] sm:$0xff] }
  0x18   :  { %v113_v11 = vld [vmem:[#allocation5 + $0x20] sm:$0xff]  ;;  %v112_v12 = vld [vmem:[#allocation5 + $0x18] sm:$0xff]  ;;  %v111_v13 = vld [vmem:[#allocation5 + $0x10] sm:$0xff] }
  0x19   :  { %131 = vmatpush.msra.mxu0 %v122_v2  ;;  %1896 = vmatpush.msra.mxu3 %v122_v2  ;;  %v110_v14 = vld [vmem:[#allocation5 + $0x8] sm:$0xff]  ;;  %v109_v15 = vld [vmem:[#allocation5] sm:$0xff]  ;;  %v95_v18 = vld [vmem:[#allocation2 + $0x10] sm:$0xff] }
  0x1a   :  { %v93_v16 = vld [vmem:[#allocation2] sm:$0xff]  ;;  %v94_v17 = vld [vmem:[#allocation2 + $0x8] sm:$0xff]  ;;  %v96_v20 = vld [vmem:[#allocation2 + $0x18] sm:$0xff] }
  0x1b   :  { %132 = vmatpush.msra.mxu0 %v121_v3  ;;  %1897 = vmatpush.msra.mxu3 %v121_v3  ;;  %v105_v19 = vld [vmem:[#allocation2 + $0x60] sm:$0xff]  ;;  %v106_v21 = vld [vmem:[#allocation2 + $0x68] sm:$0xff]  ;;  %v107_v23 = vld [vmem:[#allocation2 + $0x70] sm:$0xff] }
  0x1c   :  { %v97_v22 = vld [vmem:[#allocation2 + $0x20] sm:$0xff]  ;;  %v98_v24 = vld [vmem:[#allocation2 + $0x28] sm:$0xff]  ;;  %v108_v25 = vld [vmem:[#allocation2 + $0x78] sm:$0xff] }
  0x1d   :  { %133 = vmatpush.msra.mxu0 %v120_v4  ;;  %1898 = vmatpush.msra.mxu3 %v120_v4  ;;  %v99_v26 = vld [vmem:[#allocation2 + $0x30] sm:$0xff]  ;;  %v100_v27 = vld [vmem:[#allocation2 + $0x38] sm:$0xff]  ;;  %v101_v28 = vld [vmem:[#allocation2 + $0x40] sm:$0xff] }
  0x1e   :  { %v102_v29 = vld [vmem:[#allocation2 + $0x48] sm:$0xff]  ;;  %v103_v30 = vld [vmem:[#allocation2 + $0x50] sm:$0xff]  ;;  %v104_v31 = vld [vmem:[#allocation2 + $0x58] sm:$0xff] }
  0x1f   :  { %134 = vmatpush.msra.mxu0 %v119_v5  ;;  %1899 = vmatpush.msra.mxu3 %v119_v5  ;;  %v2348_v32 = vld [vmem:[%s3462_s2] ss:$0 sm:$0xff] }
  0x21   :  { %135 = vmatpush.msra.mxu0 %v118_v6  ;;  %1900 = vmatpush.msra.mxu3 %v118_v6 }
  0x23   :  { %136 = vmatpush.msra.mxu0 %v117_v7  ;;  %1901 = vmatpush.msra.mxu3 %v117_v7 }
  0x25   :  { %137 = vmatpush.msra.mxu0 %v116_v8  ;;  %1902 = vmatpush.msra.mxu3 %v116_v8 }
  0x27   :  { %138 = vmatpush.msra.mxu0 %v115_v9  ;;  %1903 = vmatpush.msra.mxu3 %v115_v9 }
  0x29   :  { %139 = vmatpush.msra.mxu0 %v114_v10  ;;  %1904 = vmatpush.msra.mxu3 %v114_v10 }
  0x2b   :  { %140 = vmatpush.msra.mxu0 %v113_v11  ;;  %1905 = vmatpush.msra.mxu3 %v113_v11 }
  0x2d   :  { %141 = vmatpush.msra.mxu0 %v112_v12  ;;  %1906 = vmatpush.msra.mxu3 %v112_v12 }
  0x2f   :  { %142 = vmatpush.msra.mxu0 %v111_v13  ;;  %1907 = vmatpush.msra.mxu3 %v111_v13 }
  0x31   :  { %143 = vmatpush.msra.mxu0 %v110_v14  ;;  %1908 = vmatpush.msra.mxu3 %v110_v14 }
  0x33   :  { %144 = vmatpush.msra.mxu0 %v109_v15  ;;  %1909 = vmatpush.msra.mxu3 %v109_v15 }
  0x34   :  { %145 = vmatmul.f32.vlgmr.msra.gmra.mxu0 %v93_v16  ;;  %181 = vmatmul.f32.vlgmr.msra.gmra.mxu3 %v105_v19 }
  0x3c   :  { %148 = vmatmul.f32.gmra.mxu0 %v94_v17  ;;  %184 = vmatmul.f32.gmra.mxu3 %v106_v21 }
  0x44   :  { %151 = vmatmul.f32.gmra.mxu0 %v95_v18  ;;  %187 = vmatmul.f32.gmra.mxu3 %v107_v23 }
  0x4c   :  { %154 = vmatmul.f32.gmra.mxu0 %v96_v20  ;;  %190 = vmatmul.f32.gmra.mxu3 %v108_v25 }
  0x54   :  { %157 = vmatmul.f32.gmra.mxu0 %v97_v22 }
  0x5c   :  { %160 = vmatmul.f32.gmra.mxu0 %v98_v24 }
  0x64   :  { %163 = vmatmul.f32.gmra.mxu0 %v99_v26 }
  0x6c   :  { %166 = vmatmul.f32.gmra.mxu0 %v100_v27 }
  0x74   :  { %169 = vmatmul.f32.gmra.mxu0 %v101_v28 }
  0x7c   :  { %172 = vmatmul.f32.gmra.mxu0 %v102_v29 }
  0x84   :  { %175 = vmatmul.f32.gmra.mxu0 %v103_v30 }
  0x8c   :  { %178 = vmatmul.f32.gmra.mxu0 %v104_v31 }
  0xb1   :  { %v146_v33 = vpop.f32.mrf.mxu0 }
  0xb2   :  { %v2351_v34 = vadd.f32 %v2348_v32, %v146_v33 }
  0xb4   :  { %v2354_v35 = vmul.f32 0.70710677, %v2351_v34 }
  0xb6   :  { %v226_v36 = vmul.f32 %v2354_v35, %v2354_v35 }
  0xb7   :  { %v182_v16 = vpop.f32.mrf.mxu3 }
  0xb8   :  { %v227_v37 = vmin.f32 %v226_v36, 16.0  ;;  %v2394_v21 = vadd.f32 %v2348_v32, %v182_v16 }
  0xb9   :  { %v149_v38 = vpop.f32.mrf.mxu0 }
  0xba   :  { %v228_v39 = vmul.f32 2.1237322e-06, %v227_v37  ;;  %v2359_v40 = vadd.f32 %v2348_v32, %v149_v38  ;;  %v239_v41 = vmul.f32 3.8918573e-05, %v227_v37  ;;  %v2410_v36 = vmul.f32 0.70710677, %v2394_v21 }
  0xbc   :  { %v229_v42 = vadd.f32 0.00028619796, %v228_v39  ;;  %v2362_v43 = vmul.f32 0.70710677, %v2359_v40  ;;  %v240_v44 = vadd.f32 0.001143296, %v239_v41 }
  0xbd   :  { %v2413_v39 = vmul.f32 0.5, %v2351_v34 }
  0xbe   :  { %v230_v45 = vmul.f32 %v229_v42, %v227_v37  ;;  %v266_v46 = vmul.f32 %v2362_v43, %v2362_v43  ;;  %v241_v47 = vmul.f32 %v240_v44, %v227_v37 }
  0xc0   :  { %v231_v48 = vadd.f32 0.0036580483, %v230_v45  ;;  %v2366_v49 = vmin.f32 %v266_v46, 16.0  ;;  %v242_v51 = vadd.f32 0.014752088, %v241_v47 }
  0xc1   :  { %v152_v50 = vpop.f32.mrf.mxu0 }
  0xc2   :  { %v232_v52 = vmul.f32 %v231_v48, %v227_v37  ;;  %v268_v53 = vmul.f32 2.1237322e-06, %v2366_v49  ;;  %v2370_v54 = vadd.f32 %v2348_v32, %v152_v50  ;;  %v279_v55 = vmul.f32 3.8918573e-05, %v2366_v49 }
  0xc3   :  { %v243_v56 = vmul.f32 %v242_v51, %v227_v37 }
  0xc4   :  { %v269_v57 = vadd.f32 0.00028619796, %v268_v53  ;;  %v2374_v58 = vmul.f32 0.70710677, %v2370_v54  ;;  %v280_v60 = vadd.f32 0.001143296, %v279_v55 }
  0xc5   :  { %v244_v59 = vadd.f32 0.112945676, %v243_v56  ;;  %v233_v61 = vadd.f32 0.05243302, %v232_v52  ;;  %v185_v52 = vpop.f32.mrf.mxu3 }
  0xc6   :  { %v270_v62 = vmul.f32 %v269_v57, %v2366_v49  ;;  %v306_v63 = vmul.f32 %v2374_v58, %v2374_v58  ;;  %v281_v1 = vmul.f32 %v280_v60, %v2366_v49  ;;  %v706_v57 = vmul.f32 %v2410_v36, %v2410_v36 }
  0xc7   :  { %v245_v0 = vmul.f32 %v244_v59, %v227_v37  ;;  %v234_v7 = vmul.f32 %v233_v61, %v227_v37 }
  0xc8   :  { %v271_v2 = vadd.f32 0.0036580483, %v270_v62  ;;  %v2380_v3 = vmin.f32 %v306_v63, 16.0  ;;  %v282_v6 = vadd.f32 0.014752088, %v281_v1  ;;  %v2432_v1 = vadd.f32 %v2348_v32, %v185_v52 }
  0xc9   :  { %v155_v4 = vpop.f32.mrf.mxu0  ;;  %v246_v5 = vadd.f32 0.4994258, %v245_v0  ;;  %v235_v17 = vadd.f32 0.18741608, %v234_v7 }
  0xca   :  { %v272_v8 = vmul.f32 %v271_v2, %v2366_v49  ;;  %v2384_v9 = vadd.f32 %v2348_v32, %v155_v4  ;;  %v308_v10 = vmul.f32 2.1237322e-06, %v2380_v3  ;;  %v283_v12 = vmul.f32 %v282_v6, %v2366_v49 }
  0xcb   :  { %v247_v11 = vmul.f32 %v246_v5, %v227_v37  ;;  %v236_v26 = vmul.f32 %v235_v17, %v227_v37  ;;  %v319_v31 = vmul.f32 3.8918573e-05, %v2380_v3  ;;  %v2448_v17 = vmul.f32 0.70710677, %v2432_v1 }
  0xcc   :  { %v273_v13 = vadd.f32 0.05243302, %v272_v8  ;;  %v2389_v14 = vmul.f32 0.70710677, %v2384_v9  ;;  %v284_v18 = vadd.f32 0.112945676, %v283_v12 }
  0xcd   :  { %v248_v15 = vadd.f32 1.0, %v247_v11  ;;  %v309_v19 = vadd.f32 0.00028619796, %v308_v10  ;;  %v237_v44 = vadd.f32 1.1283791, %v236_v26  ;;  %v2443_v12 = vmin.f32 %v706_v57, 16.0 }
  0xce   :  { %v346_v20 = vmul.f32 %v2389_v14, %v2389_v14  ;;  %v274_v22 = vmul.f32 %v273_v13, %v2366_v49  ;;  %v285_v25 = vmul.f32 %v284_v18, %v2366_v49  ;;  %v320_v53 = vadd.f32 0.001143296, %v319_v31 }
  0xcf   :  { %1953 = vrcp.f32 %v248_v15  ;;  %v310_v28 = vmul.f32 %v309_v19, %v2380_v3  ;;  %v258_v47 = vand.u32 2147483647, %v248_v15  ;;  %v260_v56 = vand.u32 2147483648, %v248_v15 }
  0xd0   :  { %v2397_v23 = vmin.f32 %v346_v20, 16.0  ;;  %v286_v30 = vadd.f32 0.4994258, %v285_v25  ;;  %v275_v37 = vadd.f32 0.18741608, %v274_v22  ;;  %v238_v2 = vmul.f32 %v237_v44, %v2354_v35 }
  0xd1   :  { %v158_v24 = vpop.f32.mrf.mxu0  ;;  %v311_v48 = vadd.f32 0.0036580483, %v310_v28  ;;  %vm254_vm1 = vweird.f32 %v248_v15  ;;  %vm259_vm3 = vcmp.eq.f32.partialorder %v258_v47, 8.507059e+37  ;;  %v261_v11 = vor.u32 1.1754944e-38, %v260_v56 }
  0xd2   :  { %v2401_v27 = vadd.f32 %v2348_v32, %v158_v24  ;;  %v348_v29 = vmul.f32 2.1237322e-06, %v2397_v23  ;;  %v287_v42 = vmul.f32 %v286_v30, %v2366_v49  ;;  %v276_v59 = vmul.f32 %v275_v37, %v2366_v49 }
  0xd3   :  { %v312_v4 = vmul.f32 %v311_v48, %v2380_v3  ;;  %v321_v49 = vmul.f32 %v320_v53, %v2380_v3  ;;  %v359_v5 = vmul.f32 3.8918573e-05, %v2397_v23  ;;  %v708_v28 = vmul.f32 2.1237322e-06, %v2443_v12 }
  0xd4   :  { %v2407_v33 = vmul.f32 0.70710677, %v2401_v27  ;;  %v349_v41 = vadd.f32 0.00028619796, %v348_v29  ;;  %v2419_v51 = vadd.f32 1.0, %v287_v42  ;;  %v746_v44 = vmul.f32 %v2448_v17, %v2448_v17 }
  0xd5   :  { %v1954_v38 = vpop.eup %1953  ;;  %v277_v35 = vadd.f32 1.1283791, %v276_v59  ;;  %v313_v19 = vadd.f32 0.05243302, %v312_v4  ;;  %v360_v22 = vadd.f32 0.001143296, %v359_v5 }
  0xd6   :  { %v386_v45 = vmul.f32 %v2407_v33, %v2407_v33  ;;  %v250_v46 = vmul.f32 %v1954_v38, %v248_v15  ;;  %v350_v50 = vmul.f32 %v349_v41, %v2397_v23  ;;  %vm255_vm0 = vweird.f32 %v1954_v38 }
  0xd7   :  { %1955 = vrcp.f32 %v2419_v51  ;;  %vm256_vm2 = vmor %vm254_vm1, %vm255_vm0  ;;  %v322_v15 = vadd.f32 0.014752088, %v321_v49  ;;  %vm294_vm4 = vweird.f32 %v2419_v51  ;;  %v298_v47 = vand.u32 2147483647, %v2419_v51 }
  0xd8   :  { %v2421_v55 = vmin.f32 %v386_v45, 16.0  ;;  %v251_v34 = vsub.f32 1.0, %v250_v46  ;;  %v351_v60 = vadd.f32 0.0036580483, %v350_v50  ;;  %v709_v45 = vadd.f32 0.00028619796, %v708_v28 }
  0xd9   :  { %v161_v61 = vpop.f32.mrf.mxu0  ;;  %v314_v48 = vmul.f32 %v313_v19, %v2380_v3  ;;  %v278_v4 = vmul.f32 %v277_v35, %v2362_v43  ;;  %vm299_vm7 = vcmp.eq.f32.partialorder %v298_v47, 8.507059e+37 }
  0xda   :  { %v388_v62 = vmul.f32 2.1237322e-06, %v2421_v55  ;;  %v2429_v63 = vadd.f32 %v2348_v32, %v161_v61  ;;  %v252_v0 = vmul.f32 %v1954_v38, %v251_v34  ;;  %v352_v10 = vmul.f32 %v351_v60, %v2397_v23 }
  0xdb   :  { %v710_v56 = vmul.f32 %v709_v45, %v2443_v12  ;;  %v315_v5 = vadd.f32 0.18741608, %v314_v48 }
  0xdc   :  { %v389_v6 = vadd.f32 0.00028619796, %v388_v62  ;;  %v2439_v7 = vmul.f32 0.70710677, %v2429_v63  ;;  %v253_v8 = vadd.f32 %v1954_v38, %v252_v0  ;;  %v353_v29 = vadd.f32 0.05243302, %v352_v10 }
  0xdd   :  { %v1956_v18 = vpop.eup %1955  ;;  %v711_v10 = vadd.f32 0.0036580483, %v710_v56  ;;  %v2520_v0 = vmul.f32 0.5, %v2401_v27 }
  0xde   :  { %v426_v13 = vmul.f32 %v2439_v7, %v2439_v7  ;;  %v257_v16 = vsel %vm256_vm2, %v1954_v38, %v253_v8  ;;  %v390_v24 = vmul.f32 %v389_v6, %v2421_v55  ;;  %v290_v31 = vmul.f32 %v1956_v18, %v2419_v51 }
  0xdf   :  { %v262_v20 = vsel %vm259_vm3, %v261_v11, %v257_v16  ;;  %v300_v38 = vand.u32 2147483648, %v2419_v51  ;;  %vm295_vm5 = vweird.f32 %v1956_v18  ;;  %v354_v60 = vmul.f32 %v353_v29, %v2397_v23 }
  0xe0   :  { %v2451_v25 = vmin.f32 %v426_v13, 16.0  ;;  %v263_v26 = vmul.f32 %v262_v20, %v238_v2  ;;  %v291_v46 = vsub.f32 1.0, %v290_v31  ;;  %v391_v50 = vadd.f32 0.0036580483, %v390_v24  ;;  %vm2476_vm6 = vmor %vm294_vm4, %vm295_vm5 }
  0xe1   :  { %v164_v30 = vpop.f32.mrf.mxu0  ;;  %v301_v59 = vor.u32 1.1754944e-38, %v300_v38  ;;  %v2480_v2 = vmin.f32 %v746_v44, 16.0  ;;  %v323_v8 = vmul.f32 %v322_v15, %v2380_v3  ;;  %v355_v13 = vadd.f32 0.18741608, %v354_v60 }
  0xe2   :  { %v428_v37 = vmul.f32 2.1237322e-06, %v2451_v25  ;;  %v2459_v41 = vadd.f32 %v2348_v32, %v164_v30  ;;  %v1878_v42 = vclamps-f32 %v263_v26, 1.0  ;;  %v292_v57 = vmul.f32 %v1956_v18, %v291_v46 }
  0xe3   :  { %v392_v6 = vmul.f32 %v391_v50, %v2421_v55  ;;  %v361_v16 = vmul.f32 %v360_v22, %v2397_v23  ;;  %v324_v20 = vadd.f32 0.112945676, %v323_v8  ;;  %v195_v24 = vmul.f32 0.5, %v2359_v40 }
  0xe4   :  { %v429_v52 = vadd.f32 0.00028619796, %v428_v37  ;;  %v866_v53 = vadd.f32 1.0, %v1878_v42  ;;  %v2466_v34 = vmul.f32 0.70710677, %v2459_v41  ;;  %v293_v49 = vadd.f32 %v1956_v18, %v292_v57  ;;  %v188_v42 = vpop.f32.mrf.mxu3 }
  0xe5   :  { %v316_v26 = vmul.f32 %v315_v5, %v2380_v3  ;;  %v393_v28 = vadd.f32 0.05243302, %v392_v6  ;;  %v712_v30 = vmul.f32 %v711_v10, %v2443_v12  ;;  %v2499_v38 = vmul.f32 0.5, %v2370_v54 }
  0xe6   :  { %v430_v61 = vmul.f32 %v429_v52, %v2451_v25  ;;  %v2472_v62 = vmul.f32 %v866_v53, %v2413_v39  ;;  %v748_v39 = vmul.f32 2.1237322e-06, %v2480_v2  ;;  %v466_v51 = vmul.f32 %v2466_v34, %v2466_v34 }
  0xe7   :  { %v297_v11 = vsel %vm2476_vm6, %v1956_v18, %v293_v49  ;;  %v325_v18 = vmul.f32 %v324_v20, %v2380_v3  ;;  %v356_v22 = vmul.f32 %v355_v13, %v2397_v23  ;;  %v362_v40 = vadd.f32 0.014752088, %v361_v16 }
  0xe8   :  { %898 = vadd.xlane.f32.xlu0 %v2472_v62  ;;  %v431_v43 = vadd.f32 0.0036580483, %v430_v61  ;;  %v302_v35 = vsel %vm299_vm7, %v301_v59, %v297_v11  ;;  %v749_v15 = vadd.f32 0.00028619796, %v748_v39  ;;  %v2494_v29 = vmin.f32 %v466_v51, 16.0 }
  0xe9   :  { %v303_v19 = vmul.f32 %v302_v35, %v278_v4  ;;  %v2504_v44 = vmul.f32 0.5, %v2384_v9  ;;  %v326_v47 = vadd.f32 0.4994258, %v325_v18  ;;  %v394_v48 = vmul.f32 %v393_v28, %v2421_v55 }
  0xea   :  { %v432_v37 = vmul.f32 %v431_v43, %v2451_v25  ;;  %v468_v45 = vmul.f32 2.1237322e-06, %v2494_v29  ;;  %v750_v50 = vmul.f32 %v749_v15, %v2480_v2  ;;  %v2510_v54 = vadd.f32 %v2348_v32, %v188_v42 }
  0xeb   :  { %v1879_v31 = vclamps-f32 %v303_v19, 1.0  ;;  %v363_v52 = vmul.f32 %v362_v40, %v2397_v23  ;;  %v317_v53 = vadd.f32 1.1283791, %v316_v26  ;;  %v713_v56 = vadd.f32 0.05243302, %v712_v30 }
  0xec   :  { %v327_v9 = vmul.f32 %v326_v47, %v2380_v3  ;;  %v357_v59 = vadd.f32 1.1283791, %v356_v22  ;;  %v433_v60 = vadd.f32 0.05243302, %v432_v37  ;;  %v2517_v61 = vmul.f32 0.70710677, %v2510_v54  ;;  %v191_v26 = vpop.f32.mrf.mxu3 }
  0xed   :  { %v867_v46 = vadd.f32 1.0, %v1879_v31  ;;  %v469_v4 = vadd.f32 0.00028619796, %v468_v45  ;;  %v364_v5 = vadd.f32 0.112945676, %v363_v52  ;;  %v2529_v51 = vmul.f32 %v317_v53, %v2374_v58 }
  0xee   :  { %v2523_v49 = vadd.f32 1.0, %v327_v9  ;;  %v395_v6 = vadd.f32 0.18741608, %v394_v48  ;;  %v751_v39 = vadd.f32 0.0036580483, %v750_v50  ;;  %v786_v8 = vmul.f32 %v2517_v61, %v2517_v61 }
  0xef   :  { %v2513_v57 = vmul.f32 %v867_v46, %v195_v24  ;;  %v399_v3 = vmul.f32 3.8918573e-05, %v2421_v55  ;;  %v2532_v10 = vmul.f32 0.5, %v2429_v63  ;;  %v714_v27 = vmul.f32 %v713_v56, %v2443_v12 }
  0xf0   :  { %1957 = vrcp.f32 %v2523_v49  ;;  %v434_v11 = vmul.f32 %v433_v60, %v2451_v25  ;;  %v2538_v13 = vmul.f32 0.5, %v2459_v41  ;;  %v2541_v43 = vmul.f32 0.5, %v2394_v21  ;;  %v167_v21 = vpop.f32.mrf.mxu0 }
  0xf1   :  { %900 = vadd.xlane.f32.xlu0 %v2513_v57  ;;  %v2544_v35 = vmul.f32 0.5, %v2432_v1  ;;  %v470_v58 = vmul.f32 %v469_v4, %v2494_v29  ;;  %v2547_v16 = vmin.f32 %v786_v8, 16.0  ;;  %v365_v63 = vmul.f32 %v364_v5, %v2397_v23 }
  0xf2   :  { %v400_v19 = vadd.f32 0.001143296, %v399_v3  ;;  %v2551_v20 = vmul.f32 %v357_v59, %v2389_v14  ;;  %v396_v24 = vmul.f32 %v395_v6, %v2421_v55  ;;  %v752_v41 = vmul.f32 %v751_v39, %v2480_v2 }
  0xf3   :  { %v439_v28 = vmul.f32 3.8918573e-05, %v2451_v25  ;;  %v715_v1 = vadd.f32 0.18741608, %v714_v27  ;;  %v788_v15 = vmul.f32 2.1237322e-06, %v2547_v16  ;;  %v2558_v31 = vadd.f32 %v2348_v32, %v191_v26 }
  0xf4   :  { %v366_v30 = vadd.f32 0.4994258, %v365_v63  ;;  %v435_v18 = vadd.f32 0.18741608, %v434_v11  ;;  %v2561_v22 = vadd.f32 %v2348_v32, %v167_v21  ;;  %v401_v14 = vmul.f32 %v400_v19, %v2421_v55 }
  0xf5   :  { %v440_v37 = vadd.f32 0.001143296, %v439_v28  ;;  %v471_v40 = vadd.f32 0.0036580483, %v470_v58  ;;  %vm334_vm8 = vweird.f32 %v2523_v49  ;;  %v789_v45 = vadd.f32 0.00028619796, %v788_v15 }
  0xf6   :  { %v1958_v42 = vpop.eup %1957  ;;  %v367_v46 = vmul.f32 %v366_v30, %v2397_v23  ;;  %v338_v48 = vand.u32 2147483647, %v2523_v49  ;;  %v340_v50 = vand.u32 2147483648, %v2523_v49  ;;  %v2570_v52 = vmul.f32 0.70710677, %v2558_v31 }
  0xf7   :  { %v330_v47 = vmul.f32 %v1958_v42, %v2523_v49  ;;  %vm335_vm9 = vweird.f32 %v1958_v42  ;;  %v790_v53 = vmul.f32 %v789_v45, %v2547_v16  ;;  %v2576_v9 = vmul.f32 0.70710677, %v2561_v22 }
  0xf8   :  { %v2573_v56 = vadd.f32 1.0, %v367_v46  ;;  %v826_v23 = vmul.f32 %v2570_v52, %v2570_v52  ;;  %v402_v60 = vadd.f32 0.014752088, %v401_v14  ;;  %v441_v4 = vmul.f32 %v440_v37, %v2451_v25  ;;  %vm2591_vm10 = vmor %vm334_vm8, %vm335_vm9 }
  0xf9   :  { %v331_v59 = vsub.f32 1.0, %v330_v47  ;;  %v2581_v5 = vadd.f32 1.1283791, %v396_v24  ;;  %v472_v6 = vmul.f32 %v471_v40, %v2494_v29  ;;  %v753_v39 = vadd.f32 0.05243302, %v752_v41 }
  0xfa   :  { %1959 = vrcp.f32 %v2573_v56  ;;  %v716_v8 = vmul.f32 %v715_v1, %v2443_v12  ;;  %v341_v27 = vor.u32 1.1754944e-38, %v340_v50  ;;  %v2586_v11 = vmin.f32 %v826_v23, 16.0  ;;  %v170_v23 = vpop.f32.mrf.mxu0 }
  0xfb   :  { %v332_v3 = vmul.f32 %v1958_v42, %v331_v59  ;;  %v791_v63 = vadd.f32 0.0036580483, %v790_v53  ;;  %v506_v19 = vmul.f32 %v2576_v9, %v2576_v9  ;;  %v403_v24 = vmul.f32 %v402_v60, %v2421_v55 }
  0xfc   :  { %v442_v41 = vadd.f32 0.014752088, %v441_v4  ;;  %v436_v26 = vmul.f32 %v435_v18, %v2451_v25  ;;  %vm339_vm11 = vcmp.eq.f32.partialorder %v338_v48, 8.507059e+37  ;;  %v828_v28 = vmul.f32 2.1237322e-06, %v2586_v11 }
  0xfd   :  { %v333_v21 = vadd.f32 %v1958_v42, %v332_v3  ;;  %v473_v1 = vadd.f32 0.05243302, %v472_v6  ;;  %vm374_vm12 = vweird.f32 %v2573_v56  ;;  %v2601_v49 = vmin.f32 %v506_v19, 16.0 }
  0xfe   :  { %v404_v15 = vadd.f32 0.112945676, %v403_v24  ;;  %v378_v14 = vand.u32 2147483647, %v2573_v56  ;;  %v829_v37 = vadd.f32 0.00028619796, %v828_v28  ;;  %v443_v40 = vmul.f32 %v442_v41, %v2451_v25 }
  0xff   :  { %v337_v30 = vsel %vm2591_vm10, %v1958_v42, %v333_v21  ;;  %v792_v46 = vmul.f32 %v791_v63, %v2547_v16  ;;  %v508_v47 = vmul.f32 2.1237322e-06, %v2601_v49  ;;  %v380_v59 = vand.u32 2147483648, %v2573_v56 }
 0x100   :  { %v1960_v45 = vpop.eup %1959  ;;  %v342_v18 = vsel %vm339_vm11, %v341_v27, %v337_v30  ;;  %v405_v48 = vmul.f32 %v404_v15, %v2421_v55  ;;  %v830_v42 = vmul.f32 %v829_v37, %v2586_v11  ;;  %v2615_v6 = vadd.f32 %v2348_v32, %v170_v23 }
 0x101   :  { %v343_v50 = vmul.f32 %v342_v18, %v2529_v51  ;;  %v370_v53 = vmul.f32 %v1960_v45, %v2573_v56  ;;  %vm375_vm13 = vweird.f32 %v1960_v45  ;;  %v509_v60 = vadd.f32 0.00028619796, %v508_v47 }
 0x102   :  { %v406_v4 = vadd.f32 0.4994258, %v405_v48  ;;  %v831_v58 = vadd.f32 0.0036580483, %v830_v42  ;;  %v444_v63 = vadd.f32 0.112945676, %v443_v40  ;;  %v754_v19 = vmul.f32 %v753_v39, %v2480_v2  ;;  %vm2628_vm14 = vmor %vm374_vm12, %vm375_vm13 }
 0x103   :  { %v1880_v3 = vclamps-f32 %v343_v50, 1.0  ;;  %v371_v27 = vsub.f32 1.0, %v370_v53  ;;  %v793_v51 = vadd.f32 0.05243302, %v792_v46  ;;  %v510_v24 = vmul.f32 %v509_v60, %v2601_v49 }
 0x104   :  { %v407_v41 = vmul.f32 %v406_v4, %v2421_v55  ;;  %v832_v15 = vmul.f32 %v831_v58, %v2586_v11  ;;  %v2622_v30 = vmul.f32 0.70710677, %v2615_v6  ;;  %v474_v37 = vmul.f32 %v473_v1, %v2494_v29 }
 0x105   :  { %v868_v21 = vadd.f32 1.0, %v1880_v3  ;;  %v372_v28 = vmul.f32 %v1960_v45, %v371_v27  ;;  %v381_v39 = vor.u32 1.1754944e-38, %v380_v59  ;;  %v445_v55 = vmul.f32 %v444_v63, %v2451_v25 }
 0x106   :  { %v408_v18 = vadd.f32 1.0, %v407_v41  ;;  %v717_v46 = vadd.f32 1.1283791, %v716_v8  ;;  %vm379_vm15 = vcmp.eq.f32.partialorder %v378_v14, 8.507059e+37  ;;  %v437_v50 = vadd.f32 1.1283791, %v436_v26 }
 0x107   :  { %v2634_v47 = vmul.f32 %v868_v21, %v2499_v38  ;;  %v373_v48 = vadd.f32 %v1960_v45, %v372_v28  ;;  %v511_v53 = vadd.f32 0.0036580483, %v510_v24  ;;  %v546_v56 = vmul.f32 %v2622_v30, %v2622_v30 }
 0x108   :  { %1961 = vrcp.f32 %v408_v18  ;;  %v755_v1 = vadd.f32 0.18741608, %v754_v19  ;;  %v794_v59 = vmul.f32 %v793_v51, %v2547_v16  ;;  %v833_v8 = vadd.f32 0.05243302, %v832_v15 }
 0x109   :  { %902 = vadd.xlane.f32.xlu1 %v2634_v47  ;;  %v377_v42 = vsel %vm2628_vm14, %v1960_v45, %v373_v48  ;;  %v475_v23 = vadd.f32 0.18741608, %v474_v37  ;;  %v446_v60 = vadd.f32 0.4994258, %v445_v55  ;;  %v479_v14 = vmul.f32 3.8918573e-05, %v2494_v29  ;;  %v173_v37 = vpop.f32.mrf.mxu0 }
 0x10a   :  { %v382_v38 = vsel %vm379_vm15, %v381_v39, %v377_v42  ;;  %v398_v26 = vmul.f32 %v2581_v5, %v2407_v33  ;;  %v2646_v4 = vmul.f32 %v717_v46, %v2410_v36  ;;  %v719_v27 = vmul.f32 3.8918573e-05, %v2443_v12 }
 0x10b   :  { %v383_v3 = vmul.f32 %v382_v38, %v2551_v20  ;;  %v2651_v58 = vmul.f32 %v437_v50, %v2439_v7  ;;  %v512_v45 = vmul.f32 %v511_v53, %v2601_v49  ;;  %v2654_v63 = vmin.f32 %v546_v56, 16.0 }
 0x10c   :  { %v447_v19 = vmul.f32 %v446_v60, %v2451_v25  ;;  %v756_v51 = vmul.f32 %v755_v1, %v2480_v2  ;;  %v795_v24 = vadd.f32 0.18741608, %v794_v59  ;;  %v834_v36 = vmul.f32 %v833_v8, %v2586_v11 }
 0x10d   :  { %v1881_v33 = vclamps-f32 %v383_v3, 1.0  ;;  %v476_v20 = vmul.f32 %v475_v23, %v2494_v29  ;;  %v548_v41 = vmul.f32 2.1237322e-06, %v2654_v63  ;;  %v480_v7 = vadd.f32 0.001143296, %v479_v14 }
 0x10e   :  { %v1962_v5 = vpop.eup %1961  ;;  %v2661_v21 = vadd.f32 1.0, %v447_v19  ;;  %vm414_vm0 = vweird.f32 %v408_v18  ;;  %v720_v40 = vadd.f32 0.001143296, %v719_v27  ;;  %v513_v25 = vadd.f32 0.05243302, %v512_v45 }
 0x10f   :  { %v869_v28 = vadd.f32 1.0, %v1881_v33  ;;  %v410_v15 = vmul.f32 %v1962_v5, %v408_v18  ;;  %v418_v39 = vand.u32 2147483647, %v408_v18  ;;  %v420_v55 = vand.u32 2147483648, %v408_v18 }
 0x110   :  { %1963 = vrcp.f32 %v2661_v21  ;;  %v835_v48 = vadd.f32 0.18741608, %v834_v36  ;;  %vm415_vm1 = vweird.f32 %v1962_v5  ;;  %v2667_v53 = vadd.f32 1.1283791, %v756_v51 }
 0x111   :  { %v2665_v46 = vmul.f32 %v869_v28, %v2504_v44  ;;  %v411_v50 = vsub.f32 1.0, %v410_v15  ;;  %v549_v56 = vadd.f32 0.00028619796, %v548_v41  ;;  %v2670_v1 = vadd.f32 %v2348_v32, %v173_v37  ;;  %vm2680_vm2 = vmor %vm414_vm0, %vm415_vm1 }
 0x112   :  { %v481_v59 = vmul.f32 %v480_v7, %v2494_v29  ;;  %v2673_v42 = vadd.f32 1.1283791, %v476_v20  ;;  %v796_v8 = vmul.f32 %v795_v24, %v2547_v16  ;;  %v721_v44 = vmul.f32 %v720_v40, %v2443_v12 }
 0x113   :  { %904 = vadd.xlane.f32.xlu1 %v2665_v46  ;;  %v412_v23 = vmul.f32 %v1962_v5, %v411_v50  ;;  %v514_v38 = vmul.f32 %v513_v25, %v2601_v49  ;;  %vm2684_vm3 = vcmp.eq.f32.partialorder %v418_v39, 8.507059e+37  ;;  %v421_v3 = vor.u32 1.1754944e-38, %v420_v55 }
 0x114   :  { %v482_v27 = vadd.f32 0.014752088, %v481_v59  ;;  %v836_v45 = vmul.f32 %v835_v48, %v2586_v11  ;;  %v722_v51 = vadd.f32 0.014752088, %v721_v44  ;;  %v759_v24 = vmul.f32 3.8918573e-05, %v2480_v2 }
 0x115   :  { %v413_v19 = vadd.f32 %v1962_v5, %v412_v23  ;;  %v550_v36 = vmul.f32 %v549_v56, %v2654_v63  ;;  %v2692_v18 = vmul.f32 0.70710677, %v2670_v1  ;;  %v799_v41 = vmul.f32 3.8918573e-05, %v2547_v16 }
 0x116   :  { %v1964_v33 = vpop.eup %1963  ;;  %v483_v20 = vmul.f32 %v482_v27, %v2494_v29  ;;  %vm454_vm4 = vweird.f32 %v2661_v21  ;;  %v458_v15 = vand.u32 2147483647, %v2661_v21  ;;  %v460_v40 = vand.u32 2147483648, %v2661_v21 }
 0x117   :  { %v417_v7 = vsel %vm2680_vm2, %v1962_v5, %v413_v19  ;;  %v450_v28 = vmul.f32 %v1964_v33, %v2661_v21  ;;  %v723_v39 = vmul.f32 %v722_v51, %v2443_v12  ;;  %vm455_vm5 = vweird.f32 %v1964_v33 }
 0x118   :  { %v422_v37 = vsel %vm2684_vm3, %v421_v3, %v417_v7  ;;  %v484_v25 = vadd.f32 0.112945676, %v483_v20  ;;  %v760_v50 = vadd.f32 0.001143296, %v759_v24  ;;  %v586_v5 = vmul.f32 %v2692_v18, %v2692_v18  ;;  %vm2711_vm6 = vmor %vm454_vm4, %vm455_vm5 }
 0x119   :  { %v423_v55 = vmul.f32 %v422_v37, %v398_v26  ;;  %v451_v48 = vsub.f32 1.0, %v450_v28  ;;  %v724_v59 = vadd.f32 0.112945676, %v723_v39  ;;  %v800_v23 = vadd.f32 0.001143296, %v799_v41 }
 0x11a   :  { %v485_v56 = vmul.f32 %v484_v25, %v2494_v29  ;;  %v551_v60 = vadd.f32 0.0036580483, %v550_v36  ;;  %v761_v3 = vmul.f32 %v760_v50, %v2480_v2  ;;  %v461_v26 = vor.u32 1.1754944e-38, %v460_v40 }
 0x11b   :  { %v1882_v44 = vclamps-f32 %v423_v55, 1.0  ;;  %v452_v14 = vmul.f32 %v1964_v33, %v451_v48  ;;  %v725_v51 = vmul.f32 %v724_v59, %v2443_v12  ;;  %v801_v24 = vmul.f32 %v800_v23, %v2547_v16 }
 0x11c   :  { %v486_v19 = vadd.f32 0.4994258, %v485_v56  ;;  %vm459_vm7 = vcmp.eq.f32.partialorder %v458_v15, 8.507059e+37  ;;  %v762_v41 = vadd.f32 0.014752088, %v761_v3  ;;  %v2717_v36 = vmin.f32 %v586_v5, 16.0 }
 0x11d   :  { %v870_v20 = vadd.f32 1.0, %v1882_v44  ;;  %v453_v7 = vadd.f32 %v1964_v33, %v452_v14  ;;  %v726_v37 = vadd.f32 0.4994258, %v725_v51  ;;  %v802_v21 = vadd.f32 0.014752088, %v801_v24 }
 0x11e   :  { %v487_v28 = vmul.f32 %v486_v19, %v2494_v29  ;;  %v763_v39 = vmul.f32 %v762_v41, %v2480_v2  ;;  %v839_v55 = vmul.f32 3.8918573e-05, %v2586_v11  ;;  %v588_v15 = vmul.f32 2.1237322e-06, %v2717_v36 }
 0x11f   :  { %v2721_v25 = vmul.f32 %v870_v20, %v2520_v0  ;;  %v457_v40 = vsel %vm2711_vm6, %v1964_v33, %v453_v7  ;;  %v727_v5 = vmul.f32 %v726_v37, %v2443_v12  ;;  %v797_v29 = vadd.f32 1.1283791, %v796_v8 }
 0x120   :  { %v462_v48 = vsel %vm459_vm7, %v461_v26, %v457_v40  ;;  %v2728_v50 = vadd.f32 1.0, %v487_v28  ;;  %v764_v56 = vadd.f32 0.112945676, %v763_v39  ;;  %v803_v59 = vmul.f32 %v802_v21, %v2547_v16 }
 0x121   :  { %906 = vadd.xlane.f32.xlu2 %v2721_v25  ;;  %v463_v0 = vmul.f32 %v462_v48, %v2651_v58  ;;  %v2736_v33 = vmul.f32 %v2667_v53, %v2448_v17  ;;  %v837_v23 = vadd.f32 1.1283791, %v836_v45  ;;  %v515_v44 = vadd.f32 0.18741608, %v514_v38 }
 0x122   :  { %1965 = vrcp.f32 %v2728_v50  ;;  %v552_v14 = vmul.f32 %v551_v60, %v2654_v63  ;;  %v728_v12 = vadd.f32 1.0, %v727_v5  ;;  %v765_v8 = vmul.f32 %v764_v56, %v2480_v2 }
 0x123   :  { %v1883_v3 = vclamps-f32 %v463_v0, 1.0  ;;  %v2743_v58 = vmul.f32 %v2673_v42, %v2466_v34  ;;  %v589_v27 = vadd.f32 0.00028619796, %v588_v15  ;;  %v804_v26 = vadd.f32 0.112945676, %v803_v59 }
 0x124   :  { %v840_v19 = vadd.f32 0.001143296, %v839_v55  ;;  %v2746_v17 = vmul.f32 %v797_v29, %v2517_v61  ;;  %v500_v38 = vand.u32 2147483648, %v2728_v50  ;;  %1967 = vrcp.f32 %v728_v12 }
 0x125   :  { %v871_v53 = vadd.f32 1.0, %v1883_v3  ;;  %v2750_v45 = vmul.f32 %v837_v23, %v2570_v52  ;;  %v2753_v60 = vmul.f32 %v515_v44, %v2601_v49  ;;  %v766_v51 = vadd.f32 0.4994258, %v765_v8 }
 0x126   :  { %v805_v34 = vmul.f32 %v804_v26, %v2547_v16  ;;  %v2756_v42 = vadd.f32 0.05243302, %v552_v14  ;;  %v841_v61 = vmul.f32 %v840_v19, %v2586_v11  ;;  %v519_v20 = vmul.f32 3.8918573e-05, %v2601_v49 }
 0x127   :  { %v2759_v24 = vmul.f32 %v871_v53, %v2532_v10  ;;  %v590_v41 = vmul.f32 %v589_v27, %v2717_v36  ;;  %vm494_vm8 = vweird.f32 %v2728_v50  ;;  %v767_v52 = vmul.f32 %v766_v51, %v2480_v2 }
 0x128   :  { %v1966_v7 = vpop.eup %1965  ;;  %v806_v28 = vadd.f32 0.4994258, %v805_v34  ;;  %v498_v21 = vand.u32 2147483647, %v2728_v50  ;;  %v501_v10 = vor.u32 1.1754944e-38, %v500_v38  ;;  %vm734_vm9 = vweird.f32 %v728_v12 }
 0x129   :  { %908 = vadd.xlane.f32.xlu2 %v2759_v24  ;;  %v490_v37 = vmul.f32 %v1966_v7, %v2728_v50  ;;  %v842_v40 = vadd.f32 0.014752088, %v841_v61  ;;  %v768_v39 = vadd.f32 1.0, %v767_v52  ;;  %v520_v48 = vadd.f32 0.001143296, %v519_v20 }
 0x12a   :  { %v807_v55 = vmul.f32 %v806_v28, %v2547_v16  ;;  %v1968_v15 = vpop.eup %1967  ;;  %vm495_vm10 = vweird.f32 %v1966_v7  ;;  %v559_v2 = vmul.f32 3.8918573e-05, %v2654_v63  ;;  %v738_v56 = vand.u32 2147483647, %v728_v12 }
 0x12b   :  { %v491_v5 = vsub.f32 1.0, %v490_v37  ;;  %v843_v29 = vmul.f32 %v842_v40, %v2586_v11  ;;  %v730_v0 = vmul.f32 %v1968_v15, %v728_v12  ;;  %v740_v59 = vand.u32 2147483648, %v728_v12  ;;  %vm2774_vm12 = vmor %vm494_vm8, %vm495_vm10  ;;  %v176_v12 = vpop.f32.mrf.mxu0 }
 0x12c   :  { %1969 = vrcp.f32 %v768_v39  ;;  %vm735_vm11 = vweird.f32 %v1968_v15  ;;  %v778_v44 = vand.u32 2147483647, %v768_v39  ;;  %v780_v14 = vand.u32 2147483648, %v768_v39 }
 0x12d   :  { %v492_v23 = vmul.f32 %v1966_v7, %v491_v5  ;;  %v731_v3 = vsub.f32 1.0, %v730_v0  ;;  %v2778_v8 = vadd.f32 1.0, %v807_v55  ;;  %v844_v27 = vadd.f32 0.112945676, %v843_v29  ;;  %vm2792_vm15 = vmor %vm734_vm9, %vm735_vm11 }
 0x12e   :  { %v521_v26 = vmul.f32 %v520_v48, %v2601_v49  ;;  %v2781_v19 = vadd.f32 0.0036580483, %v590_v41  ;;  %vm499_vm13 = vcmp.eq.f32.partialorder %v498_v21, 8.507059e+37  ;;  %v560_v38 = vadd.f32 0.001143296, %v559_v2 }
 0x12f   :  { %v493_v53 = vadd.f32 %v1966_v7, %v492_v23  ;;  %v732_v51 = vmul.f32 %v1968_v15, %v731_v3  ;;  %vm2783_vm14 = vcmp.eq.f32.partialorder %v738_v56, 8.507059e+37  ;;  %v741_v50 = vor.u32 1.1754944e-38, %v740_v59 }
 0x130   :  { %1971 = vrcp.f32 %v2778_v8  ;;  %vm774_vm0 = vweird.f32 %v768_v39  ;;  %vm2796_vm1 = vcmp.eq.f32.partialorder %v778_v44, 8.507059e+37  ;;  %v845_v52 = vmul.f32 %v844_v27, %v2586_v11 }
 0x131   :  { %v497_v61 = vsel %vm2774_vm12, %v1966_v7, %v493_v53  ;;  %v733_v21 = vadd.f32 %v1968_v15, %v732_v51  ;;  %v781_v40 = vor.u32 1.1754944e-38, %v780_v14  ;;  %v522_v55 = vadd.f32 0.014752088, %v521_v26 }
 0x132   :  { %v1970_v28 = vpop.eup %1969  ;;  %v502_v37 = vsel %vm499_vm13, %v501_v10, %v497_v61  ;;  %vm814_vm2 = vweird.f32 %v2778_v8  ;;  %v561_v5 = vmul.f32 %v560_v38, %v2654_v63  ;;  %v818_v2 = vand.u32 2147483647, %v2778_v8 }
 0x133   :  { %v503_v7 = vmul.f32 %v502_v37, %v2743_v58  ;;  %v770_v48 = vmul.f32 %v1970_v28, %v768_v39  ;;  %v737_v29 = vsel %vm2792_vm15, %v1968_v15, %v733_v21  ;;  %v2808_v0 = vadd.f32 %v2348_v32, %v176_v12 }
 0x134   :  { %v846_v10 = vadd.f32 0.4994258, %v845_v52  ;;  %v742_v59 = vsel %vm2783_vm14, %v741_v50, %v737_v29  ;;  %vm775_vm3 = vweird.f32 %v1970_v28  ;;  %v523_v16 = vmul.f32 %v522_v55, %v2601_v49  ;;  %v179_v55 = vpop.f32.mrf.mxu0 }
 0x135   :  { %v1884_v56 = vclamps-f32 %v503_v7, 1.0  ;;  %v771_v58 = vsub.f32 1.0, %v770_v48  ;;  %v743_v44 = vmul.f32 %v742_v59, %v2646_v4  ;;  %v2814_v14 = vmul.f32 0.70710677, %v2808_v0  ;;  %vm2820_vm4 = vmor %vm774_vm0, %vm775_vm3 }
 0x136   :  { %v1972_v23 = vpop.eup %1971  ;;  %v847_v15 = vmul.f32 %v846_v10, %v2586_v11  ;;  %v562_v26 = vadd.f32 0.014752088, %v561_v5  ;;  %v820_v4 = vand.u32 2147483648, %v2778_v8  ;;  %v554_v20 = vmul.f32 %v2756_v42, %v2654_v63 }
 0x137   :  { %v872_v3 = vadd.f32 1.0, %v1884_v56  ;;  %v772_v32 = vmul.f32 %v1970_v28, %v771_v58  ;;  %v810_v27 = vmul.f32 %v1972_v23, %v2778_v8  ;;  %v1890_v53 = vclamps-f32 %v743_v44, 1.0 }
 0x138   :  { %v626_v51 = vmul.f32 %v2814_v14, %v2814_v14  ;;  %v848_v34 = vadd.f32 1.0, %v847_v15  ;;  %vm815_vm5 = vweird.f32 %v1972_v23  ;;  %v524_v7 = vadd.f32 0.112945676, %v523_v16 }
 0x139   :  { %v2828_v11 = vmul.f32 %v872_v3, %v2538_v13  ;;  %v773_v50 = vadd.f32 %v1970_v28, %v772_v32  ;;  %v811_v61 = vsub.f32 1.0, %v810_v27  ;;  %v878_v39 = vadd.f32 1.0, %v1890_v53  ;;  %vm2842_vm6 = vmor %vm814_vm2, %vm815_vm5 }
 0x13a   :  { %v2832_v52 = vmin.f32 %v626_v51, 16.0  ;;  %1973 = vrcp.f32 %v848_v34  ;;  %v563_v13 = vmul.f32 %v562_v26, %v2654_v63  ;;  %v821_v12 = vor.u32 1.1754944e-38, %v820_v4 }
 0x13b   :  { %910 = vadd.xlane.f32.xlu1 %v2828_v11  ;;  %v777_v37 = vsel %vm2820_vm4, %v1970_v28, %v773_v50  ;;  %v812_v21 = vmul.f32 %v1972_v23, %v811_v61  ;;  %v2113_v28 = vld [vmem:[%s3462_s2] ss:$0 sm:$0xff]  ;;  %v592_v10 = vmul.f32 %v2781_v19, %v2717_v36  ;;  %vm819_vm7 = vcmp.eq.f32.partialorder %v818_v2, 8.507059e+37 }
 0x13c   :  { %v782_v48 = vsel %vm2796_vm1, %v781_v40, %v777_v37  ;;  %v628_v5 = vmul.f32 2.1237322e-06, %v2832_v52  ;;  %v2850_v29 = vadd.f32 %v2113_v28, %v179_v55  ;;  %v2856_v8 = vmul.f32 %v878_v39, %v2541_v43 }
 0x13d   :  { %v783_v41 = vmul.f32 %v782_v48, %v2736_v33  ;;  %v813_v40 = vadd.f32 %v1972_v23, %v812_v21  ;;  %v599_v58 = vmul.f32 3.8918573e-05, %v2717_v36  ;;  %v525_v16 = vmul.f32 %v524_v7, %v2601_v49 }
 0x13e   :  { %v629_v56 = vadd.f32 0.00028619796, %v628_v5  ;;  %v2859_v59 = vmul.f32 0.70710677, %v2850_v29  ;;  %v564_v19 = vadd.f32 0.112945676, %v563_v13  ;;  %vm854_vm8 = vweird.f32 %v848_v34 }
 0x13f   :  { %v1891_v44 = vclamps-f32 %v783_v41, 1.0  ;;  %v817_v15 = vsel %vm2842_vm6, %v1972_v23, %v813_v40  ;;  %v858_v32 = vand.u32 2147483647, %v848_v34  ;;  %v555_v27 = vadd.f32 0.18741608, %v554_v20 }
 0x140   :  { %v1974_v3 = vpop.eup %1973  ;;  %v822_v33 = vsel %vm819_vm7, %v821_v12, %v817_v15  ;;  %v630_v2 = vmul.f32 %v629_v56, %v2832_v52  ;;  %v666_v43 = vmul.f32 %v2859_v59, %v2859_v59  ;;  %v860_v53 = vand.u32 2147483648, %v848_v34 }
 0x141   :  { %v850_v26 = vmul.f32 %v1974_v3, %v848_v34  ;;  %v879_v38 = vadd.f32 1.0, %v1891_v44  ;;  %v823_v4 = vmul.f32 %v822_v33, %v2746_v17  ;;  %vm855_vm9 = vweird.f32 %v1974_v3 }
 0x142   :  { %v526_v23 = vadd.f32 0.4994258, %v525_v16  ;;  %v631_v51 = vadd.f32 0.0036580483, %v630_v2  ;;  %v2870_v61 = vmin.f32 %v666_v43, 16.0  ;;  %v565_v39 = vmul.f32 %v564_v19, %v2654_v63  ;;  %vm2885_vm11 = vmor %vm854_vm8, %vm855_vm9 }
 0x143   :  { %922 = vadd.xlane.f32.xlu1 %v2856_v8  ;;  %v851_v50 = vsub.f32 1.0, %v850_v26  ;;  %v593_v37 = vadd.f32 0.05243302, %v592_v10  ;;  %vm2873_vm10 = vcmp.eq.f32.partialorder %v858_v32, 8.507059e+37  ;;  %v600_v55 = vadd.f32 0.001143296, %v599_v58 }
 0x144   :  { %v527_v20 = vmul.f32 %v526_v23, %v2601_v49  ;;  %v668_v17 = vmul.f32 2.1237322e-06, %v2870_v61  ;;  %v566_v13 = vadd.f32 0.4994258, %v565_v39  ;;  %v639_v48 = vmul.f32 3.8918573e-05, %v2832_v52 }
 0x145   :  { %v852_v7 = vmul.f32 %v1974_v3, %v851_v50  ;;  %v2881_v42 = vmul.f32 %v879_v38, %v2544_v35  ;;  %v861_v5 = vor.u32 1.1754944e-38, %v860_v53  ;;  %v601_v49 = vmul.f32 %v600_v55, %v2717_v36 }
 0x146   :  { %v528_v28 = vadd.f32 1.0, %v527_v20  ;;  %v1892_v10 = vclamps-f32 %v823_v4, 1.0  ;;  %v632_v41 = vmul.f32 %v631_v51, %v2832_v52  ;;  %v567_v56 = vmul.f32 %v566_v13, %v2654_v63 }
 0x147   :  { %v853_v40 = vadd.f32 %v1974_v3, %v852_v7  ;;  %v208_v58 = vmul.f32 0.5, %v2510_v54  ;;  %v517_v35 = vadd.f32 1.1283791, %v2753_v60  ;;  %v946_v44 = vlaneseq }
 0x148   :  { %1975 = vrcp.f32 %v528_v28  ;;  %v669_v15 = vadd.f32 0.00028619796, %v668_v17  ;;  %v2896_v16 = vadd.f32 1.0, %v567_v56  ;;  %v640_v19 = vadd.f32 0.001143296, %v639_v48 }
 0x149   :  { %v857_v34 = vsel %vm2885_vm11, %v1974_v3, %v853_v40  ;;  %v556_v33 = vmul.f32 %v555_v27, %v2654_v63  ;;  %v594_v2 = vmul.f32 %v593_v37, %v2717_v36  ;;  %v602_v43 = vadd.f32 0.014752088, %v601_v49 }
 0x14a   :  { %v862_v32 = vsel %vm2873_vm10, %v861_v5, %v857_v34  ;;  %v880_v54 = vadd.f32 1.0, %v1892_v10  ;;  %v633_v60 = vadd.f32 0.05243302, %v632_v41  ;;  %1977 = vrcp.f32 %v2896_v16 }
 0x14b   :  { %924 = vadd.xlane.f32.xlu1 %v2881_v42  ;;  %v863_v26 = vmul.f32 %v862_v32, %v2750_v45  ;;  %v2905_v3 = vand.u32 127, %v946_v44  ;;  %v209_v53 = vmul.f32 0.5, %v2558_v31  ;;  %v670_v63 = vmul.f32 %v669_v15, %v2870_v61 }
 0x14c   :  { %v603_v27 = vmul.f32 %v602_v43, %v2717_v36  ;;  %v641_v38 = vmul.f32 %v640_v19, %v2832_v52  ;;  %v518_v23 = vmul.f32 %v517_v35, %v2576_v9  ;;  %v557_v51 = vadd.f32 1.1283791, %v556_v33 }
 0x14d   :  { %v1893_v50 = vclamps-f32 %v863_v26, 1.0  ;;  %v540_v39 = vand.u32 2147483648, %v528_v28  ;;  %v595_v37 = vadd.f32 0.18741608, %v594_v2  ;;  %v2912_v45 = vmul.f32 %v880_v54, %v208_v58 }
 0x14e   :  { %v1976_v4 = vpop.eup %1975  ;;  %v634_v21 = vmul.f32 %v633_v60, %v2832_v52  ;;  %vm948_vm12 = vcmp.lt.s32.totalorder %v2905_v3, 32  ;;  %vm534_vm13 = vweird.f32 %v528_v28  ;;  %v538_v31 = vand.u32 2147483647, %v528_v28 }
 0x14f   :  { %v530_v20 = vmul.f32 %v1976_v4, %v528_v28  ;;  %v604_v55 = vadd.f32 0.112945676, %v603_v27  ;;  %v642_v7 = vadd.f32 0.014752088, %v641_v38  ;;  %v671_v13 = vadd.f32 0.0036580483, %v670_v63 }
 0x150   :  { %v1978_v17 = vpop.eup %1977  ;;  %vm535_vm14 = vweird.f32 %v1976_v4  ;;  %v679_v9 = vmul.f32 3.8918573e-05, %v2870_v61  ;;  %v881_v12 = vadd.f32 1.0, %v1893_v50  ;;  %v541_v5 = vor.u32 1.1754944e-38, %v540_v39 }
 0x151   :  { %v531_v48 = vsub.f32 1.0, %v530_v20  ;;  %v570_v49 = vmul.f32 %v1978_v17, %v2896_v16  ;;  %v605_v10 = vmul.f32 %v604_v55, %v2717_v36  ;;  %vm574_vm15 = vweird.f32 %v2896_v16  ;;  %vm2923_vm0 = vmor %vm534_vm13, %vm535_vm14 }
 0x152   :  { %v643_v40 = vmul.f32 %v642_v7, %v2832_v52  ;;  %v680_v56 = vadd.f32 0.001143296, %v679_v9  ;;  %vm575_vm1 = vweird.f32 %v1978_v17  ;;  %v580_v44 = vand.u32 2147483648, %v2896_v16 }
 0x153   :  { %926 = vadd.xlane.f32.xlu1 %v2912_v45  ;;  %v532_v41 = vmul.f32 %v1976_v4, %v531_v48  ;;  %v571_v35 = vsub.f32 1.0, %v570_v49  ;;  %v606_v34 = vadd.f32 0.4994258, %v605_v10  ;;  %vm539_vm2 = vcmp.eq.f32.partialorder %v538_v31, 8.507059e+37  ;;  %vm2937_vm3 = vmor %vm574_vm15, %vm575_vm1 }
 0x154   :  { %v644_v19 = vadd.f32 0.112945676, %v643_v40  ;;  %v681_v33 = vmul.f32 %v680_v56, %v2870_v61  ;;  %v2929_v2 = vmul.f32 %v881_v12, %v209_v53  ;;  %v578_v28 = vand.u32 2147483647, %v2896_v16 }
 0x155   :  { %v533_v15 = vadd.f32 %v1976_v4, %v532_v41  ;;  %v572_v43 = vmul.f32 %v1978_v17, %v571_v35  ;;  %v607_v54 = vmul.f32 %v606_v34, %v2717_v36  ;;  %v581_v39 = vor.u32 1.1754944e-38, %v580_v44 }
 0x156   :  { %v645_v27 = vmul.f32 %v644_v19, %v2832_v52  ;;  %v682_v53 = vadd.f32 0.014752088, %v681_v33  ;;  %vm579_vm4 = vcmp.eq.f32.partialorder %v578_v28, 8.507059e+37  ;;  %v558_v12 = vmul.f32 %v557_v51, %v2622_v30 }
 0x157   :  { %v537_v26 = vsel %vm2923_vm0, %v1976_v4, %v533_v15  ;;  %v573_v50 = vadd.f32 %v1978_v17, %v572_v43  ;;  %v608_v20 = vadd.f32 1.0, %v607_v54  ;;  %v672_v4 = vmul.f32 %v671_v13, %v2870_v61 }
 0x158   :  { %v542_v38 = vsel %vm539_vm2, %v541_v5, %v537_v26  ;;  %v646_v7 = vadd.f32 0.4994258, %v645_v27  ;;  %v683_v48 = vmul.f32 %v682_v53, %v2870_v61  ;;  %v596_v13 = vmul.f32 %v595_v37, %v2717_v36 }
 0x159   :  { %v543_v55 = vmul.f32 %v542_v38, %v518_v23  ;;  %v577_v16 = vsel %vm2937_vm3, %v1978_v17, %v573_v50  ;;  %1979 = vrcp.f32 %v608_v20  ;;  %v635_v49 = vadd.f32 0.18741608, %v634_v21 }
 0x15a   :  { %v647_v5 = vmul.f32 %v646_v7, %v2832_v52  ;;  %v582_v17 = vsel %vm579_vm4, %v581_v39, %v577_v16  ;;  %v684_v10 = vadd.f32 0.112945676, %v683_v48  ;;  %v673_v41 = vadd.f32 0.05243302, %v672_v4 }
 0x15b   :  { %v899_v32 = vpop.xlane.xlu0 %898  ;;  %928 = vadd.xlane.f32.xlu1 %v2929_v2  ;;  %v1885_v23 = vclamps-f32 %v543_v55, 1.0  ;;  %v201_v35 = vmul.f32 0.5, %v2561_v22  ;;  %v583_v51 = vmul.f32 %v582_v17, %v558_v12  ;;  %v597_v44 = vadd.f32 1.1283791, %v596_v13 }
 0x15c   :  { %v930_v60 = vmul.f32 0.03125, %v899_v32  ;;  %v648_v40 = vadd.f32 1.0, %v647_v5  ;;  %v685_v56 = vmul.f32 %v684_v10, %v2870_v61  ;;  %v636_v34 = vmul.f32 %v635_v49, %v2832_v52 }
 0x15d   :  { %v873_v30 = vadd.f32 1.0, %v1885_v23  ;;  %v674_v37 = vmul.f32 %v673_v41, %v2870_v61  ;;  %vm614_vm5 = vweird.f32 %v608_v20  ;;  %v620_v33 = vand.u32 2147483648, %v608_v20 }
 0x15e   :  { %v949_v31 = vsub.f32 %v2472_v62, %v930_v60  ;;  %1981 = vrcp.f32 %v648_v40  ;;  %v686_v36 = vadd.f32 0.4994258, %v685_v56  ;;  %v618_v43 = vand.u32 2147483647, %v608_v20 }
 0x15f   :  { %v1980_v58 = vpop.eup %1979  ;;  %v2963_v54 = vmul.f32 %v873_v30, %v201_v35  ;;  %v1886_v60 = vclamps-f32 %v583_v51, 1.0  ;;  %v202_v52 = vmul.f32 0.5, %v2615_v6  ;;  %v598_v26 = vmul.f32 %v597_v44, %v2692_v18 }
 0x160   :  { %v2950_v9 = vsel %vm948_vm12, %v949_v31, 0.0  ;;  %v610_v19 = vmul.f32 %v1980_v58, %v608_v20  ;;  %vm615_vm6 = vweird.f32 %v1980_v58  ;;  %v687_v28 = vmul.f32 %v686_v36, %v2870_v61 }
 0x161   :  { %v981_v62 = vmul.f32 %v2950_v9, %v2950_v9  ;;  %v637_v38 = vadd.f32 1.1283791, %v636_v34  ;;  %v675_v50 = vadd.f32 0.18741608, %v674_v37  ;;  %vm2974_vm7 = vmor %vm614_vm5, %vm615_vm6  ;;  %v621_v6 = vor.u32 1.1754944e-38, %v620_v33 }
 0x162   :  { %v611_v32 = vsub.f32 1.0, %v610_v19  ;;  %v688_v27 = vadd.f32 1.0, %v687_v28  ;;  %vm619_vm8 = vcmp.eq.f32.partialorder %v618_v43, 8.507059e+37  ;;  %v874_v7 = vadd.f32 1.0, %v1886_v60 }
 0x163   :  { %997 = vadd.xlane.f32.xlu0 %v981_v62  ;;  %vm654_vm9 = vweird.f32 %v648_v40  ;;  %v660_v48 = vand.u32 2147483648, %v648_v40  ;;  %v658_v16 = vand.u32 2147483647, %v648_v40  ;;  %v676_v62 = vmul.f32 %v675_v50, %v2870_v61 }
 0x164   :  { %v901_v15 = vpop.xlane.xlu0 %900  ;;  %v612_v63 = vmul.f32 %v1980_v58, %v611_v32  ;;  %v1982_v53 = vpop.eup %1981  ;;  %1983 = vrcp.f32 %v688_v27  ;;  %v2983_v13 = vmul.f32 %v874_v7, %v202_v52  ;;  %v638_v17 = vmul.f32 %v637_v38, %v2814_v14 }
 0x165   :  { %v931_v21 = vmul.f32 0.03125, %v901_v15  ;;  %v650_v55 = vmul.f32 %v1982_v53, %v648_v40  ;;  %vm655_vm10 = vweird.f32 %v1982_v53  ;;  %v661_v49 = vor.u32 1.1754944e-38, %v660_v48 }
 0x166   :  { %v613_v31 = vadd.f32 %v1980_v58, %v612_v63  ;;  %vm656_vm11 = vmor %vm654_vm9, %vm655_vm10  ;;  %vm659_vm13 = vcmp.eq.f32.partialorder %v658_v16, 8.507059e+37  ;;  %v677_v40 = vadd.f32 1.1283791, %v676_v62  ;;  %vm694_vm14 = vweird.f32 %v688_v27 }
 0x167   :  { %v950_v22 = vsub.f32 %v2513_v57, %v931_v21  ;;  %v651_v20 = vsub.f32 1.0, %v650_v55  ;;  %v700_v44 = vand.u32 2147483648, %v688_v27  ;;  %v698_v19 = vand.u32 2147483647, %v688_v27 }
 0x168   :  { %v617_v4 = vsel %vm2974_vm7, %v1980_v58, %v613_v31  ;;  %v203_v58 = vmul.f32 0.5, %v2670_v1  ;;  %v678_v33 = vmul.f32 %v677_v40, %v2859_v59  ;;  %v204_v43 = vmul.f32 0.5, %v2808_v0 }
 0x169   :  { %v2970_v39 = vsel %vm948_vm12, %v950_v22, 0.0  ;;  %v622_v12 = vsel %vm619_vm8, %v621_v6, %v617_v4  ;;  %v652_v5 = vmul.f32 %v1982_v53, %v651_v20  ;;  %v701_v21 = vor.u32 1.1754944e-38, %v700_v44  ;;  %v1247_v44 = vld [vmem:[#allocation7 + $0x50] sm:$0xff] }
 0x16a   :  { %v982_v18 = vmul.f32 %v2970_v39, %v2970_v39  ;;  %v623_v23 = vmul.f32 %v622_v12, %v598_v26  ;;  %v1984_v56 = vpop.eup %1983  ;;  %vm699_vm1 = vcmp.eq.f32.partialorder %v698_v19, 8.507059e+37  ;;  %v205_v59 = vmul.f32 0.5, %v2850_v29  ;;  %v1243_v19 = vld [vmem:[#allocation7 + $0x30] sm:$0xff] }
 0x16b   :  { %912 = vadd.xlane.f32.xlu0 %v2963_v54  ;;  %v653_v41 = vadd.f32 %v1982_v53, %v652_v5  ;;  %v690_v30 = vmul.f32 %v1984_v56, %v688_v27  ;;  %vm695_vm15 = vweird.f32 %v1984_v56 }
 0x16c   :  { %999 = vadd.xlane.f32.xlu2 %v982_v18  ;;  %v1887_v10 = vclamps-f32 %v623_v23, 1.0  ;;  %vm696_vm0 = vmor %vm694_vm14, %vm695_vm15 }
 0x16d   :  { %v657_v35 = vsel %vm656_vm11, %v1982_v53, %v653_v41  ;;  %v691_v15 = vsub.f32 1.0, %v690_v30 }
 0x16e   :  { %v875_v61 = vadd.f32 1.0, %v1887_v10  ;;  %v662_v51 = vsel %vm659_vm13, %v661_v49, %v657_v35  ;;  %v1251_v10 = vld [vmem:[#allocation7 + $0x70] sm:$0xff] }
 0x16f   :  { %v663_v34 = vmul.f32 %v662_v51, %v638_v17  ;;  %v692_v14 = vmul.f32 %v1984_v56, %v691_v15  ;;  %v1252_v17 = vld [vmem:[#allocation7 + $0x78] sm:$0xff]  ;;  %v1245_v15 = vld [vmem:[#allocation7 + $0x40] sm:$0xff] }
 0x170   :  { %v2988_v36 = vmul.f32 %v875_v61, %v203_v58  ;;  %1257 = vmatpush.msra.mxu1 %v1252_v17  ;;  %1910 = vmatpush.msrb.mxu3 %v1252_v17  ;;  %v1249_v58 = vld [vmem:[#allocation7 + $0x60] sm:$0xff]  ;;  %v1248_v51 = vld [vmem:[#allocation7 + $0x58] sm:$0xff] }
 0x171   :  { %v1888_v37 = vclamps-f32 %v663_v34, 1.0  ;;  %v693_v1 = vadd.f32 %v1984_v56, %v692_v14  ;;  %v1246_v34 = vld [vmem:[#allocation7 + $0x48] sm:$0xff] }
 0x172   :  { %1258 = vmatpush.msra.mxu1 %v1251_v10  ;;  %1911 = vmatpush.msrb.mxu3 %v1251_v10  ;;  %v1242_v14 = vld [vmem:[#allocation7 + $0x28] sm:$0xff] }
 0x173   :  { %914 = vadd.xlane.f32.xlu0 %v2983_v13  ;;  %v697_v32 = vsel %vm696_vm0, %v1984_v56, %v693_v1  ;;  %v876_v28 = vadd.f32 1.0, %v1888_v37 }
 0x174   :  { %v702_v22 = vsel %vm699_vm1, %v701_v21, %v697_v32 }
 0x175   :  { %v703_v60 = vmul.f32 %v702_v22, %v678_v33  ;;  %v2993_v26 = vmul.f32 %v876_v28, %v204_v43  ;;  %v1241_v33 = vld [vmem:[#allocation7 + $0x20] sm:$0xff] }
 0x177   :  { %v1889_v63 = vclamps-f32 %v703_v60, 1.0 }
 0x179   :  { %v877_v38 = vadd.f32 1.0, %v1889_v63 }
 0x17b   :  { %916 = vadd.xlane.f32.xlu0 %v2988_v36  ;;  %v3004_v57 = vmul.f32 %v877_v38, %v205_v59 }
 0x17c   :  { %v903_v52 = vpop.xlane.xlu1 %902 }
 0x17d   :  { %v932_v27 = vmul.f32 0.03125, %v903_v52 }
 0x17f   :  { %v951_v53 = vsub.f32 %v2634_v47, %v932_v27 }
 0x181   :  { %v3000_v50 = vsel %vm948_vm12, %v951_v53, 0.0 }
 0x182   :  { %v983_v0 = vmul.f32 %v3000_v50, %v3000_v50 }
 0x183   :  { %918 = vadd.xlane.f32.xlu0 %v2993_v26 }
 0x184   :  { %1001 = vadd.xlane.f32.xlu2 %v983_v0 }
 0x186   :  { %v905_v6 = vpop.xlane.xlu1 %904 }
 0x187   :  { %v933_v18 = vmul.f32 0.03125, %v905_v6 }
 0x189   :  { %v952_v31 = vsub.f32 %v2665_v46, %v933_v18 }
 0x18b   :  { %920 = vadd.xlane.f32.xlu0 %v3004_v57  ;;  %v3010_v47 = vsel %vm948_vm12, %v952_v31, 0.0 }
 0x18c   :  { %v984_v29 = vmul.f32 %v3010_v47, %v3010_v47 }
 0x18e   :  { %1003 = vadd.xlane.f32.xlu2 %v984_v29 }
 0x194   :  { %v907_v55 = vpop.xlane.xlu2 %906 }
 0x195   :  { %v934_v7 = vmul.f32 0.03125, %v907_v55  ;;  %v1240_v55 = vld [vmem:[#allocation7 + $0x18] sm:$0xff] }
 0x197   :  { %v953_v48 = vsub.f32 %v2721_v25, %v934_v7  ;;  %v1239_v7 = vld [vmem:[#allocation7 + $0x10] sm:$0xff] }
 0x199   :  { %v3017_v4 = vsel %vm948_vm12, %v953_v48, 0.0 }
 0x19a   :  { %v985_v20 = vmul.f32 %v3017_v4, %v3017_v4 }
 0x19c   :  { %v909_v46 = vpop.xlane.xlu2 %908  ;;  %1005 = vadd.xlane.f32.xlu2 %v985_v20 }
 0x19d   :  { %v935_v16 = vmul.f32 0.03125, %v909_v46 }
 0x19f   :  { %v954_v12 = vsub.f32 %v2759_v24, %v935_v16  ;;  %v1250_v24 = vld [vmem:[#allocation7 + $0x68] sm:$0xff] }
 0x1a0   :  { %1259 = vmatpush.msra.mxu1 %v1250_v24  ;;  %1912 = vmatpush.msrb.mxu3 %v1250_v24  ;;  %v1238_v16 = vld [vmem:[#allocation7 + $0x8] sm:$0xff] }
 0x1a1   :  { %v3024_v62 = vsel %vm948_vm12, %v954_v12, 0.0 }
 0x1a2   :  { %v986_v23 = vmul.f32 %v3024_v62, %v3024_v62  ;;  %1260 = vmatpush.msra.mxu1 %v1249_v58  ;;  %1913 = vmatpush.msrb.mxu3 %v1249_v58 }
 0x1a4   :  { %1007 = vadd.xlane.f32.xlu2 %v986_v23  ;;  %1261 = vmatpush.msra.mxu1 %v1248_v51 }
 0x1a5   :  { %1914 = vmatpush.msrb.mxu3 %v1248_v51 }
 0x1a6   :  { %1262 = vmatpush.msra.mxu1 %v1247_v44 }
 0x1a7   :  { %1915 = vmatpush.msrb.mxu3 %v1247_v44 }
 0x1a8   :  { %1263 = vmatpush.msra.mxu1 %v1246_v34 }
 0x1a9   :  { %1916 = vmatpush.msrb.mxu3 %v1246_v34 }
 0x1aa   :  { %1264 = vmatpush.msra.mxu1 %v1245_v15 }
 0x1ab   :  { %1917 = vmatpush.msrb.mxu3 %v1245_v15 }
 0x1ae   :  { %v911_v25 = vpop.xlane.xlu1 %910 }
 0x1af   :  { %v936_v5 = vmul.f32 0.03125, %v911_v25  ;;  %v1237_v25 = vld [vmem:[#allocation7] sm:$0xff] }
 0x1b1   :  { %v955_v49 = vsub.f32 %v2828_v11, %v936_v5 }
 0x1b3   :  { %v3031_v41 = vsel %vm948_vm12, %v955_v49, 0.0 }
 0x1b4   :  { %v987_v56 = vmul.f32 %v3031_v41, %v3031_v41 }
 0x1b6   :  { %1009 = vadd.xlane.f32.xlu1 %v987_v56  ;;  %v923_v40 = vpop.xlane.xlu1 %922 }
 0x1b7   :  { %v942_v35 = vmul.f32 0.03125, %v923_v40 }
 0x1b9   :  { %v961_v11 = vsub.f32 %v2856_v8, %v942_v35  ;;  %v1244_v8 = vld [vmem:[#allocation7 + $0x38] sm:$0xff] }
 0x1ba   :  { %1265 = vmatpush.msra.mxu1 %v1244_v8  ;;  %1918 = vmatpush.msrb.mxu3 %v1244_v8 }
 0x1bb   :  { %v3038_v30 = vsel %vm948_vm12, %v961_v11, 0.0 }
 0x1bc   :  { %v993_v61 = vmul.f32 %v3038_v30, %v3038_v30  ;;  %1266 = vmatpush.msra.mxu1 %v1243_v19  ;;  %1919 = vmatpush.msrb.mxu3 %v1243_v19 }
 0x1be   :  { %1021 = vadd.xlane.f32.xlu0 %v993_v61  ;;  %1267 = vmatpush.msra.mxu1 %v1242_v14  ;;  %v925_v52 = vpop.xlane.xlu1 %924 }
 0x1bf   :  { %1920 = vmatpush.msrb.mxu3 %v1242_v14  ;;  %v943_v0 = vmul.f32 0.03125, %v925_v52 }
 0x1c0   :  { %1268 = vmatpush.msra.mxu1 %v1241_v33 }
 0x1c1   :  { %1921 = vmatpush.msrb.mxu3 %v1241_v33 }
 0x1c2   :  { %1269 = vmatpush.msra.mxu1 %v1240_v55 }
 0x1c3   :  { %1922 = vmatpush.msrb.mxu3 %v1240_v55 }
 0x1c4   :  { %1270 = vmatpush.msra.mxu1 %v1239_v7 }
 0x1c5   :  { %1923 = vmatpush.msrb.mxu3 %v1239_v7 }
 0x1c6   :  { %v927_v46 = vpop.xlane.xlu1 %926  ;;  %1271 = vmatpush.msra.mxu1 %v1238_v16 }
 0x1c7   :  { %1924 = vmatpush.msrb.mxu3 %v1238_v16  ;;  %v944_v17 = vmul.f32 0.03125, %v927_v46 }
 0x1c8   :  { %1272 = vmatpush.msra.mxu1 %v1237_v25 }
 0x1c9   :  { %1925 = vmatpush.msrb.mxu3 %v1237_v25  ;;  %v963_v35 = vsub.f32 %v2912_v45, %v944_v17 }
 0x1cb   :  { %v3077_v14 = vsel %vm948_vm12, %v963_v35, 0.0 }
 0x1ce   :  { %v929_v51 = vpop.xlane.xlu1 %928 }
 0x1cf   :  { %v945_v8 = vmul.f32 0.03125, %v929_v51 }
 0x1d6   :  { %v998_v37 = vpop.xlane.xlu0 %997 }
 0x1d7   :  { %v1029_v21 = vmul.f32 0.03125, %v998_v37 }
 0x1d9   :  { %v1045_v1 = vadd.f32 1e-06, %v1029_v21 }
 0x1db   :  { %1985 = vrsqrt.f32 %v1045_v1  ;;  %vm1067_vm3 = vweird.f32 %v1045_v1 }
 0x1de   :  { %v913_v22 = vpop.xlane.xlu0 %912 }
 0x1df   :  { %v1000_v32 = vpop.xlane.xlu2 %999  ;;  %v937_v27 = vmul.f32 0.03125, %v913_v22 }
 0x1e0   :  { %v1030_v43 = vmul.f32 0.03125, %v1000_v32 }
 0x1e1   :  { %v1986_v28 = vpop.eup %1985  ;;  %v956_v59 = vsub.f32 %v2963_v54, %v937_v27  ;;  %v962_v54 = vsub.f32 %v2881_v42, %v943_v0 }
 0x1e2   :  { %v3042_v60 = vadd.f32 1e-06, %v1030_v43  ;;  %v1062_v63 = vmul.f32 %v1986_v28, %v1045_v1  ;;  %vm1068_vm2 = vweird.f32 %v1986_v28  ;;  %v964_v1 = vsub.f32 %v2929_v2, %v945_v8 }
 0x1e3   :  { %v3052_v31 = vsel %vm948_vm12, %v956_v59, 0.0  ;;  %v3061_v49 = vsel %vm948_vm12, %v962_v54, 0.0  ;;  %vm1069_vm4 = vmor %vm1067_vm3, %vm1068_vm2 }
 0x1e4   :  { %1987 = vrsqrt.f32 %v3042_v60  ;;  %v1063_v53 = vmul.f32 %v1986_v28, %v1062_v63  ;;  %v988_v48 = vmul.f32 %v3052_v31, %v3052_v31  ;;  %v994_v24 = vmul.f32 %v3061_v49, %v3061_v49 }
 0x1e5   :  { %vm1077_vm6 = vweird.f32 %v3042_v60 }
 0x1e6   :  { %v1064_v6 = vmul.f32 0.5, %v1063_v53  ;;  %v915_v29 = vpop.xlane.xlu0 %914  ;;  %1011 = vadd.xlane.f32.xlu2 %v988_v48 }
 0x1e7   :  { %v938_v20 = vmul.f32 0.03125, %v915_v29 }
 0x1e8   :  { %v1065_v12 = vsub.f32 1.5, %v1064_v6 }
 0x1e9   :  { %v957_v5 = vsub.f32 %v2983_v13, %v938_v20 }
 0x1ea   :  { %v3046_v38 = vpop.eup %1987  ;;  %v1066_v10 = vmul.f32 %v1986_v28, %v1065_v12 }
 0x1eb   :  { %v1072_v18 = vmul.f32 %v3046_v38, %v3042_v60  ;;  %v3067_v56 = vsel %vm948_vm12, %v957_v5, 0.0  ;;  %vm1078_vm5 = vweird.f32 %v3046_v38  ;;  %v3095_v60 = vsel %vm948_vm12, %v964_v1, 0.0  ;;  %v1336_v1 = vld [vmem:[#allocation8 + $0x70] sm:$0xff] }
 0x1ec   :  { %v989_v13 = vmul.f32 %v3067_v56, %v3067_v56  ;;  %v1070_v40 = vsel %vm1069_vm4, %v1986_v28, %v1066_v10  ;;  %vm1079_vm7 = vmor %vm1077_vm6, %vm1078_vm5 }
 0x1ed   :  { %v1073_v23 = vmul.f32 %v3046_v38, %v1072_v18  ;;  %v1221_v61 = vmul.f32 %v1070_v40, %v2950_v9 }
 0x1ee   :  { %v917_v58 = vpop.xlane.xlu0 %916  ;;  %1023 = vadd.xlane.f32.xlu2 %v994_v24  ;;  %1013 = vadd.xlane.f32.xlu1 %v989_v13 }
 0x1ef   :  { %v1074_v42 = vmul.f32 0.5, %v1073_v23  ;;  %v939_v11 = vmul.f32 0.03125, %v917_v58  ;;  %1273 = vmatmul.f32.vlgmr.msra.gmra.mxu1 %v1221_v61 }
 0x1f1   :  { %v1075_v44 = vsub.f32 1.5, %v1074_v42  ;;  %v958_v34 = vsub.f32 %v2988_v36, %v939_v11  ;;  %v995_v36 = vmul.f32 %v3077_v14, %v3077_v14 }
 0x1f3   :  { %v1076_v45 = vmul.f32 %v3046_v38, %v1075_v44  ;;  %v3083_v37 = vsel %vm948_vm12, %v958_v34, 0.0 }
 0x1f4   :  { %v990_v21 = vmul.f32 %v3083_v37, %v3083_v37 }
 0x1f5   :  { %v1080_v33 = vsel %vm1079_vm7, %v3046_v38, %v1076_v45 }
 0x1f6   :  { %v1222_v32 = vmul.f32 %v1080_v33, %v2970_v39  ;;  %1025 = vadd.xlane.f32.xlu1 %v995_v36  ;;  %1015 = vadd.xlane.f32.xlu0 %v990_v21  ;;  %v919_v43 = vpop.xlane.xlu0 %918  ;;  %v996_v39 = vmul.f32 %v3095_v60, %v3095_v60  ;;  %v1337_v33 = vld [vmem:[#allocation8 + $0x78] sm:$0xff] }
 0x1f7   :  { %v1002_v15 = vpop.xlane.xlu2 %1001  ;;  %v940_v28 = vmul.f32 0.03125, %v919_v43  ;;  %1342 = vmatpush.msra.mxu2 %v1337_v33  ;;  %1926 = vmatpush.msra.mxu3 %v1337_v33 }
 0x1f8   :  { %v1031_v19 = vmul.f32 0.03125, %v1002_v15  ;;  %1276 = vmatmul.f32.gmra.mxu1 %v1222_v32 }
 0x1f9   :  { %v959_v22 = vsub.f32 %v2993_v26, %v940_v28  ;;  %v1335_v28 = vld [vmem:[#allocation8 + $0x68] sm:$0xff]  ;;  %1343 = vmatpush.msra.mxu2 %v1336_v1  ;;  %1927 = vmatpush.msra.mxu3 %v1336_v1 }
 0x1fa   :  { %v1047_v9 = vadd.f32 1e-06, %v1031_v19 }
 0x1fb   :  { %v3099_v2 = vsel %vm948_vm12, %v959_v22, 0.0  ;;  %1344 = vmatpush.msra.mxu2 %v1335_v28  ;;  %1928 = vmatpush.msra.mxu3 %v1335_v28 }
 0x1fc   :  { %1989 = vrsqrt.f32 %v1047_v9  ;;  %v991_v59 = vmul.f32 %v3099_v2, %v3099_v2  ;;  %vm1087_vm9 = vweird.f32 %v1047_v9 }
 0x1fe   :  { %1027 = vadd.xlane.f32.xlu0 %v996_v39  ;;  %1017 = vadd.xlane.f32.xlu2 %v991_v59  ;;  %v921_v0 = vpop.xlane.xlu0 %920 }
 0x1ff   :  { %v941_v6 = vmul.f32 0.03125, %v921_v0 }
 0x201   :  { %v1004_v52 = vpop.xlane.xlu2 %1003  ;;  %v960_v29 = vsub.f32 %v3004_v57, %v941_v6 }
 0x202   :  { %v1990_v63 = vpop.eup %1989  ;;  %v1032_v27 = vmul.f32 0.03125, %v1004_v52  ;;  %v1334_v52 = vld [vmem:[#allocation8 + $0x60] sm:$0xff] }
 0x203   :  { %v1082_v53 = vmul.f32 %v1990_v63, %v1047_v9  ;;  %vm1088_vm8 = vweird.f32 %v1990_v63  ;;  %v3108_v7 = vsel %vm948_vm12, %v960_v29, 0.0  ;;  %1345 = vmatpush.msra.mxu2 %v1334_v52  ;;  %1929 = vmatpush.msra.mxu3 %v1334_v52 }
 0x204   :  { %v1048_v38 = vadd.f32 1e-06, %v1032_v27  ;;  %v992_v20 = vmul.f32 %v3108_v7, %v3108_v7  ;;  %vm1089_vm10 = vmor %vm1087_vm9, %vm1088_vm8 }
 0x205   :  { %v1083_v26 = vmul.f32 %v1990_v63, %v1082_v53 }
 0x206   :  { %1991 = vrsqrt.f32 %v1048_v38  ;;  %1019 = vadd.xlane.f32.xlu1 %v992_v20  ;;  %vm1097_vm11 = vweird.f32 %v1048_v38 }
 0x207   :  { %v1084_v18 = vmul.f32 0.5, %v1083_v26 }
 0x209   :  { %v1085_v55 = vsub.f32 1.5, %v1084_v18 }
 0x20b   :  { %v1086_v48 = vmul.f32 %v1990_v63, %v1085_v55 }
 0x20c   :  { %v1992_v54 = vpop.eup %1991 }
 0x20d   :  { %v1092_v46 = vmul.f32 %v1992_v54, %v1048_v38  ;;  %v1090_v16 = vsel %vm1089_vm10, %v1990_v63, %v1086_v48  ;;  %vm1098_vm12 = vweird.f32 %v1992_v54  ;;  %v1333_v63 = vld [vmem:[#allocation8 + $0x58] sm:$0xff] }
 0x20e   :  { %v1223_v12 = vmul.f32 %v1090_v16, %v3000_v50  ;;  %vm1099_vm13 = vmor %vm1097_vm11, %vm1098_vm12  ;;  %1346 = vmatpush.msra.mxu2 %v1333_v63  ;;  %1930 = vmatpush.msra.mxu3 %v1333_v63 }
 0x20f   :  { %v1093_v23 = vmul.f32 %v1992_v54, %v1092_v46  ;;  %v1006_v57 = vpop.xlane.xlu2 %1005 }
 0x210   :  { %v1033_v25 = vmul.f32 0.03125, %v1006_v57  ;;  %1279 = vmatmul.f32.gmra.mxu1 %v1223_v12  ;;  %v1332_v57 = vld [vmem:[#allocation8 + $0x50] sm:$0xff] }
 0x211   :  { %v1094_v5 = vmul.f32 0.5, %v1093_v23  ;;  %1347 = vmatpush.msra.mxu2 %v1332_v57  ;;  %1931 = vmatpush.msra.mxu3 %v1332_v57 }
 0x212   :  { %v1049_v3 = vadd.f32 1e-06, %v1033_v25  ;;  %v1331_v25 = vld [vmem:[#allocation8 + $0x48] sm:$0xff] }
 0x213   :  { %v1095_v17 = vsub.f32 1.5, %v1094_v5  ;;  %v1330_v5 = vld [vmem:[#allocation8 + $0x40] sm:$0xff]  ;;  %1348 = vmatpush.msra.mxu2 %v1331_v25  ;;  %1932 = vmatpush.msra.mxu3 %v1331_v25 }
 0x214   :  { %1993 = vrsqrt.f32 %v1049_v3  ;;  %vm1107_vm15 = vweird.f32 %v1049_v3 }
 0x215   :  { %v1096_v42 = vmul.f32 %v1992_v54, %v1095_v17  ;;  %1349 = vmatpush.msra.mxu2 %v1330_v5  ;;  %1933 = vmatpush.msra.mxu3 %v1330_v5  ;;  %v1327_v17 = vld [vmem:[#allocation8 + $0x28] sm:$0xff] }
 0x217   :  { %v1008_v10 = vpop.xlane.xlu2 %1007  ;;  %v1100_v24 = vsel %vm1099_vm13, %v1992_v54, %v1096_v42  ;;  %v1326_v42 = vld [vmem:[#allocation8 + $0x20] sm:$0xff] }
 0x218   :  { %v1034_v13 = vmul.f32 0.03125, %v1008_v10  ;;  %v1224_v58 = vmul.f32 %v1100_v24, %v3010_v47 }
 0x21a   :  { %v1994_v40 = vpop.eup %1993  ;;  %v1050_v35 = vadd.f32 1e-06, %v1034_v13  ;;  %1282 = vmatmul.f32.gmra.mxu1 %v1224_v58  ;;  %v1324_v58 = vld [vmem:[#allocation8 + $0x10] sm:$0xff] }
 0x21b   :  { %v1102_v50 = vmul.f32 %v1994_v40, %v1049_v3  ;;  %vm1108_vm14 = vweird.f32 %v1994_v40  ;;  %v1329_v3 = vld [vmem:[#allocation8 + $0x38] sm:$0xff] }
 0x21c   :  { %1995 = vrsqrt.f32 %v1050_v35  ;;  %vm1109_vm0 = vmor %vm1107_vm15, %vm1108_vm14  ;;  %vm1117_vm2 = vweird.f32 %v1050_v35  ;;  %1350 = vmatpush.msra.mxu2 %v1329_v3  ;;  %1934 = vmatpush.msra.mxu3 %v1329_v3 }
 0x21d   :  { %v1103_v11 = vmul.f32 %v1994_v40, %v1102_v50 }
 0x21f   :  { %v1104_v61 = vmul.f32 0.5, %v1103_v11 }
 0x221   :  { %v1105_v51 = vsub.f32 1.5, %v1104_v61 }
 0x222   :  { %v1996_v44 = vpop.eup %1995 }
 0x223   :  { %v1112_v34 = vmul.f32 %v1996_v44, %v1050_v35  ;;  %v1106_v15 = vmul.f32 %v1994_v40, %v1105_v51  ;;  %vm1118_vm1 = vweird.f32 %v1996_v44  ;;  %v1322_v35 = vld [vmem:[#allocation8] sm:$0xff] }
 0x224   :  { %vm1119_vm3 = vmor %vm1117_vm2, %vm1118_vm1 }
 0x225   :  { %v1113_v8 = vmul.f32 %v1996_v44, %v1112_v34  ;;  %v1110_v19 = vsel %vm1109_vm0, %v1994_v40, %v1106_v15  ;;  %v1323_v40 = vld [vmem:[#allocation8 + $0x8] sm:$0xff] }
 0x226   :  { %v1225_v45 = vmul.f32 %v1110_v19, %v3017_v4 }
 0x227   :  { %v1114_v9 = vmul.f32 0.5, %v1113_v8 }
 0x228   :  { %1285 = vmatmul.f32.gmra.mxu1 %v1225_v45 }
 0x229   :  { %v1115_v47 = vsub.f32 1.5, %v1114_v9  ;;  %v1010_v36 = vpop.xlane.xlu1 %1009 }
 0x22a   :  { %v1035_v21 = vmul.f32 0.03125, %v1010_v36  ;;  %v3124_v36 = vld [vmem:[%s3464_s4] ss:$0 sm:$0xff] }
 0x22b   :  { %v1116_v32 = vmul.f32 %v1996_v44, %v1115_v47 }
 0x22c   :  { %v1051_v43 = vadd.f32 1e-06, %v1035_v21 }
 0x22d   :  { %v1120_v22 = vsel %vm1119_vm3, %v1996_v44, %v1116_v32 }
 0x22e   :  { %1997 = vrsqrt.f32 %v1051_v43  ;;  %v1226_v4 = vmul.f32 %v1120_v22, %v3024_v62  ;;  %vm1127_vm5 = vweird.f32 %v1051_v43 }
 0x230   :  { %1288 = vmatmul.f32.gmra.mxu1 %v1226_v4 }
 0x231   :  { %v1022_v27 = vpop.xlane.xlu0 %1021 }
 0x232   :  { %v1041_v53 = vmul.f32 0.03125, %v1022_v27 }
 0x234   :  { %v1998_v39 = vpop.eup %1997  ;;  %v1057_v59 = vadd.f32 1e-06, %v1041_v53 }
 0x235   :  { %v1122_v38 = vmul.f32 %v1998_v39, %v1051_v43  ;;  %vm1128_vm4 = vweird.f32 %v1998_v39 }
 0x236   :  { %1999 = vrsqrt.f32 %v1057_v59  ;;  %vm1129_vm6 = vmor %vm1127_vm5, %vm1128_vm4  ;;  %vm1187_vm8 = vweird.f32 %v1057_v59 }
 0x237   :  { %v1123_v26 = vmul.f32 %v1998_v39, %v1122_v38 }
 0x239   :  { %v1124_v0 = vmul.f32 0.5, %v1123_v26 }
 0x23b   :  { %v1125_v6 = vsub.f32 1.5, %v1124_v0 }
 0x23c   :  { %v2000_v62 = vpop.eup %1999 }
 0x23d   :  { %v1182_v18 = vmul.f32 %v2000_v62, %v1057_v59  ;;  %v1126_v29 = vmul.f32 %v1998_v39, %v1125_v6  ;;  %vm1188_vm7 = vweird.f32 %v2000_v62 }
 0x23e   :  { %vm1189_vm9 = vmor %vm1187_vm8, %vm1188_vm7 }
 0x23f   :  { %v1183_v55 = vmul.f32 %v2000_v62, %v1182_v18  ;;  %v1130_v48 = vsel %vm1129_vm6, %v1998_v39, %v1126_v29 }
 0x240   :  { %v1227_v20 = vmul.f32 %v1130_v48, %v3031_v41  ;;  %v1328_v41 = vld [vmem:[#allocation8 + $0x30] sm:$0xff] }
 0x241   :  { %v1184_v54 = vmul.f32 0.5, %v1183_v55  ;;  %1351 = vmatpush.msra.mxu2 %v1328_v41  ;;  %1935 = vmatpush.msra.mxu3 %v1328_v41 }
 0x242   :  { %1291 = vmatmul.f32.gmra.mxu1 %v1227_v20 }
 0x243   :  { %v1185_v46 = vsub.f32 1.5, %v1184_v54  ;;  %1352 = vmatpush.msra.mxu2 %v1327_v17  ;;  %1936 = vmatpush.msra.mxu3 %v1327_v17 }
 0x245   :  { %v1186_v16 = vmul.f32 %v2000_v62, %v1185_v46  ;;  %1353 = vmatpush.msra.mxu2 %v1326_v42  ;;  %1937 = vmatpush.msra.mxu3 %v1326_v42 }
 0x247   :  { %v1190_v12 = vsel %vm1189_vm9, %v2000_v62, %v1186_v16 }
 0x248   :  { %v1233_v23 = vmul.f32 %v1190_v12, %v3038_v30  ;;  %v1325_v30 = vld [vmem:[#allocation8 + $0x18] sm:$0xff] }
 0x249   :  { %1354 = vmatpush.msra.mxu2 %v1325_v30  ;;  %1938 = vmatpush.msra.mxu3 %v1325_v30 }
 0x24a   :  { %1309 = vmatmul.f32.vlgmr.msrb.gmra.mxu3 %v1233_v23 }
 0x24b   :  { %1355 = vmatpush.msra.mxu2 %v1324_v58  ;;  %1939 = vmatpush.msra.mxu3 %v1324_v58 }
 0x24d   :  { %1356 = vmatpush.msra.mxu2 %v1323_v40  ;;  %1940 = vmatpush.msra.mxu3 %v1323_v40 }
 0x24f   :  { %1357 = vmatpush.msra.mxu2 %v1322_v35  ;;  %1941 = vmatpush.msra.mxu3 %v1322_v35 }
 0x259   :  { %v1012_v10 = vpop.xlane.xlu2 %1011 }
 0x25a   :  { %v1036_v24 = vmul.f32 0.03125, %v1012_v10 }
 0x25c   :  { %v1052_v13 = vadd.f32 1e-06, %v1036_v24 }
 0x25e   :  { %2001 = vrsqrt.f32 %v1052_v13  ;;  %vm1137_vm12 = vweird.f32 %v1052_v13 }
 0x261   :  { %v1024_v50 = vpop.xlane.xlu2 %1023  ;;  %v1014_v61 = vpop.xlane.xlu1 %1013 }
 0x262   :  { %v1042_v11 = vmul.f32 0.03125, %v1024_v50  ;;  %v1037_v51 = vmul.f32 0.03125, %v1014_v61 }
 0x264   :  { %v2002_v44 = vpop.eup %2001  ;;  %v3118_v34 = vadd.f32 1e-06, %v1042_v11  ;;  %v1053_v8 = vadd.f32 1e-06, %v1037_v51 }
 0x265   :  { %v1132_v15 = vmul.f32 %v2002_v44, %v1052_v13  ;;  %vm1138_vm10 = vweird.f32 %v2002_v44 }
 0x266   :  { %2003 = vrsqrt.f32 %v3118_v34  ;;  %vm1139_vm11 = vmor %vm1137_vm12, %vm1138_vm10  ;;  %vm1147_vm15 = vweird.f32 %v1053_v8  ;;  %vm1197_vm0 = vweird.f32 %v3118_v34 }
 0x267   :  { %v1133_v19 = vmul.f32 %v2002_v44, %v1132_v15  ;;  %2005 = vrsqrt.f32 %v1053_v8 }
 0x269   :  { %v1134_v45 = vmul.f32 0.5, %v1133_v19  ;;  %v1026_v9 = vpop.xlane.xlu1 %1025  ;;  %v1016_v47 = vpop.xlane.xlu0 %1015 }
 0x26a   :  { %v1043_v33 = vmul.f32 0.03125, %v1026_v9  ;;  %v1038_v1 = vmul.f32 0.03125, %v1016_v47 }
 0x26b   :  { %v1135_v21 = vsub.f32 1.5, %v1134_v45 }
 0x26c   :  { %v2004_v32 = vpop.eup %2003  ;;  %v3127_v22 = vadd.f32 1e-06, %v1043_v33  ;;  %v3129_v4 = vadd.f32 1e-06, %v1038_v1  ;;  %v1274_v52 = vpop.f32.mrf.mxu1 }
 0x26d   :  { %v2006_v43 = vpop.eup %2005  ;;  %v1192_v28 = vmul.f32 %v2004_v32, %v3118_v34  ;;  %v1136_v63 = vmul.f32 %v2002_v44, %v1135_v21  ;;  %v3132_v53 = vadd.f32 %v3124_v36, %v1274_v52  ;;  %vm1198_vm14 = vweird.f32 %v2004_v32 }
 0x26e   :  { %v1142_v27 = vmul.f32 %v2006_v43, %v1053_v8  ;;  %2007 = vrsqrt.f32 %v3127_v22  ;;  %vm1148_vm13 = vweird.f32 %v2006_v43  ;;  %vm1199_vm2 = vmor %vm1197_vm0, %vm1198_vm14  ;;  %vm1207_vm5 = vweird.f32 %v3127_v22 }
 0x26f   :  { %v1193_v39 = vmul.f32 %v2004_v32, %v1192_v28  ;;  %2009 = vrsqrt.f32 %v3129_v4  ;;  %1358 = vmatmul.f32.vlgmr.msra.gmra.mxu2 %v3132_v53  ;;  %v1583_v38 = vmul.f32 %v3132_v53, %v3132_v53  ;;  %v1140_v26 = vsel %vm1139_vm11, %v2002_v44, %v1136_v63  ;;  %vm1149_vm1 = vmor %vm1147_vm15, %vm1148_vm13 }
 0x270   :  { %v1143_v59 = vmul.f32 %v2006_v43, %v1142_v27  ;;  %v1228_v6 = vmul.f32 %v1140_v26, %v3052_v31  ;;  %vm1157_vm6 = vweird.f32 %v3129_v4 }
 0x271   :  { %v1194_v0 = vmul.f32 0.5, %v1193_v39  ;;  %1599 = vadd.xlane.f32.xlu2 %v1583_v38  ;;  %v1018_v18 = vpop.xlane.xlu2 %1017  ;;  %v1028_v29 = vpop.xlane.xlu0 %1027 }
 0x272   :  { %v1144_v62 = vmul.f32 0.5, %v1143_v59  ;;  %v1039_v48 = vmul.f32 0.03125, %v1018_v18  ;;  %v1044_v20 = vmul.f32 0.03125, %v1028_v29  ;;  %1294 = vmatmul.f32.gmra.mxu1 %v1228_v6 }
 0x273   :  { %v1195_v55 = vsub.f32 1.5, %v1194_v0 }
 0x274   :  { %v1145_v54 = vsub.f32 1.5, %v1144_v62  ;;  %v2008_v46 = vpop.eup %2007  ;;  %v3140_v16 = vadd.f32 1e-06, %v1039_v48  ;;  %v3142_v12 = vadd.f32 1e-06, %v1044_v20 }
 0x275   :  { %v1277_v23 = vpop.f32.mrf.mxu1  ;;  %v1196_v57 = vmul.f32 %v2004_v32, %v1195_v55  ;;  %v2010_v25 = vpop.eup %2009  ;;  %v1202_v31 = vmul.f32 %v2008_v46, %v3127_v22  ;;  %vm1208_vm3 = vweird.f32 %v2008_v46 }
 0x276   :  { %v3146_v5 = vadd.f32 %v3124_v36, %v1277_v23  ;;  %v1146_v3 = vmul.f32 %v2006_v43, %v1145_v54  ;;  %v1152_v41 = vmul.f32 %v2010_v25, %v3129_v4  ;;  %2011 = vrsqrt.f32 %v3140_v16  ;;  %vm1209_vm7 = vmor %vm1207_vm5, %vm1208_vm3 }
 0x277   :  { %v1203_v17 = vmul.f32 %v2008_v46, %v1202_v31  ;;  %2013 = vrsqrt.f32 %v3142_v12  ;;  %v1200_v13 = vsel %vm1199_vm2, %v2004_v32, %v1196_v57  ;;  %vm1158_vm4 = vweird.f32 %v2010_v25 }
 0x278   :  { %1361 = vmatmul.f32.gmra.mxu2 %v3146_v5  ;;  %v1584_v42 = vmul.f32 %v3146_v5, %v3146_v5  ;;  %v1150_v30 = vsel %vm1149_vm1, %v2006_v43, %v1146_v3  ;;  %v1153_v10 = vmul.f32 %v2010_v25, %v1152_v41  ;;  %v1234_v35 = vmul.f32 %v1200_v13, %v3061_v49  ;;  %vm1159_vm8 = vmor %vm1157_vm6, %vm1158_vm4 }
 0x279   :  { %v1229_v24 = vmul.f32 %v1150_v30, %v3067_v56  ;;  %v1204_v58 = vmul.f32 0.5, %v1203_v17  ;;  %v1020_v40 = vpop.xlane.xlu1 %1019  ;;  %vm1167_vm12 = vweird.f32 %v3140_v16  ;;  %vm1217_vm11 = vweird.f32 %v3142_v12 }
 0x27a   :  { %1601 = vadd.xlane.f32.xlu0 %v1584_v42  ;;  %v1154_v50 = vmul.f32 0.5, %v1153_v10  ;;  %v1040_v11 = vmul.f32 0.03125, %v1020_v40  ;;  %1312 = vmatmul.f32.gmra.mxu3 %v1234_v35  ;;  %v3207_v40 = vld [vmem:[%s3466_s6] ss:$0 sm:$0xff]  ;;  %s2274_s6 = smov [#allocation11]  }
 0x27b   :  { %1297 = vmatmul.f32.gmra.mxu1 %v1229_v24  ;;  %v1205_v61 = vsub.f32 1.5, %v1204_v58  ;;  %s1856_s29 = sshll.u32 %s2274_s6, 4  ;;  %s1857_s29 = int_to_ptr.vmem [resolvable:$true] %s1856_s29 }
 0x27c   :  { %v2012_v51 = vpop.eup %2011  ;;  %v1155_v44 = vsub.f32 1.5, %v1154_v50  ;;  %v1056_v34 = vadd.f32 1e-06, %v1040_v11 }
 0x27d   :  { %v2014_v15 = vpop.eup %2013  ;;  %v1162_v56 = vmul.f32 %v2012_v51, %v3140_v16  ;;  %v1206_v8 = vmul.f32 %v2008_v46, %v1205_v61  ;;  %vm1168_vm9 = vweird.f32 %v2012_v51 }
 0x27e   :  { %v1212_v49 = vmul.f32 %v2014_v15, %v3142_v12  ;;  %2015 = vrsqrt.f32 %v1056_v34  ;;  %v1156_v19 = vmul.f32 %v2010_v25, %v1155_v44  ;;  %vm1218_vm10 = vweird.f32 %v2014_v15  ;;  %vm1169_vm13 = vmor %vm1167_vm12, %vm1168_vm9 }
 0x27f   :  { %v1163_v45 = vmul.f32 %v2012_v51, %v1162_v56  ;;  %v1210_v9 = vsel %vm1209_vm7, %v2008_v46, %v1206_v8  ;;  %vm1219_vm14 = vmor %vm1217_vm11, %vm1218_vm10  ;;  %vm1177_vm0 = vweird.f32 %v1056_v34 }
 0x280   :  { %v1213_v47 = vmul.f32 %v2014_v15, %v1212_v49  ;;  %v1160_v21 = vsel %vm1159_vm8, %v2010_v25, %v1156_v19  ;;  %v1235_v33 = vmul.f32 %v1210_v9, %v3077_v14 }
 0x281   :  { %v1164_v1 = vmul.f32 0.5, %v1163_v45  ;;  %v1230_v32 = vmul.f32 %v1160_v21, %v3083_v37 }
 0x282   :  { %v1214_v43 = vmul.f32 0.5, %v1213_v47  ;;  %1315 = vmatmul.f32.gmra.mxu3 %v1235_v33 }
 0x283   :  { %v1165_v28 = vsub.f32 1.5, %v1164_v1  ;;  %1300 = vmatmul.f32.gmra.mxu1 %v1230_v32 }
 0x284   :  { %v2016_v22 = vpop.eup %2015  ;;  %v1215_v4 = vsub.f32 1.5, %v1214_v43 }
 0x285   :  { %v1172_v52 = vmul.f32 %v2016_v22, %v1056_v34  ;;  %v1166_v63 = vmul.f32 %v2012_v51, %v1165_v28  ;;  %vm1178_vm15 = vweird.f32 %v2016_v22 }
 0x286   :  { %v1216_v14 = vmul.f32 %v2014_v15, %v1215_v4  ;;  %vm1179_vm1 = vmor %vm1177_vm0, %vm1178_vm15 }
 0x287   :  { %v1173_v39 = vmul.f32 %v2016_v22, %v1172_v52  ;;  %v1170_v59 = vsel %vm1169_vm13, %v2012_v51, %v1166_v63 }
 0x288   :  { %v1231_v38 = vmul.f32 %v1170_v59, %v3099_v2  ;;  %v1220_v26 = vsel %vm1219_vm14, %v2014_v15, %v1216_v14 }
 0x289   :  { %v1174_v0 = vmul.f32 0.5, %v1173_v39  ;;  %v1236_v62 = vmul.f32 %v1220_v26, %v3095_v60 }
 0x28b   :  { %v1175_v18 = vsub.f32 1.5, %v1174_v0  ;;  %1303 = vmatmul.f32.gmra.mxu1 %v1231_v38  ;;  %1318 = vmatmul.f32.gmra.mxu3 %v1236_v62 }
 0x28d   :  { %v1280_v27 = vpop.f32.mrf.mxu1  ;;  %v1176_v29 = vmul.f32 %v2016_v22, %v1175_v18 }
 0x28e   :  { %v3168_v37 = vadd.f32 %v3124_v36, %v1280_v27 }
 0x28f   :  { %v1180_v55 = vsel %vm1179_vm1, %v2016_v22, %v1176_v29 }
 0x290   :  { %1364 = vmatmul.f32.gmra.mxu2 %v3168_v37  ;;  %v1585_v6 = vmul.f32 %v3168_v37, %v3168_v37  ;;  %v1232_v2 = vmul.f32 %v1180_v55, %v3108_v7 }
 0x292   :  { %1603 = vadd.xlane.f32.xlu1 %v1585_v6 }
 0x293   :  { %1306 = vmatmul.f32.gmra.mxu1 %v1232_v2 }
 0x297   :  { %v1283_v48 = vpop.f32.mrf.mxu1 }
 0x298   :  { %v3177_v20 = vadd.f32 %v3124_v36, %v1283_v48 }
 0x29a   :  { %1367 = vmatmul.f32.gmra.mxu2 %v3177_v20  ;;  %v1586_v60 = vmul.f32 %v3177_v20, %v3177_v20 }
 0x29c   :  { %1605 = vadd.xlane.f32.xlu2 %v1586_v60 }
 0x2a5   :  { %v1286_v54 = vpop.f32.mrf.mxu1 }
 0x2a6   :  { %v3183_v46 = vadd.f32 %v3124_v36, %v1286_v54 }
 0x2a8   :  { %1370 = vmatmul.f32.gmra.mxu2 %v3183_v46  ;;  %v1587_v16 = vmul.f32 %v3183_v46, %v3183_v46 }
 0x2aa   :  { %1607 = vadd.xlane.f32.xlu0 %v1587_v16 }
 0x2ad   :  { %v1289_v7 = vpop.f32.mrf.mxu1 }
 0x2ae   :  { %v3189_v12 = vadd.f32 %v3124_v36, %v1289_v7 }
 0x2b0   :  { %1373 = vmatmul.f32.gmra.mxu2 %v3189_v12  ;;  %v1588_v23 = vmul.f32 %v3189_v12, %v3189_v12 }
 0x2b2   :  { %1609 = vadd.xlane.f32.xlu1 %v1588_v23 }
 0x2bf   :  { %v1292_v57 = vpop.f32.mrf.mxu1 }
 0x2c0   :  { %v3195_v25 = vadd.f32 %v3124_v36, %v1292_v57 }
 0x2c2   :  { %1376 = vmatmul.f32.gmra.mxu2 %v3195_v25  ;;  %v1589_v31 = vmul.f32 %v3195_v25, %v3195_v25 }
 0x2c4   :  { %1611 = vadd.xlane.f32.xlu2 %v1589_v31 }
 0x2cd   :  { %v1310_v3 = vpop.f32.mrf.mxu3 }
 0x2ce   :  { %v3201_v41 = vadd.f32 %v3124_v36, %v1310_v3 }
 0x2d0   :  { %1394 = vmatmul.f32.vlgmr.msra.gmra.mxu3 %v3201_v41 }
 0x2e4   :  { %v1600_v17 = vpop.xlane.xlu2 %1599 }
 0x2e5   :  { %v1631_v42 = vadd.f32 1e-30, %v1600_v17 }
 0x2e7   :  { %2017 = vrsqrt.f32 %v1631_v42  ;;  %vm1653_vm3 = vweird.f32 %v1631_v42 }
 0x2ed   :  { %v1602_v30 = vpop.xlane.xlu0 %1601  ;;  %v2018_v10 = vpop.eup %2017 }
 0x2ee   :  { %v1632_v24 = vadd.f32 1e-30, %v1602_v30  ;;  %v1648_v13 = vmul.f32 %v2018_v10, %v1631_v42  ;;  %vm1654_vm2 = vweird.f32 %v2018_v10 }
 0x2ef   :  { %v1295_v58 = vpop.f32.mrf.mxu1  ;;  %vm1655_vm4 = vmor %vm1653_vm3, %vm1654_vm2 }
 0x2f0   :  { %2019 = vrsqrt.f32 %v1632_v24  ;;  %v1649_v35 = vmul.f32 %v2018_v10, %v1648_v13  ;;  %v3210_v50 = vadd.f32 %v3124_v36, %v1295_v58  ;;  %vm1663_vm6 = vweird.f32 %v1632_v24 }
 0x2f2   :  { %v1650_v11 = vmul.f32 0.5, %v1649_v35  ;;  %v1359_v61 = vpop.f32.mrf.mxu2  ;;  %1379 = vmatmul.f32.gmra.mxu2 %v3210_v50  ;;  %v1590_v51 = vmul.f32 %v3210_v50, %v3210_v50 }
 0x2f3   :  { %v3216_v44 = vadd.f32 %v3207_v40, %v1359_v61 }
 0x2f4   :  { %v1651_v34 = vsub.f32 1.5, %v1650_v11  ;;  %1613 = vadd.xlane.f32.xlu0 %v1590_v51 }
 0x2f5   :  { %1407 = vmax.xlane.f32.xlu2 %v3216_v44 }
 0x2f6   :  { %v2020_v15 = vpop.eup %2019  ;;  %v1652_v56 = vmul.f32 %v2018_v10, %v1651_v34 }
 0x2f7   :  { %v1658_v8 = vmul.f32 %v2020_v15, %v1632_v24  ;;  %vm1664_vm5 = vweird.f32 %v2020_v15 }
 0x2f8   :  { %v1298_v49 = vpop.f32.mrf.mxu1  ;;  %v1656_v19 = vsel %vm1655_vm4, %v2018_v10, %v1652_v56  ;;  %vm1665_vm7 = vmor %vm1663_vm6, %vm1664_vm5 }
 0x2f9   :  { %v1659_v45 = vmul.f32 %v2020_v15, %v1658_v8  ;;  %v3220_v9 = vadd.f32 %v3124_v36, %v1298_v49  ;;  %v1807_v47 = vmul.f32 %v1656_v19, %v3132_v53 }
 0x2fb   :  { %v1660_v21 = vmul.f32 0.5, %v1659_v45  ;;  %v1362_v33 = vpop.f32.mrf.mxu2  ;;  %1382 = vmatmul.f32.gmra.mxu2 %v3220_v9  ;;  %v1591_v1 = vmul.f32 %v3220_v9, %v3220_v9  ;;  %1823 = vst [vmem:[#allocation11] sm:$0xff] %v1807_v47 }
 0x2fc   :  { %v3227_v32 = vadd.f32 %v3207_v40, %v1362_v33 }
 0x2fd   :  { %v1661_v43 = vsub.f32 1.5, %v1660_v21  ;;  %1615 = vadd.xlane.f32.xlu1 %v1591_v1  ;;  %v1313_v53 = vpop.f32.mrf.mxu3 }
 0x2fe   :  { %1409 = vmax.xlane.f32.xlu0 %v3227_v32  ;;  %v3231_v52 = vadd.f32 %v3124_v36, %v1313_v53 }
 0x2ff   :  { %v1662_v28 = vmul.f32 %v2020_v15, %v1661_v43 }
 0x300   :  { %v1301_v27 = vpop.f32.mrf.mxu1  ;;  %1397 = vmatmul.f32.gmra.mxu3 %v3231_v52 }
 0x301   :  { %v1666_v63 = vsel %vm1665_vm7, %v2020_v15, %v1662_v28  ;;  %v3235_v39 = vadd.f32 %v3124_v36, %v1301_v27 }
 0x302   :  { %v1808_v14 = vmul.f32 %v1666_v63, %v3146_v5 }
 0x303   :  { %1385 = vmatmul.f32.gmra.mxu2 %v3235_v39 }
 0x304   :  { %1824 = vst [vmem:[#allocation11 + $0x8] sm:$0xff] %v1808_v14 }
 0x305   :  { %v1604_v22 = vpop.xlane.xlu1 %1603  ;;  %v1316_v59 = vpop.f32.mrf.mxu3 }
 0x306   :  { %v1633_v4 = vadd.f32 1e-30, %v1604_v22  ;;  %v3240_v26 = vadd.f32 %v3124_v36, %v1316_v59 }
 0x308   :  { %2021 = vrsqrt.f32 %v1633_v4  ;;  %v1304_v62 = vpop.f32.mrf.mxu1  ;;  %1400 = vmatmul.f32.gmra.mxu3 %v3240_v26  ;;  %vm1673_vm9 = vweird.f32 %v1633_v4 }
 0x309   :  { %v3243_v5 = vadd.f32 %v3124_v36, %v1304_v62 }
 0x30b   :  { %1388 = vmatmul.f32.gmra.mxu2 %v3243_v5 }
 0x30e   :  { %v2022_v38 = vpop.eup %2021  ;;  %v1319_v54 = vpop.f32.mrf.mxu3 }
 0x30f   :  { %v1668_v0 = vmul.f32 %v2022_v38, %v1633_v4  ;;  %v1606_v6 = vpop.xlane.xlu2 %1605  ;;  %vm1674_vm8 = vweird.f32 %v2022_v38  ;;  %v3252_v7 = vadd.f32 %v3124_v36, %v1319_v54 }
 0x310   :  { %v1634_v18 = vadd.f32 1e-30, %v1606_v6  ;;  %v1307_v23 = vpop.f32.mrf.mxu1  ;;  %vm1675_vm10 = vmor %vm1673_vm9, %vm1674_vm8 }
 0x311   :  { %v1669_v29 = vmul.f32 %v2022_v38, %v1668_v0  ;;  %v3255_v31 = vadd.f32 %v3124_v36, %v1307_v23  ;;  %1403 = vmatmul.f32.gmra.mxu3 %v3252_v7 }
 0x312   :  { %2023 = vrsqrt.f32 %v1634_v18  ;;  %vm1683_vm11 = vweird.f32 %v1634_v18 }
 0x313   :  { %v1670_v55 = vmul.f32 0.5, %v1669_v29  ;;  %v1365_v48 = vpop.f32.mrf.mxu2  ;;  %1391 = vmatmul.f32.gmra.mxu2 %v3255_v31 }
 0x314   :  { %v3248_v2 = vadd.f32 %v3207_v40, %v1365_v48 }
 0x315   :  { %v1671_v60 = vsub.f32 1.5, %v1670_v55 }
 0x316   :  { %1411 = vmax.xlane.f32.xlu1 %v3248_v2 }
 0x317   :  { %v1672_v16 = vmul.f32 %v2022_v38, %v1671_v60 }
 0x318   :  { %v2024_v57 = vpop.eup %2023 }
 0x319   :  { %v1676_v3 = vsel %vm1675_vm10, %v2022_v38, %v1672_v16  ;;  %v1678_v17 = vmul.f32 %v2024_v57, %v1634_v18  ;;  %vm1684_vm12 = vweird.f32 %v2024_v57 }
 0x31a   :  { %v1809_v42 = vmul.f32 %v1676_v3, %v3168_v37  ;;  %vm1685_vm13 = vmor %vm1683_vm11, %vm1684_vm12 }
 0x31b   :  { %v1679_v30 = vmul.f32 %v2024_v57, %v1678_v17 }
 0x31c   :  { %1825 = vst [vmem:[#allocation11 + $0x10] sm:$0xff] %v1809_v42 }
 0x31d   :  { %v1680_v10 = vmul.f32 0.5, %v1679_v30  ;;  %v1608_v24 = vpop.xlane.xlu0 %1607 }
 0x31e   :  { %v1635_v13 = vadd.f32 1e-30, %v1608_v24 }
 0x31f   :  { %v1681_v58 = vsub.f32 1.5, %v1680_v10 }
 0x320   :  { %2025 = vrsqrt.f32 %v1635_v13  ;;  %vm1693_vm15 = vweird.f32 %v1635_v13 }
 0x321   :  { %v1682_v35 = vmul.f32 %v2024_v57, %v1681_v58 }
 0x323   :  { %v1686_v36 = vsel %vm1685_vm13, %v2024_v57, %v1682_v35 }
 0x324   :  { %v1810_v11 = vmul.f32 %v1686_v36, %v3177_v20 }
 0x325   :  { %v1610_v61 = vpop.xlane.xlu1 %1609 }
 0x326   :  { %v2026_v51 = vpop.eup %2025  ;;  %1826 = vst [vmem:[#allocation11 + $0x18] sm:$0xff] %v1810_v11  ;;  %v1636_v37 = vadd.f32 1e-30, %v1610_v61 }
 0x327   :  { %v1688_v34 = vmul.f32 %v2026_v51, %v1635_v13  ;;  %vm1694_vm14 = vweird.f32 %v2026_v51 }
 0x328   :  { %2027 = vrsqrt.f32 %v1636_v37  ;;  %vm1695_vm0 = vmor %vm1693_vm15, %vm1694_vm14  ;;  %vm1703_vm2 = vweird.f32 %v1636_v37 }
 0x329   :  { %v1689_v15 = vmul.f32 %v2026_v51, %v1688_v34 }
 0x32b   :  { %v1690_v56 = vmul.f32 0.5, %v1689_v15 }
 0x32d   :  { %v1691_v8 = vsub.f32 1.5, %v1690_v56 }
 0x32e   :  { %v2028_v49 = vpop.eup %2027 }
 0x32f   :  { %v1692_v19 = vmul.f32 %v2026_v51, %v1691_v8  ;;  %v1698_v45 = vmul.f32 %v2028_v49, %v1636_v37  ;;  %vm1704_vm1 = vweird.f32 %v2028_v49 }
 0x330   :  { %vm1705_vm3 = vmor %vm1703_vm2, %vm1704_vm1 }
 0x331   :  { %v1696_v47 = vsel %vm1695_vm0, %v2026_v51, %v1692_v19  ;;  %v1699_v21 = vmul.f32 %v2028_v49, %v1698_v45 }
 0x332   :  { %v1811_v33 = vmul.f32 %v1696_v47, %v3183_v46 }
 0x333   :  { %v1700_v20 = vmul.f32 0.5, %v1699_v21 }
 0x334   :  { %1827 = vst [vmem:[#allocation11 + $0x20] sm:$0xff] %v1811_v33 }
 0x335   :  { %v1701_v1 = vsub.f32 1.5, %v1700_v20 }
 0x337   :  { %v1702_v43 = vmul.f32 %v2028_v49, %v1701_v1  ;;  %v1612_v28 = vpop.xlane.xlu2 %1611 }
 0x338   :  { %v1637_v22 = vadd.f32 1e-30, %v1612_v28 }
 0x339   :  { %v1706_v53 = vsel %vm1705_vm3, %v2028_v49, %v1702_v43  ;;  %v1593_v43 = vmul.f32 %v3243_v5, %v3243_v5 }
 0x33a   :  { %v1812_v4 = vmul.f32 %v1706_v53, %v3189_v12  ;;  %2029 = vrsqrt.f32 %v1637_v22  ;;  %vm1713_vm5 = vweird.f32 %v1637_v22  ;;  %v1368_v12 = vpop.f32.mrf.mxu2 }
 0x33b   :  { %v3269_v29 = vadd.f32 %v3207_v40, %v1368_v12 }
 0x33c   :  { %1828 = vst [vmem:[#allocation11 + $0x28] sm:$0xff] %v1812_v4 }
 0x340   :  { %v2030_v63 = vpop.eup %2029 }
 0x341   :  { %v1708_v27 = vmul.f32 %v2030_v63, %v1637_v22  ;;  %vm1714_vm4 = vweird.f32 %v2030_v63 }
 0x342   :  { %vm1715_vm6 = vmor %vm1713_vm5, %vm1714_vm4  ;;  %v1371_v55 = vpop.f32.mrf.mxu2 }
 0x343   :  { %v1709_v14 = vmul.f32 %v2030_v63, %v1708_v27  ;;  %v3279_v19 = vadd.f32 %v3207_v40, %v1371_v55 }
 0x345   :  { %v1710_v59 = vmul.f32 0.5, %v1709_v14 }
 0x347   :  { %v1711_v38 = vsub.f32 1.5, %v1710_v59 }
 0x349   :  { %v1712_v46 = vmul.f32 %v2030_v63, %v1711_v38 }
 0x34b   :  { %v1716_v0 = vsel %vm1715_vm6, %v2030_v63, %v1712_v46  ;;  %v1594_v63 = vmul.f32 %v3255_v31, %v3255_v31 }
 0x34c   :  { %v1813_v6 = vmul.f32 %v1716_v0, %v3195_v25  ;;  %v1374_v25 = vpop.f32.mrf.mxu2 }
 0x34e   :  { %1829 = vst [vmem:[#allocation11 + $0x30] sm:$0xff] %v1813_v6  ;;  %v1596_v6 = vmul.f32 %v3231_v52, %v3231_v52 }
 0x353   :  { %v1395_v62 = vpop.f32.mrf.mxu3 }
 0x354   :  { %v3265_v18 = vadd.f32 %v3207_v40, %v1395_v62  ;;  %v1377_v13 = vpop.f32.mrf.mxu2  ;;  %v1592_v62 = vmul.f32 %v3235_v39, %v3235_v39 }
 0x355   :  { %v3304_v28 = vadd.f32 %v3207_v40, %v1377_v13 }
 0x356   :  { %1431 = vmax.xlane.f32.xlu2 %v3265_v18 }
 0x35e   :  { %1413 = vmax.xlane.f32.xlu2 %v3269_v29 }
 0x367   :  { %v1614_v48 = vpop.xlane.xlu0 %1613 }
 0x368   :  { %v1638_v60 = vadd.f32 1e-30, %v1614_v48  ;;  %v1408_v53 = vpop.xlane.xlu2 %1407 }
 0x369   :  { %v3318_v14 = vsub.f32 %v3216_v44, %v1408_v53 }
 0x36a   :  { %2031 = vrsqrt.f32 %v1638_v60  ;;  %vm1723_vm8 = vweird.f32 %v1638_v60 }
 0x36b   :  { %v1455_v38 = vmul.f32 1.442695, %v3318_v14 }
 0x370   :  { %v1616_v54 = vpop.xlane.xlu1 %1615  ;;  %v2032_v16 = vpop.eup %2031 }
 0x371   :  { %v1639_v23 = vadd.f32 1e-30, %v1616_v54  ;;  %v1718_v57 = vmul.f32 %v2032_v16, %v1638_v60  ;;  %vm1724_vm7 = vweird.f32 %v2032_v16  ;;  %v1410_v46 = vpop.xlane.xlu0 %1409  ;;  %v1595_v60 = vmul.f32 %v3201_v41, %v3201_v41 }
 0x372   :  { %vm1725_vm9 = vmor %vm1723_vm8, %vm1724_vm7  ;;  %v3331_v44 = vsub.f32 %v3227_v32, %v1410_v46 }
 0x373   :  { %2033 = vrsqrt.f32 %v1639_v23  ;;  %v1719_v3 = vmul.f32 %v2032_v16, %v1718_v57  ;;  %vm1733_vm12 = vweird.f32 %v1639_v23 }
 0x374   :  { %2035 = vpow2.f32 %v1455_v38  ;;  %v1457_v12 = vmul.f32 1.442695, %v3331_v44 }
 0x375   :  { %v1720_v17 = vmul.f32 0.5, %v1719_v3  ;;  %v1380_v37 = vpop.f32.mrf.mxu2 }
 0x376   :  { %v3290_v47 = vadd.f32 %v3207_v40, %v1380_v37  ;;  %2037 = vpow2.f32 %v1457_v12 }
 0x377   :  { %v1721_v42 = vsub.f32 1.5, %v1720_v17 }
 0x379   :  { %v2034_v30 = vpop.eup %2033  ;;  %v1722_v10 = vmul.f32 %v2032_v16, %v1721_v42 }
 0x37a   :  { %v1728_v24 = vmul.f32 %v2034_v30, %v1639_v23  ;;  %vm1734_vm10 = vweird.f32 %v2034_v30  ;;  %v2036_v55 = vpop.eup %2035 }
 0x37b   :  { %v1726_v58 = vsel %vm1725_vm9, %v2032_v16, %v1722_v10  ;;  %vm1735_vm11 = vmor %vm1733_vm12, %vm1734_vm10 }
 0x37c   :  { %v1729_v35 = vmul.f32 %v2034_v30, %v1728_v24  ;;  %v1814_v36 = vmul.f32 %v1726_v58, %v3210_v50  ;;  %v2038_v16 = vpop.eup %2037 }
 0x37e   :  { %v1730_v11 = vmul.f32 0.5, %v1729_v35  ;;  %1830 = vst [vmem:[#allocation11 + $0x38] sm:$0xff] %v1814_v36  ;;  %v1383_v49 = vpop.f32.mrf.mxu2 }
 0x37f   :  { %v3299_v1 = vadd.f32 %v3207_v40, %v1383_v49 }
 0x380   :  { %v1731_v61 = vsub.f32 1.5, %v1730_v11 }
 0x382   :  { %v1732_v51 = vmul.f32 %v2034_v30, %v1731_v61 }
 0x383   :  { %v1398_v56 = vpop.f32.mrf.mxu3 }
 0x384   :  { %v1736_v34 = vsel %vm1735_vm11, %v2034_v30, %v1732_v51  ;;  %v3275_v8 = vadd.f32 %v3207_v40, %v1398_v56 }
 0x385   :  { %v1815_v15 = vmul.f32 %v1736_v34, %v3220_v9  ;;  %v3287_v9 = vadd.f32 %v3207_v40, %v1374_v25  ;;  %v1598_v25 = vmul.f32 %v3252_v7, %v3252_v7 }
 0x386   :  { %1433 = vmax.xlane.f32.xlu0 %v3275_v8  ;;  %v1386_v33 = vpop.f32.mrf.mxu2 }
 0x387   :  { %1831 = vst [vmem:[#allocation11 + $0x40] sm:$0xff] %v1815_v15  ;;  %v3314_v27 = vadd.f32 %v3207_v40, %v1386_v33 }
 0x389   :  { %v1412_v48 = vpop.xlane.xlu1 %1411 }
 0x38a   :  { %v3339_v54 = vsub.f32 %v3248_v2, %v1412_v48 }
 0x38b   :  { %v1401_v50 = vpop.f32.mrf.mxu3 }
 0x38c   :  { %v3282_v45 = vadd.f32 %v3207_v40, %v1401_v50  ;;  %v1459_v32 = vmul.f32 1.442695, %v3339_v54 }
 0x38e   :  { %1435 = vmax.xlane.f32.xlu1 %v3282_v45  ;;  %1415 = vmax.xlane.f32.xlu0 %v3279_v19  ;;  %v1389_v22 = vpop.f32.mrf.mxu2  ;;  %2039 = vpow2.f32 %v1459_v32 }
 0x38f   :  { %v3309_v4 = vadd.f32 %v3207_v40, %v1389_v22 }
 0x394   :  { %v1404_v21 = vpop.f32.mrf.mxu3  ;;  %v2040_v17 = vpop.eup %2039 }
 0x395   :  { %v3293_v20 = vadd.f32 %v3207_v40, %v1404_v21 }
 0x396   :  { %1417 = vmax.xlane.f32.xlu1 %v3287_v9  ;;  %1421 = vmax.xlane.f32.xlu0 %v3290_v47  ;;  %v1392_v59 = vpop.f32.mrf.mxu2 }
 0x397   :  { %1437 = vmax.xlane.f32.xlu2 %v3293_v20  ;;  %v3323_v0 = vadd.f32 %v3207_v40, %v1392_v59  ;;  %v1597_v40 = vmul.f32 %v3240_v26, %v3240_v26 }
 0x39e   :  { %1423 = vmax.xlane.f32.xlu1 %v3299_v1  ;;  %1619 = vadd.xlane.f32.xlu0 %v1593_v43 }
 0x39f   :  { %1419 = vmax.xlane.f32.xlu2 %v3304_v28 }
 0x3a6   :  { %1621 = vadd.xlane.f32.xlu1 %v1594_v63  ;;  %1427 = vmax.xlane.f32.xlu0 %v3309_v4 }
 0x3a7   :  { %1425 = vmax.xlane.f32.xlu2 %v3314_v27 }
 0x3ae   :  { %1429 = vmax.xlane.f32.xlu1 %v3323_v0  ;;  %1625 = vadd.xlane.f32.xlu0 %v1596_v6 }
 0x3af   :  { %1617 = vadd.xlane.f32.xlu2 %v1592_v62 }
 0x3b6   :  { %1627 = vadd.xlane.f32.xlu1 %v1597_v40  ;;  %1487 = vadd.xlane.f32.xlu0 %v2036_v55 }
 0x3b7   :  { %1623 = vadd.xlane.f32.xlu2 %v1595_v60 }
 0x3be   :  { %1489 = vadd.xlane.f32.xlu1 %v2038_v16 }
 0x3bf   :  { %1629 = vadd.xlane.f32.xlu2 %v1598_v25 }
 0x3c7   :  { %1491 = vadd.xlane.f32.xlu2 %v2040_v17 }
 0x3c9   :  { %v1432_v23 = vpop.xlane.xlu2 %1431 }
 0x3ca   :  { %v3345_v57 = vsub.f32 %v3265_v18, %v1432_v23 }
 0x3cc   :  { %v1479_v3 = vmul.f32 1.442695, %v3345_v57 }
 0x3ce   :  { %2041 = vpow2.f32 %v1479_v3 }
 0x3d1   :  { %v1414_v2 = vpop.xlane.xlu2 %1413 }
 0x3d2   :  { %v3349_v42 = vsub.f32 %v3269_v29, %v1414_v2 }
 0x3d4   :  { %v2042_v30 = vpop.eup %2041  ;;  %v1461_v10 = vmul.f32 1.442695, %v3349_v42 }
 0x3d5   :  { %1511 = vadd.xlane.f32.xlu1 %v2042_v30 }
 0x3d6   :  { %2043 = vpow2.f32 %v1461_v10 }
 0x3dc   :  { %v2044_v24 = vpop.eup %2043 }
 0x3dd   :  { %1493 = vadd.xlane.f32.xlu0 %v2044_v24 }
 0x3f9   :  { %v1434_v13 = vpop.xlane.xlu0 %1433 }
 0x3fa   :  { %v3374_v22 = vsub.f32 %v3275_v8, %v1434_v13 }
 0x401   :  { %v3352_v58 = vpop.xlane.xlu1 %1435  ;;  %v1416_v18 = vpop.xlane.xlu0 %1415 }
 0x402   :  { %v3355_v35 = vsub.f32 %v3279_v19, %v1416_v18 }
 0x404   :  { %v1463_v36 = vmul.f32 1.442695, %v3355_v35 }
 0x406   :  { %2045 = vpow2.f32 %v1463_v36 }
 0x409   :  { %v1418_v11 = vpop.xlane.xlu1 %1417  ;;  %v1422_v29 = vpop.xlane.xlu0 %1421 }
 0x40a   :  { %v3359_v61 = vsub.f32 %v3287_v9, %v1418_v11  ;;  %v1438_v51 = vpop.xlane.xlu2 %1437  ;;  %v3362_v37 = vsub.f32 %v3290_v47, %v1422_v29 }
 0x40b   :  { %v3379_v46 = vsub.f32 %v3293_v20, %v1438_v51 }
 0x40c   :  { %v1465_v34 = vmul.f32 1.442695, %v3359_v61  ;;  %v1469_v15 = vmul.f32 1.442695, %v3362_v37  ;;  %v2046_v56 = vpop.eup %2045 }
 0x40d   :  { %1495 = vadd.xlane.f32.xlu1 %v2046_v56  ;;  %v1485_v16 = vmul.f32 1.442695, %v3379_v46 }
 0x40e   :  { %2047 = vpow2.f32 %v1465_v34  ;;  %v3406_v34 = vsub.f32 %v3282_v45, %v3352_v58 }
 0x40f   :  { %2049 = vpow2.f32 %v1469_v15 }
 0x411   :  { %v1424_v49 = vpop.xlane.xlu1 %1423  ;;  %v1620_v50 = vpop.xlane.xlu0 %1619 }
 0x412   :  { %v3367_v19 = vsub.f32 %v3299_v1, %v1424_v49  ;;  %v1420_v21 = vpop.xlane.xlu2 %1419  ;;  %v1641_v9 = vadd.f32 1e-30, %v1620_v50  ;;  %v1481_v1 = vmul.f32 1.442695, %v3374_v22 }
 0x413   :  { %v3370_v33 = vsub.f32 %v3304_v28, %v1420_v21 }
 0x414   :  { %v2048_v47 = vpop.eup %2047  ;;  %v1471_v43 = vmul.f32 1.442695, %v3367_v19  ;;  %2051 = vrsqrt.f32 %v1641_v9  ;;  %vm1753_vm14 = vweird.f32 %v1641_v9 }
 0x415   :  { %v1467_v53 = vmul.f32 1.442695, %v3370_v33  ;;  %1497 = vadd.xlane.f32.xlu2 %v2048_v47  ;;  %v2050_v63 = vpop.eup %2049 }
 0x416   :  { %2053 = vpow2.f32 %v1471_v43  ;;  %1501 = vadd.xlane.f32.xlu1 %v2050_v63  ;;  %v1483_v43 = vmul.f32 1.442695, %v3406_v34 }
 0x417   :  { %2055 = vpow2.f32 %v1467_v53 }
 0x419   :  { %v1622_v59 = vpop.xlane.xlu1 %1621  ;;  %v1428_v38 = vpop.xlane.xlu0 %1427 }
 0x41a   :  { %v2052_v28 = vpop.eup %2051  ;;  %v3381_v6 = vadd.f32 1e-30, %v1622_v59  ;;  %v1426_v62 = vpop.xlane.xlu2 %1425  ;;  %v3384_v8 = vsub.f32 %v3309_v4, %v1428_v38 }
 0x41b   :  { %v1748_v12 = vmul.f32 %v2052_v28, %v1641_v9  ;;  %v3387_v40 = vsub.f32 %v3314_v27, %v1426_v62  ;;  %vm1754_vm13 = vweird.f32 %v2052_v28 }
 0x41c   :  { %v2054_v55 = vpop.eup %2053  ;;  %2057 = vrsqrt.f32 %v3381_v6  ;;  %v1475_v48 = vmul.f32 1.442695, %v3384_v8  ;;  %vm1755_vm15 = vmor %vm1753_vm14, %vm1754_vm13  ;;  %vm1763_vm1 = vweird.f32 %v3381_v6 }
 0x41d   :  { %v2056_v60 = vpop.eup %2055  ;;  %2059 = vpow2.f32 %v1481_v1  ;;  %v1749_v32 = vmul.f32 %v2052_v28, %v1748_v12  ;;  %v1473_v20 = vmul.f32 1.442695, %v3387_v40  ;;  %1503 = vadd.xlane.f32.xlu2 %v2054_v55 }
 0x41e   :  { %2061 = vpow2.f32 %v1475_v48  ;;  %1499 = vadd.xlane.f32.xlu0 %v2056_v60 }
 0x41f   :  { %v1750_v4 = vmul.f32 0.5, %v1749_v32  ;;  %2063 = vpow2.f32 %v1473_v20 }
 0x420   :  { %2065 = vpow2.f32 %v1485_v16 }
 0x421   :  { %v1751_v25 = vsub.f32 1.5, %v1750_v4  ;;  %v1430_v27 = vpop.xlane.xlu1 %1429  ;;  %v1626_v23 = vpop.xlane.xlu0 %1625 }
 0x422   :  { %v2058_v3 = vpop.eup %2057  ;;  %v3394_v17 = vsub.f32 %v3323_v0, %v1430_v27  ;;  %v1618_v2 = vpop.xlane.xlu2 %1617  ;;  %v3396_v30 = vadd.f32 1e-30, %v1626_v23 }
 0x423   :  { %v2060_v10 = vpop.eup %2059  ;;  %v1752_v24 = vmul.f32 %v2052_v28, %v1751_v25  ;;  %v1758_v13 = vmul.f32 %v2058_v3, %v3381_v6  ;;  %v3399_v18 = vadd.f32 1e-30, %v1618_v2  ;;  %vm1764_vm0 = vweird.f32 %v2058_v3 }
 0x424   :  { %v2062_v36 = vpop.eup %2061  ;;  %v1477_v11 = vmul.f32 1.442695, %v3394_v17  ;;  %2067 = vrsqrt.f32 %v3396_v30  ;;  %vm1765_vm2 = vmor %vm1763_vm1, %vm1764_vm0  ;;  %vm1783_vm5 = vweird.f32 %v3396_v30 }
 0x425   :  { %v2064_v29 = vpop.eup %2063  ;;  %v1756_v51 = vsel %vm1755_vm15, %v2052_v28, %v1752_v24  ;;  %v1759_v0 = vmul.f32 %v2058_v3, %v1758_v13  ;;  %2069 = vrsqrt.f32 %v3399_v18  ;;  %1513 = vadd.xlane.f32.xlu2 %v2060_v10  ;;  %1507 = vadd.xlane.f32.xlu1 %v2062_v36  ;;  %vm1743_vm6 = vweird.f32 %v3399_v18 }
 0x426   :  { %v1817_v15 = vmul.f32 %v1756_v51, %v3243_v5  ;;  %2071 = vpow2.f32 %v1477_v11  ;;  %1505 = vadd.xlane.f32.xlu0 %v2064_v29  ;;  %v2066_v49 = vpop.eup %2065 }
 0x427   :  { %v1760_v56 = vmul.f32 0.5, %v1759_v0 }
 0x428   :  { %1833 = vst [vmem:[#allocation11 + $0x50] sm:$0xff] %v1817_v15 }
 0x429   :  { %v1761_v50 = vsub.f32 1.5, %v1760_v56  ;;  %v1628_v21 = vpop.xlane.xlu1 %1627  ;;  %v1488_v9 = vpop.xlane.xlu0 %1487 }
 0x42a   :  { %v2068_v47 = vpop.eup %2067  ;;  %v3410_v53 = vadd.f32 1e-30, %v1628_v21  ;;  %v1624_v63 = vpop.xlane.xlu2 %1623  ;;  %2073 = vlog2.f32 %v1488_v9 }
 0x42b   :  { %v2070_v45 = vpop.eup %2069  ;;  %v1762_v58 = vmul.f32 %v2058_v3, %v1761_v50  ;;  %v1778_v5 = vmul.f32 %v2068_v47, %v3396_v30  ;;  %v3414_v1 = vadd.f32 1e-30, %v1624_v63  ;;  %vm1784_vm3 = vweird.f32 %v2068_v47 }
 0x42c   :  { %v2072_v59 = vpop.eup %2071  ;;  %v1738_v38 = vmul.f32 %v2070_v45, %v3399_v18  ;;  %2075 = vrsqrt.f32 %v3410_v53  ;;  %vm1744_vm4 = vweird.f32 %v2070_v45  ;;  %vm1785_vm7 = vmor %vm1783_vm5, %vm1784_vm3  ;;  %vm1793_vm12 = vweird.f32 %v3410_v53 }
 0x42d   :  { %v1766_v28 = vsel %vm1765_vm2, %v2058_v3, %v1762_v58  ;;  %v1779_v62 = vmul.f32 %v2068_v47, %v1778_v5  ;;  %2077 = vrsqrt.f32 %v3414_v1  ;;  %1517 = vadd.xlane.f32.xlu1 %v2066_v49  ;;  %vm1745_vm8 = vmor %vm1743_vm6, %vm1744_vm4  ;;  %vm1773_vm13 = vweird.f32 %v3414_v1 }
 0x42e   :  { %v1818_v12 = vmul.f32 %v1766_v28, %v3255_v31  ;;  %v1739_v55 = vmul.f32 %v2070_v45, %v1738_v38  ;;  %1509 = vadd.xlane.f32.xlu0 %v2072_v59  ;;  %2079 = vpow2.f32 %v1483_v43 }
 0x42f   :  { %v1780_v6 = vmul.f32 0.5, %v1779_v62 }
 0x430   :  { %v2074_v48 = vpop.eup %2073  ;;  %1834 = vst [vmem:[#allocation11 + $0x58] sm:$0xff] %v1818_v12  ;;  %v1740_v60 = vmul.f32 0.5, %v1739_v55 }
 0x431   :  { %v1781_v32 = vsub.f32 1.5, %v1780_v6  ;;  %v1520_v20 = vmul.f32 0.6931472, %v2074_v48  ;;  %v1490_v16 = vpop.xlane.xlu1 %1489 }
 0x432   :  { %v2076_v4 = vpop.eup %2075  ;;  %v1741_v25 = vsub.f32 1.5, %v1740_v60  ;;  %v1630_v27 = vpop.xlane.xlu2 %1629  ;;  %2081 = vlog2.f32 %v1490_v16 }
 0x433   :  { %v2078_v23 = vpop.eup %2077  ;;  %v1782_v3 = vmul.f32 %v2068_v47, %v1781_v32  ;;  %v1788_v31 = vmul.f32 %v2076_v4, %v3410_v53  ;;  %v1551_v2 = vsub.f32 %v3318_v14, %v1520_v20  ;;  %v1646_v13 = vadd.f32 1e-30, %v1630_v27 }
 0x434   :  { %v1742_v10 = vmul.f32 %v2070_v45, %v1741_v25  ;;  %v1768_v24 = vmul.f32 %v2078_v23, %v3414_v1  ;;  %v2080_v36 = vpop.eup %2079  ;;  %vm1794_vm9 = vweird.f32 %v2076_v4  ;;  %vm1774_vm10 = vweird.f32 %v2078_v23 }
 0x435   :  { %v1786_v11 = vsel %vm1785_vm7, %v2068_v47, %v1782_v3  ;;  %v1789_v29 = vmul.f32 %v2076_v4, %v1788_v31  ;;  %1567 = vst [vmem:[#allocation10] sm:$0xff] %v1551_v2  ;;  %2083 = vrsqrt.f32 %v1646_v13  ;;  %vm1795_vm11 = vmor %vm1793_vm12, %vm1794_vm9  ;;  %vm1803_vm0 = vweird.f32 %v1646_v13 }
 0x436   :  { %v1746_v51 = vsel %vm1745_vm8, %v2070_v45, %v1742_v10  ;;  %v1820_v30 = vmul.f32 %v1786_v11, %v3231_v52  ;;  %v1769_v0 = vmul.f32 %v2078_v23, %v1768_v24  ;;  %1515 = vadd.xlane.f32.xlu0 %v2080_v36  ;;  %vm1775_vm14 = vmor %vm1773_vm13, %vm1774_vm10 }
 0x437   :  { %v1816_v14 = vmul.f32 %v1746_v51, %v3235_v39  ;;  %v1790_v15 = vmul.f32 0.5, %v1789_v29 }
 0x438   :  { %v2082_v18 = vpop.eup %2081  ;;  %1836 = vst [vmem:[#allocation11 + $0x68] sm:$0xff] %v1820_v30  ;;  %v1770_v56 = vmul.f32 0.5, %v1769_v0 }
 0x439   :  { %1832 = vst [vmem:[#allocation11 + $0x48] sm:$0xff] %v1816_v14  ;;  %v1791_v49 = vsub.f32 1.5, %v1790_v15  ;;  %v1522_v50 = vmul.f32 0.6931472, %v2082_v18 }
 0x43a   :  { %v1771_v21 = vsub.f32 1.5, %v1770_v56  ;;  %v1492_v9 = vpop.xlane.xlu2 %1491 }
 0x43b   :  { %v1792_v47 = vmul.f32 %v2076_v4, %v1791_v49  ;;  %v1552_v52 = vsub.f32 %v3331_v44, %v1522_v50  ;;  %2085 = vlog2.f32 %v1492_v9  ;;  %v2084_v43 = vpop.eup %2083 }
 0x43c   :  { %v1772_v39 = vmul.f32 %v2078_v23, %v1771_v21  ;;  %v1798_v45 = vmul.f32 %v2084_v43, %v1646_v13  ;;  %vm1804_vm15 = vweird.f32 %v2084_v43 }
 0x43d   :  { %v1796_v63 = vsel %vm1795_vm11, %v2076_v4, %v1792_v47  ;;  %1568 = vst [vmem:[#allocation10 + $0x8] sm:$0xff] %v1552_v52  ;;  %vm1805_vm1 = vmor %vm1803_vm0, %vm1804_vm15 }
 0x43e   :  { %v1821_v58 = vmul.f32 %v1796_v63, %v3240_v26  ;;  %v1776_v5 = vsel %vm1775_vm14, %v2078_v23, %v1772_v39  ;;  %v1799_v38 = vmul.f32 %v2084_v43, %v1798_v45 }
 0x43f   :  { %v1819_v59 = vmul.f32 %v1776_v5, %v3201_v41 }
 0x440   :  { %1837 = vst [vmem:[#allocation11 + $0x70] sm:$0xff] %v1821_v58  ;;  %v1800_v44 = vmul.f32 0.5, %v1799_v38 }
 0x441   :  { %v2086_v28 = vpop.eup %2085  ;;  %1835 = vst [vmem:[#allocation11 + $0x60] sm:$0xff] %v1819_v59 }
 0x442   :  { %v1524_v62 = vmul.f32 0.6931472, %v2086_v28  ;;  %v1801_v12 = vsub.f32 1.5, %v1800_v44 }
 0x444   :  { %v1553_v1 = vsub.f32 %v3339_v54, %v1524_v62  ;;  %v1802_v55 = vmul.f32 %v2084_v43, %v1801_v12 }
 0x446   :  { %1569 = vst [vmem:[#allocation10 + $0x10] sm:$0xff] %v1553_v1  ;;  %v1806_v26 = vsel %vm1805_vm1, %v2084_v43, %v1802_v55 }
 0x447   :  { %v1822_v6 = vmul.f32 %v1806_v26, %v3252_v7 }
 0x448   :  { %v1512_v53 = vpop.xlane.xlu1 %1511 }
 0x449   :  { %2087 = vlog2.f32 %v1512_v53  ;;  %1838 = vst [vmem:[#allocation11 + $0x78] sm:$0xff] %v1822_v6 }
 0x44a   :  { %1864 = dma.vmem_to_hbm [thread:$0]  %s1857_s29, 2048, %s1859_s10, [#allocation12], %s2269_s13, %s2269_s13, %s2270_s14  }
 0x44f   :  { %v2088_v41 = vpop.eup %2087 }
 0x450   :  { %v1494_v48 = vpop.xlane.xlu0 %1493  ;;  %v1544_v60 = vmul.f32 0.6931472, %v2088_v41 }
 0x451   :  { %2089 = vlog2.f32 %v1494_v48 }
 0x452   :  { %v1563_v54 = vsub.f32 %v3345_v57, %v1544_v60 }
 0x454   :  { %1579 = vst [vmem:[#allocation10 + $0x60] sm:$0xff] %v1563_v54 }
 0x457   :  { %v2090_v32 = vpop.eup %2089 }
 0x458   :  { %v1526_v20 = vmul.f32 0.6931472, %v2090_v32 }
 0x45a   :  { %v1554_v16 = vsub.f32 %v3349_v42, %v1526_v20 }
 0x45c   :  { %1570 = vst [vmem:[#allocation10 + $0x18] sm:$0xff] %v1554_v16 }
 0x480   :  { %v1496_v4 = vpop.xlane.xlu1 %1495 }
 0x481   :  { %2091 = vlog2.f32 %v1496_v4 }
 0x487   :  { %v2092_v7 = vpop.eup %2091 }
 0x488   :  { %v1498_v25 = vpop.xlane.xlu2 %1497  ;;  %v1528_v27 = vmul.f32 0.6931472, %v2092_v7 }
 0x489   :  { %2093 = vlog2.f32 %v1498_v25  ;;  %v1502_v23 = vpop.xlane.xlu1 %1501 }
 0x48a   :  { %v1555_v3 = vsub.f32 %v3355_v35, %v1528_v27  ;;  %2095 = vlog2.f32 %v1502_v23 }
 0x48c   :  { %1571 = vst [vmem:[#allocation10 + $0x20] sm:$0xff] %v1555_v3 }
 0x48f   :  { %v2094_v57 = vpop.eup %2093 }
 0x490   :  { %v1530_v31 = vmul.f32 0.6931472, %v2094_v57  ;;  %v1504_v2 = vpop.xlane.xlu2 %1503  ;;  %v2096_v10 = vpop.eup %2095 }
 0x491   :  { %2097 = vlog2.f32 %v1504_v2  ;;  %v1500_v24 = vpop.xlane.xlu0 %1499  ;;  %v1534_v13 = vmul.f32 0.6931472, %v2096_v10 }
 0x492   :  { %v1556_v42 = vsub.f32 %v3359_v61, %v1530_v31  ;;  %2099 = vlog2.f32 %v1500_v24 }
 0x493   :  { %v1558_v36 = vsub.f32 %v3362_v37, %v1534_v13 }
 0x494   :  { %1572 = vst [vmem:[#allocation10 + $0x28] sm:$0xff] %v1556_v42 }
 0x495   :  { %1574 = vst [vmem:[#allocation10 + $0x38] sm:$0xff] %v1558_v36 }
 0x497   :  { %v2098_v11 = vpop.eup %2097 }
 0x498   :  { %v2100_v29 = vpop.eup %2099  ;;  %v1536_v51 = vmul.f32 0.6931472, %v2098_v11  ;;  %v1514_v35 = vpop.xlane.xlu2 %1513 }
 0x499   :  { %v1508_v30 = vpop.xlane.xlu1 %1507  ;;  %v1532_v0 = vmul.f32 0.6931472, %v2100_v29  ;;  %2101 = vlog2.f32 %v1514_v35  ;;  %v1506_v14 = vpop.xlane.xlu0 %1505 }
 0x49a   :  { %v1559_v15 = vsub.f32 %v3367_v19, %v1536_v51  ;;  %2103 = vlog2.f32 %v1508_v30 }
 0x49b   :  { %v1557_v18 = vsub.f32 %v3370_v33, %v1532_v0  ;;  %2105 = vlog2.f32 %v1506_v14 }
 0x49c   :  { %1575 = vst [vmem:[#allocation10 + $0x40] sm:$0xff] %v1559_v15 }
 0x49d   :  { %1573 = vst [vmem:[#allocation10 + $0x30] sm:$0xff] %v1557_v18 }
 0x49f   :  { %v2102_v61 = vpop.eup %2101 }
 0x4a0   :  { %v2104_v56 = vpop.eup %2103  ;;  %v1546_v37 = vmul.f32 0.6931472, %v2102_v61 }
 0x4a1   :  { %v1518_v49 = vpop.xlane.xlu1 %1517  ;;  %v2106_v50 = vpop.eup %2105  ;;  %v1540_v21 = vmul.f32 0.6931472, %v2104_v56 }
 0x4a2   :  { %2107 = vlog2.f32 %v1518_v49  ;;  %v1510_v9 = vpop.xlane.xlu0 %1509  ;;  %v1564_v47 = vsub.f32 %v3374_v22, %v1546_v37  ;;  %v1538_v52 = vmul.f32 0.6931472, %v2106_v50 }
 0x4a3   :  { %2109 = vlog2.f32 %v1510_v9  ;;  %v1561_v19 = vsub.f32 %v3384_v8, %v1540_v21 }
 0x4a4   :  { %1580 = vst [vmem:[#allocation10 + $0x68] sm:$0xff] %v1564_v47  ;;  %v1560_v33 = vsub.f32 %v3387_v40, %v1538_v52 }
 0x4a5   :  { %1577 = vst [vmem:[#allocation10 + $0x50] sm:$0xff] %v1561_v19 }
 0x4a6   :  { %1576 = vst [vmem:[#allocation10 + $0x48] sm:$0xff] %v1560_v33 }
 0x4a8   :  { %v2108_v43 = vpop.eup %2107 }
 0x4a9   :  { %v2110_v39 = vpop.eup %2109  ;;  %v1550_v63 = vmul.f32 0.6931472, %v2108_v43 }
 0x4aa   :  { %v1542_v45 = vmul.f32 0.6931472, %v2110_v39  ;;  %v1516_v58 = vpop.xlane.xlu0 %1515 }
 0x4ab   :  { %v1566_v5 = vsub.f32 %v3379_v46, %v1550_v63  ;;  %2111 = vlog2.f32 %v1516_v58 }
 0x4ac   :  { %v1562_v59 = vsub.f32 %v3394_v17, %v1542_v45 }
 0x4ad   :  { %1582 = vst [vmem:[#allocation10 + $0x78] sm:$0xff] %v1566_v5 }
 0x4ae   :  { %1578 = vst [vmem:[#allocation10 + $0x58] sm:$0xff] %v1562_v59 }
 0x4b1   :  { %v2112_v22 = vpop.eup %2111 }
 0x4b2   :  { %v1548_v8 = vmul.f32 0.6931472, %v2112_v22 }
 0x4b4   :  { %v1565_v40 = vsub.f32 %v3406_v34, %v1548_v8 }
 0x4b6   :  { %1581 = vst [vmem:[#allocation10 + $0x70] sm:$0xff] %v1565_v40 }
 0x4b7   :  { %1851 = dma.vmem_to_hbm [thread:$0]  %s1844_s11, 2048, %s1846_s16, [#allocation4], %s2269_s13, %s2269_s13, %s2270_s14  }
 0x4b8   :  { %2264 = dma.done.wait [#allocation4], 2048  }
 0x4b9   :  { %2265 = vsyncadd [#allocation4], 4294965248 }
 0x4ba   :  { %2266 = dma.done.wait [#allocation12], 2048  }
 0x4bb   :  { %2267 = vsyncadd [#allocation12], 4294965248 }
 0x4bc   :  { %1873 = vsyncpa [#allocation3], 1 }
 0x4bd   :  { %1874 = vsyncpa [#allocation6], 1 }
 0x4be   :  { %1875 = vsyncpa [#allocation9], 1 }
 0x4bf   :  { %1876 = vsyncpa [#allocation4], 1 }
 0x4c0   :  { %1877 = vsyncpa [#allocation12], 1 }

</bundles_post_ra>
